<compile_context>
chip_gen: v7x
topology: tpu7x:2x2x1
jax: 0.10.0
libtpu: 0.0.40
codegen_flags: <defaults>
</compile_context>

<pallas_src>
import functools

import numpy as np
import jax
import jax.numpy as jnp
from jax import lax
from jax.experimental import pallas as pl
from jax.experimental.pallas import tpu as pltpu


# ----------------------------------------------------------------------------
# Fused per-batch kernel (time-major): QKV proj -> circular corr -> softmax
# stats -> top-k -> per-channel roll/weight -> split final projection.
# ----------------------------------------------------------------------------
def _autocorrelation_kernel(xq_ref, xk_ref, xv_ref, wqkv_ref, bqkv_ref,
                            wf_ref, bf_ref, o_ref, krow_ref, *, tk, unroll):
    f32 = jnp.float32
    hi = lax.Precision.HIGHEST

    xq = xq_ref[0]                                   # (T, C), channels on lanes
    xk = xk_ref[0]
    xv = xv_ref[0]
    T, C = xq.shape

    # --- Q/K/V projections on the MXU: (T, C) @ (C, C), K = N = d_model.
    q = jnp.dot(xq, wqkv_ref[0], preferred_element_type=f32, precision=hi) + bqkv_ref[0]
    k = jnp.dot(xk, wqkv_ref[1], preferred_element_type=f32, precision=hi) + bqkv_ref[1]
    v = jnp.dot(xv, wqkv_ref[2], preferred_element_type=f32, precision=hi) + bqkv_ref[2]

    # --- stage K's lag rows into a (T, 1, C) scratch: the correlation loop then
    #     reads k[s, :] with a dynamic index on the MAJOR axis only (cheap load,
    #     no dynamic sublane indexing, no per-lag lane-broadcast relayout).
    for s in range(T):                               # static one-time staging
        krow_ref[s] = k[s:s + 1, :]

    # --- circular cross-correlation over all T lags (== irfft(rfft(q)*conj(rfft(k)))/T):
    #       corr[tau, c] = (1/T) * sum_s k[s, c] * q[(tau + s) % T, c]
    #     fori_loop bounds vreg live ranges; the carried q_rot advances by a
    #     constant sublane roll (XLU) and each lag adds one broadcast-row FMA (VPU).
    def corr_body(g, carry):
        corr, q_rot = carry
        for j in range(unroll):                      # manual unroll for scheduler visibility
            s = g * unroll + j
            corr = corr + krow_ref[s] * q_rot        # q_rot == roll(q, -s, axis=0)
            q_rot = pltpu.roll(q_rot, T - 1, axis=0) # advance to roll(q, -(s+1))
        return corr, q_rot

    corr, _ = lax.fori_loop(0, T // unroll, corr_body,
                            (jnp.zeros((T, C), f32), q))
    corr = corr * (1.0 / T)

    # --- softmax statistics only (no full softmax tile materialized):
    #     softmax(corr)[lag] = exp(corr[lag] - mx) / denom.
    mx = jnp.max(corr, axis=0, keepdims=True)                      # (1, C)
    denom = jnp.sum(jnp.exp(corr - mx), axis=0, keepdims=True)     # (1, C)
    inv_denom = 1.0 / denom

    # --- top-k lags per channel via iterative argmax (lowest index wins ties),
    #     masking out exactly the chosen lag each round; the selected softmax
    #     weight comes directly from the argmax value m_i.
    iota_t = lax.broadcasted_iota(jnp.int32, (T, C), 0)
    big_neg = jnp.float32(-1e30)
    work = corr
    shifts, wsels = [], []
    for _ in range(tk):
        m_i = jnp.max(work, axis=0, keepdims=True)                 # (1, C)
        sh_i = jnp.min(jnp.where(work == m_i, iota_t, T),
                       axis=0, keepdims=True)                      # (1, C) int32
        shifts.append(sh_i)
        wsels.append(jnp.exp(m_i - mx) * inv_denom)                # (1, C)
        work = jnp.where(iota_t == sh_i, big_neg, work)

    # --- per-channel circular roll of V by its selected lags: one sweep over the
    #     T rolls (carried roll-by-one), selecting into tk accumulators.
    # TODO(synk): at production T replace this O(T) select sweep with a
    # scalar-prefetch DMA gather over a time-doubled V in a second pallas_call.
    def roll_body(g, carry):
        accs = list(carry[:tk])
        v_rot = carry[tk]
        for j in range(unroll):
            s = g * unroll + j
            for i in range(tk):
                accs[i] = jnp.where(shifts[i] == s, v_rot, accs[i])
            v_rot = pltpu.roll(v_rot, 1, axis=0)     # v_rot == roll(v, s+1, axis=0)
        return (*accs, v_rot)

    init = tuple(jnp.zeros((T, C), f32) for _ in range(tk)) + (v,)
    res = lax.fori_loop(0, T // unroll, roll_body, init)

    # --- weighting fused into a SPLIT final projection (no (C*tk, T) concat):
    #     out = bias + sum_i (rolled_i * wsel_i) @ WfT_i ,  each dot K=N=d_model.
    out = jnp.dot(res[0] * wsels[0], wf_ref[0],
                  preferred_element_type=f32, precision=hi)
    for i in range(1, tk):
        out = out + jnp.dot(res[i] * wsels[i], wf_ref[i],
                            preferred_element_type=f32, precision=hi)
    o_ref[0] = out + bf_ref[...]                     # lane-dense (T, C) store


def auto_correlation_pallas(query, key, value, params, top_k):
    """query/key/value: (B, d_model, T) channels-first, like the PyTorch module."""
    B, C, T = query.shape
    tk = min(top_k, T // 2)
    assert tk >= 1
    unroll = 4 if T % 4 == 0 else (2 if T % 2 == 0 else 1)

    # Lane-dense time-major layout (layout plumbing, not compute): channels go
    # on the lane axis so every in-kernel op / the output store is full width.
    q_tm = jnp.transpose(query, (0, 2, 1))           # (B, T, C)
    k_tm = jnp.transpose(key, (0, 2, 1))
    v_tm = jnp.transpose(value, (0, 2, 1))

    # Pre-transposed weights: projections become x(T,C) @ W^T(C,C) on the MXU.
    w_qkv = jnp.stack([params["wq"].T, params["wk"].T, params["wv"].T], axis=0)      # (3, C, C)
    b_qkv = jnp.stack([params["bq"], params["bk"], params["bv"]], axis=0)[:, None, :]  # (3, 1, C)
    w_f = jnp.transpose(params["wf"]).reshape(tk, C, C)                                # (tk, C, C)
    b_f = params["bf"][None, :]                                                        # (1, C)

    kern = functools.partial(_autocorrelation_kernel, tk=tk, unroll=unroll)
    out_tm = pl.pallas_call(
        kern,
        grid=(B,),                                   # B >= 2 keeps both v7x TCs busy
        in_specs=[
            pl.BlockSpec((1, T, C), lambda b: (b, 0, 0)),       # query  (time-major)
            pl.BlockSpec((1, T, C), lambda b: (b, 0, 0)),       # key
            pl.BlockSpec((1, T, C), lambda b: (b, 0, 0)),       # value
            pl.BlockSpec((3, C, C), lambda b: (0, 0, 0)),       # W_q^T / W_k^T / W_v^T
            pl.BlockSpec((3, 1, C), lambda b: (0, 0, 0)),       # biases
            pl.BlockSpec((tk, C, C), lambda b: (0, 0, 0)),      # W_final^T split per top-k slot
            pl.BlockSpec((1, C), lambda b: (0, 0)),             # final bias
        ],
        out_specs=pl.BlockSpec((1, T, C), lambda b: (b, 0, 0)),
        out_shape=jax.ShapeDtypeStruct((B, T, C), jnp.float32),
        scratch_shapes=[pltpu.VMEM((T, 1, C), jnp.float32)],    # staged K lag rows
        compiler_params=pltpu.CompilerParams(
            dimension_semantics=("parallel",),
            vmem_limit_bytes=32 * 1024 * 1024),
    )(q_tm, k_tm, v_tm, w_qkv, b_qkv, w_f, b_f)

    return jnp.transpose(out_tm, (0, 2, 1))          # back to (B, C, T)


# ----------------------------------------------------------------------------
# Pure-JAX reference mirroring the PyTorch module (FFT-based), for validation.
# ----------------------------------------------------------------------------
def auto_correlation_ref(query, key, value, params, top_k):
    B, C, T = query.shape
    hi = lax.Precision.HIGHEST

    def lin(x_cf, w, b):   # x_cf: (B, C_in, T), w: (C_out, C_in)
        return jnp.einsum("oc,bct->bot", w, x_cf, precision=hi) + b[None, :, None]

    q = lin(query, params["wq"], params["bq"])
    k = lin(key, params["wk"], params["bk"])
    v = lin(value, params["wv"], params["bv"])

    fq = jnp.fft.rfft(q, axis=-1)
    fk = jnp.fft.rfft(k, axis=-1)
    corr = jnp.fft.irfft(fq * jnp.conj(fk), n=T, axis=-1) / T
    tk = min(top_k, T // 2)
    lags = lax.top_k(corr, tk)[1]                               # (B, C, tk)
    weights = jax.nn.softmax(corr, axis=-1)

    t_idx = jnp.arange(T)
    outs = []
    for i in range(tk):
        shift = lags[..., i]                                    # (B, C)
        idx = (t_idx[None, None, :] - shift[..., None]) % T
        rolled = jnp.take_along_axis(v, idx, axis=-1)           # torch.roll semantics
        wgt = jnp.take_along_axis(weights, shift[..., None], axis=-1)
        outs.append(rolled * wgt)
    agg = jnp.concatenate(outs, axis=1)                         # (B, C*tk, T)
    out = jnp.einsum("oj,bjt->bot", params["wf"], agg, precision=hi)
    return out + params["bf"][None, :, None], corr


# ----------------------------------------------------------------------------
# Deterministic parameter init (PyTorch Linear (out, in) weight convention).
# ----------------------------------------------------------------------------
def init_params(key, d_model, top_k, T):
    tk = min(top_k, T // 2)
    ks = jax.random.split(key, 8)

    def lin(kw, kb, dout, din):
        w = jax.random.normal(kw, (dout, din), jnp.float32) / np.sqrt(din)
        b = jax.random.normal(kb, (dout,), jnp.float32) * 0.02
        return w, b

    wq, bq = lin(ks[0], ks[1], d_model, d_model)
    wk, bk = lin(ks[2], ks[3], d_model, d_model)
    wv, bv = lin(ks[4], ks[5], d_model, d_model)
    wf, bf = lin(ks[6], ks[7], d_model, d_model * tk)
    return dict(wq=wq, bq=bq, wk=wk, bk=bk, wv=wv, bv=bv, wf=wf, bf=bf)


if __name__ == "__main__":
    # Small but lane-dense shapes: d_model = 128 puts a full 128-lane vector
    # behind every elementwise op and an unmasked store behind the output.
    B, d_model, T, top_k = 2, 128, 32, 3

    root = jax.random.PRNGKey(0)
    kq, kk, kv, kp = jax.random.split(root, 4)
    query = jax.random.normal(kq, (B, d_model, T), jnp.float32)
    key_in = jax.random.normal(kk, (B, d_model, T), jnp.float32)
    value = jax.random.normal(kv, (B, d_model, T), jnp.float32)
    params = init_params(kp, d_model, top_k, T)

    fwd = jax.jit(functools.partial(auto_correlation_pallas, top_k=top_k))
    out = fwd(query, key_in, value, params)
    jax.block_until_ready(out)

    assert out.shape == (B, d_model, T), out.shape
    assert bool(jnp.all(jnp.isfinite(out)))

    ref, corr_ref = auto_correlation_ref(query, key_in, value, params, top_k)
    err = float(jnp.max(jnp.abs(out - ref)))
    if err >= 1e-3:
        # A large delta is only legitimate if a near-tie in the discrete top-k
        # lag selection flipped between implementations (review concern #1).
        tkk = min(top_k, T // 2)
        top_vals = lax.top_k(corr_ref, tkk + 1)[0]
        min_gap = float(jnp.min(top_vals[..., :-1] - top_vals[..., 1:]))
        assert min_gap < 5e-6, f"max abs err vs reference: {err} (min top-k gap {min_gap})"

    print("KERNEL_OK")
</pallas_src>

<mosaic_0001>
module attributes {stable_mosaic.version = 11 : i64} {
  func.func @_autocorrelation_kernel(%arg0: i32, %arg1: memref<1x32x128xf32, #tpu.memory_space<vmem>>, %arg2: memref<1x32x128xf32, #tpu.memory_space<vmem>>, %arg3: memref<1x32x128xf32, #tpu.memory_space<vmem>>, %arg4: memref<3x128x128xf32, #tpu.memory_space<vmem>>, %arg5: memref<3x1x128xf32, #tpu.memory_space<vmem>>, %arg6: memref<3x128x128xf32, #tpu.memory_space<vmem>>, %arg7: memref<1x128xf32, #tpu.memory_space<vmem>>, %arg8: memref<1x32x128xf32, #tpu.memory_space<vmem>>, %arg9: memref<32x1x128xf32, #tpu.memory_space<vmem>>) attributes {dimension_semantics = [#tpu.dimension_semantics<parallel>], iteration_bounds = array<i64: 2>, scalar_prefetch = 0 : i64, scratch_operands = 1 : i64, tpu.core_type = #tpu.core_type<tc>, window_params = [{transform_indices = @transform_0, window_bounds = array<i64: 1, 32, 128>}, {transform_indices = @transform_1, window_bounds = array<i64: 1, 32, 128>}, {transform_indices = @transform_2, window_bounds = array<i64: 1, 32, 128>}, {pipeline_mode = #tpu.pipeline_mode<synchronous>, transform_indices = @transform_3, window_bounds = array<i64: 3, 128, 128>}, {pipeline_mode = #tpu.pipeline_mode<synchronous>, transform_indices = @transform_4, window_bounds = array<i64: 3, 1, 128>}, {pipeline_mode = #tpu.pipeline_mode<synchronous>, transform_indices = @transform_5, window_bounds = array<i64: 3, 128, 128>}, {pipeline_mode = #tpu.pipeline_mode<synchronous>, transform_indices = @transform_6, window_bounds = array<i64: 1, 128>}, {transform_indices = @transform_7, window_bounds = array<i64: 1, 32, 128>}]} {
    %c0 = arith.constant 0 : index
    %c0_0 = arith.constant 0 : index
    %c0_1 = arith.constant 0 : index
    %0 = vector.load %arg1[%c0, %c0_0, %c0_1] : memref<1x32x128xf32, #tpu.memory_space<vmem>>, vector<1x32x128xf32>
    %1 = vector.shape_cast %0 : vector<1x32x128xf32> to vector<32x128xf32>
    %c0_2 = arith.constant 0 : index
    %c0_3 = arith.constant 0 : index
    %c0_4 = arith.constant 0 : index
    %2 = vector.load %arg2[%c0_2, %c0_3, %c0_4] : memref<1x32x128xf32, #tpu.memory_space<vmem>>, vector<1x32x128xf32>
    %3 = vector.shape_cast %2 : vector<1x32x128xf32> to vector<32x128xf32>
    %c0_5 = arith.constant 0 : index
    %c0_6 = arith.constant 0 : index
    %c0_7 = arith.constant 0 : index
    %4 = vector.load %arg3[%c0_5, %c0_6, %c0_7] : memref<1x32x128xf32, #tpu.memory_space<vmem>>, vector<1x32x128xf32>
    %5 = vector.shape_cast %4 : vector<1x32x128xf32> to vector<32x128xf32>
    %c0_8 = arith.constant 0 : index
    %c0_9 = arith.constant 0 : index
    %c0_10 = arith.constant 0 : index
    %6 = vector.load %arg4[%c0_8, %c0_9, %c0_10] : memref<3x128x128xf32, #tpu.memory_space<vmem>>, vector<1x128x128xf32>
    %7 = vector.shape_cast %6 : vector<1x128x128xf32> to vector<128x128xf32>
    %cst = arith.constant dense<0.000000e+00> : vector<32x128xf32>
    %8 = tpu.matmul %1, %7, %cst {dimension_numbers = #tpu.dot_dimension_numbers<[1], [0], [0], [1], [0, 0, 1, 1], [], []>, precision = #tpu.contract_precision<fp32>} : vector<32x128xf32>, vector<128x128xf32>, vector<32x128xf32> -> vector<32x128xf32>
    %c0_11 = arith.constant 0 : index
    %c0_12 = arith.constant 0 : index
    %c0_13 = arith.constant 0 : index
    %9 = vector.load %arg5[%c0_11, %c0_12, %c0_13] : memref<3x1x128xf32, #tpu.memory_space<vmem>>, vector<1x1x128xf32>
    %10 = vector.shape_cast %9 : vector<1x1x128xf32> to vector<1x128xf32>
    %11 = vector.broadcast %10 : vector<1x128xf32> to vector<32x128xf32>
    %12 = arith.addf %8, %11 : vector<32x128xf32>
    %c1 = arith.constant 1 : index
    %c0_14 = arith.constant 0 : index
    %c0_15 = arith.constant 0 : index
    %13 = vector.load %arg4[%c1, %c0_14, %c0_15] : memref<3x128x128xf32, #tpu.memory_space<vmem>>, vector<1x128x128xf32>
    %14 = vector.shape_cast %13 : vector<1x128x128xf32> to vector<128x128xf32>
    %cst_16 = arith.constant dense<0.000000e+00> : vector<32x128xf32>
    %15 = tpu.matmul %3, %14, %cst_16 {dimension_numbers = #tpu.dot_dimension_numbers<[1], [0], [0], [1], [0, 0, 1, 1], [], []>, precision = #tpu.contract_precision<fp32>} : vector<32x128xf32>, vector<128x128xf32>, vector<32x128xf32> -> vector<32x128xf32>
    %c1_17 = arith.constant 1 : index
    %c0_18 = arith.constant 0 : index
    %c0_19 = arith.constant 0 : index
    %16 = vector.load %arg5[%c1_17, %c0_18, %c0_19] : memref<3x1x128xf32, #tpu.memory_space<vmem>>, vector<1x1x128xf32>
    %17 = vector.shape_cast %16 : vector<1x1x128xf32> to vector<1x128xf32>
    %18 = vector.broadcast %17 : vector<1x128xf32> to vector<32x128xf32>
    %19 = arith.addf %15, %18 : vector<32x128xf32>
    %c2 = arith.constant 2 : index
    %c0_20 = arith.constant 0 : index
    %c0_21 = arith.constant 0 : index
    %20 = vector.load %arg4[%c2, %c0_20, %c0_21] : memref<3x128x128xf32, #tpu.memory_space<vmem>>, vector<1x128x128xf32>
    %21 = vector.shape_cast %20 : vector<1x128x128xf32> to vector<128x128xf32>
    %cst_22 = arith.constant dense<0.000000e+00> : vector<32x128xf32>
    %22 = tpu.matmul %5, %21, %cst_22 {dimension_numbers = #tpu.dot_dimension_numbers<[1], [0], [0], [1], [0, 0, 1, 1], [], []>, precision = #tpu.contract_precision<fp32>} : vector<32x128xf32>, vector<128x128xf32>, vector<32x128xf32> -> vector<32x128xf32>
    %c2_23 = arith.constant 2 : index
    %c0_24 = arith.constant 0 : index
    %c0_25 = arith.constant 0 : index
    %23 = vector.load %arg5[%c2_23, %c0_24, %c0_25] : memref<3x1x128xf32, #tpu.memory_space<vmem>>, vector<1x1x128xf32>
    %24 = vector.shape_cast %23 : vector<1x1x128xf32> to vector<1x128xf32>
    %25 = vector.broadcast %24 : vector<1x128xf32> to vector<32x128xf32>
    %26 = arith.addf %22, %25 : vector<32x128xf32>
    %27 = vector.extract_strided_slice %19 {offsets = [0, 0], sizes = [1, 128], strides = [1, 1]} : vector<32x128xf32> to vector<1x128xf32>
    %c0_26 = arith.constant 0 : index
    %c0_27 = arith.constant 0 : index
    %c0_28 = arith.constant 0 : index
    %28 = vector.load %arg9[%c0_26, %c0_27, %c0_28] : memref<32x1x128xf32, #tpu.memory_space<vmem>>, vector<1x1x128xf32>
    %29 = vector.shape_cast %28 : vector<1x1x128xf32> to vector<1x128xf32>
    %30 = vector.shape_cast %27 : vector<1x128xf32> to vector<1x1x128xf32>
    tpu.vector_store %arg9[%c0_26, %c0_27, %c0_28], %30 {strides = array<i32>} : memref<32x1x128xf32, #tpu.memory_space<vmem>>, vector<1x1x128xf32>,
    %31 = vector.extract_strided_slice %19 {offsets = [1, 0], sizes = [1, 128], strides = [1, 1]} : vector<32x128xf32> to vector<1x128xf32>
    %c1_29 = arith.constant 1 : index
    %c0_30 = arith.constant 0 : index
    %c0_31 = arith.constant 0 : index
    %32 = vector.load %arg9[%c1_29, %c0_30, %c0_31] : memref<32x1x128xf32, #tpu.memory_space<vmem>>, vector<1x1x128xf32>
    %33 = vector.shape_cast %32 : vector<1x1x128xf32> to vector<1x128xf32>
    %34 = vector.shape_cast %31 : vector<1x128xf32> to vector<1x1x128xf32>
    tpu.vector_store %arg9[%c1_29, %c0_30, %c0_31], %34 {strides = array<i32>} : memref<32x1x128xf32, #tpu.memory_space<vmem>>, vector<1x1x128xf32>,
    %35 = vector.extract_strided_slice %19 {offsets = [2, 0], sizes = [1, 128], strides = [1, 1]} : vector<32x128xf32> to vector<1x128xf32>
    %c2_32 = arith.constant 2 : index
    %c0_33 = arith.constant 0 : index
    %c0_34 = arith.constant 0 : index
    %36 = vector.load %arg9[%c2_32, %c0_33, %c0_34] : memref<32x1x128xf32, #tpu.memory_space<vmem>>, vector<1x1x128xf32>
    %37 = vector.shape_cast %36 : vector<1x1x128xf32> to vector<1x128xf32>
    %38 = vector.shape_cast %35 : vector<1x128xf32> to vector<1x1x128xf32>
    tpu.vector_store %arg9[%c2_32, %c0_33, %c0_34], %38 {strides = array<i32>} : memref<32x1x128xf32, #tpu.memory_space<vmem>>, vector<1x1x128xf32>,
    %39 = vector.extract_strided_slice %19 {offsets = [3, 0], sizes = [1, 128], strides = [1, 1]} : vector<32x128xf32> to vector<1x128xf32>
    %c3 = arith.constant 3 : index
    %c0_35 = arith.constant 0 : index
    %c0_36 = arith.constant 0 : index
    %40 = vector.load %arg9[%c3, %c0_35, %c0_36] : memref<32x1x128xf32, #tpu.memory_space<vmem>>, vector<1x1x128xf32>
    %41 = vector.shape_cast %40 : vector<1x1x128xf32> to vector<1x128xf32>
    %42 = vector.shape_cast %39 : vector<1x128xf32> to vector<1x1x128xf32>
    tpu.vector_store %arg9[%c3, %c0_35, %c0_36], %42 {strides = array<i32>} : memref<32x1x128xf32, #tpu.memory_space<vmem>>, vector<1x1x128xf32>,
    %43 = vector.extract_strided_slice %19 {offsets = [4, 0], sizes = [1, 128], strides = [1, 1]} : vector<32x128xf32> to vector<1x128xf32>
    %c4 = arith.constant 4 : index
    %c0_37 = arith.constant 0 : index
    %c0_38 = arith.constant 0 : index
    %44 = vector.load %arg9[%c4, %c0_37, %c0_38] : memref<32x1x128xf32, #tpu.memory_space<vmem>>, vector<1x1x128xf32>
    %45 = vector.shape_cast %44 : vector<1x1x128xf32> to vector<1x128xf32>
    %46 = vector.shape_cast %43 : vector<1x128xf32> to vector<1x1x128xf32>
    tpu.vector_store %arg9[%c4, %c0_37, %c0_38], %46 {strides = array<i32>} : memref<32x1x128xf32, #tpu.memory_space<vmem>>, vector<1x1x128xf32>,
    %47 = vector.extract_strided_slice %19 {offsets = [5, 0], sizes = [1, 128], strides = [1, 1]} : vector<32x128xf32> to vector<1x128xf32>
    %c5 = arith.constant 5 : index
    %c0_39 = arith.constant 0 : index
    %c0_40 = arith.constant 0 : index
    %48 = vector.load %arg9[%c5, %c0_39, %c0_40] : memref<32x1x128xf32, #tpu.memory_space<vmem>>, vector<1x1x128xf32>
    %49 = vector.shape_cast %48 : vector<1x1x128xf32> to vector<1x128xf32>
    %50 = vector.shape_cast %47 : vector<1x128xf32> to vector<1x1x128xf32>
    tpu.vector_store %arg9[%c5, %c0_39, %c0_40], %50 {strides = array<i32>} : memref<32x1x128xf32, #tpu.memory_space<vmem>>, vector<1x1x128xf32>,
    %51 = vector.extract_strided_slice %19 {offsets = [6, 0], sizes = [1, 128], strides = [1, 1]} : vector<32x128xf32> to vector<1x128xf32>
    %c6 = arith.constant 6 : index
    %c0_41 = arith.constant 0 : index
    %c0_42 = arith.constant 0 : index
    %52 = vector.load %arg9[%c6, %c0_41, %c0_42] : memref<32x1x128xf32, #tpu.memory_space<vmem>>, vector<1x1x128xf32>
    %53 = vector.shape_cast %52 : vector<1x1x128xf32> to vector<1x128xf32>
    %54 = vector.shape_cast %51 : vector<1x128xf32> to vector<1x1x128xf32>
    tpu.vector_store %arg9[%c6, %c0_41, %c0_42], %54 {strides = array<i32>} : memref<32x1x128xf32, #tpu.memory_space<vmem>>, vector<1x1x128xf32>,
    %55 = vector.extract_strided_slice %19 {offsets = [7, 0], sizes = [1, 128], strides = [1, 1]} : vector<32x128xf32> to vector<1x128xf32>
    %c7 = arith.constant 7 : index
    %c0_43 = arith.constant 0 : index
    %c0_44 = arith.constant 0 : index
    %56 = vector.load %arg9[%c7, %c0_43, %c0_44] : memref<32x1x128xf32, #tpu.memory_space<vmem>>, vector<1x1x128xf32>
    %57 = vector.shape_cast %56 : vector<1x1x128xf32> to vector<1x128xf32>
    %58 = vector.shape_cast %55 : vector<1x128xf32> to vector<1x1x128xf32>
    tpu.vector_store %arg9[%c7, %c0_43, %c0_44], %58 {strides = array<i32>} : memref<32x1x128xf32, #tpu.memory_space<vmem>>, vector<1x1x128xf32>,
    %59 = vector.extract_strided_slice %19 {offsets = [8, 0], sizes = [1, 128], strides = [1, 1]} : vector<32x128xf32> to vector<1x128xf32>
    %c8 = arith.constant 8 : index
    %c0_45 = arith.constant 0 : index
    %c0_46 = arith.constant 0 : index
    %60 = vector.load %arg9[%c8, %c0_45, %c0_46] : memref<32x1x128xf32, #tpu.memory_space<vmem>>, vector<1x1x128xf32>
    %61 = vector.shape_cast %60 : vector<1x1x128xf32> to vector<1x128xf32>
    %62 = vector.shape_cast %59 : vector<1x128xf32> to vector<1x1x128xf32>
    tpu.vector_store %arg9[%c8, %c0_45, %c0_46], %62 {strides = array<i32>} : memref<32x1x128xf32, #tpu.memory_space<vmem>>, vector<1x1x128xf32>,
    %63 = vector.extract_strided_slice %19 {offsets = [9, 0], sizes = [1, 128], strides = [1, 1]} : vector<32x128xf32> to vector<1x128xf32>
    %c9 = arith.constant 9 : index
    %c0_47 = arith.constant 0 : index
    %c0_48 = arith.constant 0 : index
    %64 = vector.load %arg9[%c9, %c0_47, %c0_48] : memref<32x1x128xf32, #tpu.memory_space<vmem>>, vector<1x1x128xf32>
    %65 = vector.shape_cast %64 : vector<1x1x128xf32> to vector<1x128xf32>
    %66 = vector.shape_cast %63 : vector<1x128xf32> to vector<1x1x128xf32>
    tpu.vector_store %arg9[%c9, %c0_47, %c0_48], %66 {strides = array<i32>} : memref<32x1x128xf32, #tpu.memory_space<vmem>>, vector<1x1x128xf32>,
    %67 = vector.extract_strided_slice %19 {offsets = [10, 0], sizes = [1, 128], strides = [1, 1]} : vector<32x128xf32> to vector<1x128xf32>
    %c10 = arith.constant 10 : index
    %c0_49 = arith.constant 0 : index
    %c0_50 = arith.constant 0 : index
    %68 = vector.load %arg9[%c10, %c0_49, %c0_50] : memref<32x1x128xf32, #tpu.memory_space<vmem>>, vector<1x1x128xf32>
    %69 = vector.shape_cast %68 : vector<1x1x128xf32> to vector<1x128xf32>
    %70 = vector.shape_cast %67 : vector<1x128xf32> to vector<1x1x128xf32>
    tpu.vector_store %arg9[%c10, %c0_49, %c0_50], %70 {strides = array<i32>} : memref<32x1x128xf32, #tpu.memory_space<vmem>>, vector<1x1x128xf32>,
    %71 = vector.extract_strided_slice %19 {offsets = [11, 0], sizes = [1, 128], strides = [1, 1]} : vector<32x128xf32> to vector<1x128xf32>
    %c11 = arith.constant 11 : index
    %c0_51 = arith.constant 0 : index
    %c0_52 = arith.constant 0 : index
    %72 = vector.load %arg9[%c11, %c0_51, %c0_52] : memref<32x1x128xf32, #tpu.memory_space<vmem>>, vector<1x1x128xf32>
    %73 = vector.shape_cast %72 : vector<1x1x128xf32> to vector<1x128xf32>
    %74 = vector.shape_cast %71 : vector<1x128xf32> to vector<1x1x128xf32>
    tpu.vector_store %arg9[%c11, %c0_51, %c0_52], %74 {strides = array<i32>} : memref<32x1x128xf32, #tpu.memory_space<vmem>>, vector<1x1x128xf32>,
    %75 = vector.extract_strided_slice %19 {offsets = [12, 0], sizes = [1, 128], strides = [1, 1]} : vector<32x128xf32> to vector<1x128xf32>
    %c12 = arith.constant 12 : index
    %c0_53 = arith.constant 0 : index
    %c0_54 = arith.constant 0 : index
    %76 = vector.load %arg9[%c12, %c0_53, %c0_54] : memref<32x1x128xf32, #tpu.memory_space<vmem>>, vector<1x1x128xf32>
    %77 = vector.shape_cast %76 : vector<1x1x128xf32> to vector<1x128xf32>
    %78 = vector.shape_cast %75 : vector<1x128xf32> to vector<1x1x128xf32>
    tpu.vector_store %arg9[%c12, %c0_53, %c0_54], %78 {strides = array<i32>} : memref<32x1x128xf32, #tpu.memory_space<vmem>>, vector<1x1x128xf32>,
    %79 = vector.extract_strided_slice %19 {offsets = [13, 0], sizes = [1, 128], strides = [1, 1]} : vector<32x128xf32> to vector<1x128xf32>
    %c13 = arith.constant 13 : index
    %c0_55 = arith.constant 0 : index
    %c0_56 = arith.constant 0 : index
    %80 = vector.load %arg9[%c13, %c0_55, %c0_56] : memref<32x1x128xf32, #tpu.memory_space<vmem>>, vector<1x1x128xf32>
    %81 = vector.shape_cast %80 : vector<1x1x128xf32> to vector<1x128xf32>
    %82 = vector.shape_cast %79 : vector<1x128xf32> to vector<1x1x128xf32>
    tpu.vector_store %arg9[%c13, %c0_55, %c0_56], %82 {strides = array<i32>} : memref<32x1x128xf32, #tpu.memory_space<vmem>>, vector<1x1x128xf32>,
    %83 = vector.extract_strided_slice %19 {offsets = [14, 0], sizes = [1, 128], strides = [1, 1]} : vector<32x128xf32> to vector<1x128xf32>
    %c14 = arith.constant 14 : index
    %c0_57 = arith.constant 0 : index
    %c0_58 = arith.constant 0 : index
    %84 = vector.load %arg9[%c14, %c0_57, %c0_58] : memref<32x1x128xf32, #tpu.memory_space<vmem>>, vector<1x1x128xf32>
    %85 = vector.shape_cast %84 : vector<1x1x128xf32> to vector<1x128xf32>
    %86 = vector.shape_cast %83 : vector<1x128xf32> to vector<1x1x128xf32>
    tpu.vector_store %arg9[%c14, %c0_57, %c0_58], %86 {strides = array<i32>} : memref<32x1x128xf32, #tpu.memory_space<vmem>>, vector<1x1x128xf32>,
    %87 = vector.extract_strided_slice %19 {offsets = [15, 0], sizes = [1, 128], strides = [1, 1]} : vector<32x128xf32> to vector<1x128xf32>
    %c15 = arith.constant 15 : index
    %c0_59 = arith.constant 0 : index
    %c0_60 = arith.constant 0 : index
    %88 = vector.load %arg9[%c15, %c0_59, %c0_60] : memref<32x1x128xf32, #tpu.memory_space<vmem>>, vector<1x1x128xf32>
    %89 = vector.shape_cast %88 : vector<1x1x128xf32> to vector<1x128xf32>
    %90 = vector.shape_cast %87 : vector<1x128xf32> to vector<1x1x128xf32>
    tpu.vector_store %arg9[%c15, %c0_59, %c0_60], %90 {strides = array<i32>} : memref<32x1x128xf32, #tpu.memory_space<vmem>>, vector<1x1x128xf32>,
    %91 = vector.extract_strided_slice %19 {offsets = [16, 0], sizes = [1, 128], strides = [1, 1]} : vector<32x128xf32> to vector<1x128xf32>
    %c16 = arith.constant 16 : index
    %c0_61 = arith.constant 0 : index
    %c0_62 = arith.constant 0 : index
    %92 = vector.load %arg9[%c16, %c0_61, %c0_62] : memref<32x1x128xf32, #tpu.memory_space<vmem>>, vector<1x1x128xf32>
    %93 = vector.shape_cast %92 : vector<1x1x128xf32> to vector<1x128xf32>
    %94 = vector.shape_cast %91 : vector<1x128xf32> to vector<1x1x128xf32>
    tpu.vector_store %arg9[%c16, %c0_61, %c0_62], %94 {strides = array<i32>} : memref<32x1x128xf32, #tpu.memory_space<vmem>>, vector<1x1x128xf32>,
    %95 = vector.extract_strided_slice %19 {offsets = [17, 0], sizes = [1, 128], strides = [1, 1]} : vector<32x128xf32> to vector<1x128xf32>
    %c17 = arith.constant 17 : index
    %c0_63 = arith.constant 0 : index
    %c0_64 = arith.constant 0 : index
    %96 = vector.load %arg9[%c17, %c0_63, %c0_64] : memref<32x1x128xf32, #tpu.memory_space<vmem>>, vector<1x1x128xf32>
    %97 = vector.shape_cast %96 : vector<1x1x128xf32> to vector<1x128xf32>
    %98 = vector.shape_cast %95 : vector<1x128xf32> to vector<1x1x128xf32>
    tpu.vector_store %arg9[%c17, %c0_63, %c0_64], %98 {strides = array<i32>} : memref<32x1x128xf32, #tpu.memory_space<vmem>>, vector<1x1x128xf32>,
    %99 = vector.extract_strided_slice %19 {offsets = [18, 0], sizes = [1, 128], strides = [1, 1]} : vector<32x128xf32> to vector<1x128xf32>
    %c18 = arith.constant 18 : index
    %c0_65 = arith.constant 0 : index
    %c0_66 = arith.constant 0 : index
    %100 = vector.load %arg9[%c18, %c0_65, %c0_66] : memref<32x1x128xf32, #tpu.memory_space<vmem>>, vector<1x1x128xf32>
    %101 = vector.shape_cast %100 : vector<1x1x128xf32> to vector<1x128xf32>
    %102 = vector.shape_cast %99 : vector<1x128xf32> to vector<1x1x128xf32>
    tpu.vector_store %arg9[%c18, %c0_65, %c0_66], %102 {strides = array<i32>} : memref<32x1x128xf32, #tpu.memory_space<vmem>>, vector<1x1x128xf32>,
    %103 = vector.extract_strided_slice %19 {offsets = [19, 0], sizes = [1, 128], strides = [1, 1]} : vector<32x128xf32> to vector<1x128xf32>
    %c19 = arith.constant 19 : index
    %c0_67 = arith.constant 0 : index
    %c0_68 = arith.constant 0 : index
    %104 = vector.load %arg9[%c19, %c0_67, %c0_68] : memref<32x1x128xf32, #tpu.memory_space<vmem>>, vector<1x1x128xf32>
    %105 = vector.shape_cast %104 : vector<1x1x128xf32> to vector<1x128xf32>
    %106 = vector.shape_cast %103 : vector<1x128xf32> to vector<1x1x128xf32>
    tpu.vector_store %arg9[%c19, %c0_67, %c0_68], %106 {strides = array<i32>} : memref<32x1x128xf32, #tpu.memory_space<vmem>>, vector<1x1x128xf32>,
    %107 = vector.extract_strided_slice %19 {offsets = [20, 0], sizes = [1, 128], strides = [1, 1]} : vector<32x128xf32> to vector<1x128xf32>
    %c20 = arith.constant 20 : index
    %c0_69 = arith.constant 0 : index
    %c0_70 = arith.constant 0 : index
    %108 = vector.load %arg9[%c20, %c0_69, %c0_70] : memref<32x1x128xf32, #tpu.memory_space<vmem>>, vector<1x1x128xf32>
    %109 = vector.shape_cast %108 : vector<1x1x128xf32> to vector<1x128xf32>
    %110 = vector.shape_cast %107 : vector<1x128xf32> to vector<1x1x128xf32>
    tpu.vector_store %arg9[%c20, %c0_69, %c0_70], %110 {strides = array<i32>} : memref<32x1x128xf32, #tpu.memory_space<vmem>>, vector<1x1x128xf32>,
    %111 = vector.extract_strided_slice %19 {offsets = [21, 0], sizes = [1, 128], strides = [1, 1]} : vector<32x128xf32> to vector<1x128xf32>
    %c21 = arith.constant 21 : index
    %c0_71 = arith.constant 0 : index
    %c0_72 = arith.constant 0 : index
    %112 = vector.load %arg9[%c21, %c0_71, %c0_72] : memref<32x1x128xf32, #tpu.memory_space<vmem>>, vector<1x1x128xf32>
    %113 = vector.shape_cast %112 : vector<1x1x128xf32> to vector<1x128xf32>
    %114 = vector.shape_cast %111 : vector<1x128xf32> to vector<1x1x128xf32>
    tpu.vector_store %arg9[%c21, %c0_71, %c0_72], %114 {strides = array<i32>} : memref<32x1x128xf32, #tpu.memory_space<vmem>>, vector<1x1x128xf32>,
    %115 = vector.extract_strided_slice %19 {offsets = [22, 0], sizes = [1, 128], strides = [1, 1]} : vector<32x128xf32> to vector<1x128xf32>
    %c22 = arith.constant 22 : index
    %c0_73 = arith.constant 0 : index
    %c0_74 = arith.constant 0 : index
    %116 = vector.load %arg9[%c22, %c0_73, %c0_74] : memref<32x1x128xf32, #tpu.memory_space<vmem>>, vector<1x1x128xf32>
    %117 = vector.shape_cast %116 : vector<1x1x128xf32> to vector<1x128xf32>
    %118 = vector.shape_cast %115 : vector<1x128xf32> to vector<1x1x128xf32>
    tpu.vector_store %arg9[%c22, %c0_73, %c0_74], %118 {strides = array<i32>} : memref<32x1x128xf32, #tpu.memory_space<vmem>>, vector<1x1x128xf32>,
    %119 = vector.extract_strided_slice %19 {offsets = [23, 0], sizes = [1, 128], strides = [1, 1]} : vector<32x128xf32> to vector<1x128xf32>
    %c23 = arith.constant 23 : index
    %c0_75 = arith.constant 0 : index
    %c0_76 = arith.constant 0 : index
    %120 = vector.load %arg9[%c23, %c0_75, %c0_76] : memref<32x1x128xf32, #tpu.memory_space<vmem>>, vector<1x1x128xf32>
    %121 = vector.shape_cast %120 : vector<1x1x128xf32> to vector<1x128xf32>
    %122 = vector.shape_cast %119 : vector<1x128xf32> to vector<1x1x128xf32>
    tpu.vector_store %arg9[%c23, %c0_75, %c0_76], %122 {strides = array<i32>} : memref<32x1x128xf32, #tpu.memory_space<vmem>>, vector<1x1x128xf32>,
    %123 = vector.extract_strided_slice %19 {offsets = [24, 0], sizes = [1, 128], strides = [1, 1]} : vector<32x128xf32> to vector<1x128xf32>
    %c24 = arith.constant 24 : index
    %c0_77 = arith.constant 0 : index
    %c0_78 = arith.constant 0 : index
    %124 = vector.load %arg9[%c24, %c0_77, %c0_78] : memref<32x1x128xf32, #tpu.memory_space<vmem>>, vector<1x1x128xf32>
    %125 = vector.shape_cast %124 : vector<1x1x128xf32> to vector<1x128xf32>
    %126 = vector.shape_cast %123 : vector<1x128xf32> to vector<1x1x128xf32>
    tpu.vector_store %arg9[%c24, %c0_77, %c0_78], %126 {strides = array<i32>} : memref<32x1x128xf32, #tpu.memory_space<vmem>>, vector<1x1x128xf32>,
    %127 = vector.extract_strided_slice %19 {offsets = [25, 0], sizes = [1, 128], strides = [1, 1]} : vector<32x128xf32> to vector<1x128xf32>
    %c25 = arith.constant 25 : index
    %c0_79 = arith.constant 0 : index
    %c0_80 = arith.constant 0 : index
    %128 = vector.load %arg9[%c25, %c0_79, %c0_80] : memref<32x1x128xf32, #tpu.memory_space<vmem>>, vector<1x1x128xf32>
    %129 = vector.shape_cast %128 : vector<1x1x128xf32> to vector<1x128xf32>
    %130 = vector.shape_cast %127 : vector<1x128xf32> to vector<1x1x128xf32>
    tpu.vector_store %arg9[%c25, %c0_79, %c0_80], %130 {strides = array<i32>} : memref<32x1x128xf32, #tpu.memory_space<vmem>>, vector<1x1x128xf32>,
    %131 = vector.extract_strided_slice %19 {offsets = [26, 0], sizes = [1, 128], strides = [1, 1]} : vector<32x128xf32> to vector<1x128xf32>
    %c26 = arith.constant 26 : index
    %c0_81 = arith.constant 0 : index
    %c0_82 = arith.constant 0 : index
    %132 = vector.load %arg9[%c26, %c0_81, %c0_82] : memref<32x1x128xf32, #tpu.memory_space<vmem>>, vector<1x1x128xf32>
    %133 = vector.shape_cast %132 : vector<1x1x128xf32> to vector<1x128xf32>
    %134 = vector.shape_cast %131 : vector<1x128xf32> to vector<1x1x128xf32>
    tpu.vector_store %arg9[%c26, %c0_81, %c0_82], %134 {strides = array<i32>} : memref<32x1x128xf32, #tpu.memory_space<vmem>>, vector<1x1x128xf32>,
    %135 = vector.extract_strided_slice %19 {offsets = [27, 0], sizes = [1, 128], strides = [1, 1]} : vector<32x128xf32> to vector<1x128xf32>
    %c27 = arith.constant 27 : index
    %c0_83 = arith.constant 0 : index
    %c0_84 = arith.constant 0 : index
    %136 = vector.load %arg9[%c27, %c0_83, %c0_84] : memref<32x1x128xf32, #tpu.memory_space<vmem>>, vector<1x1x128xf32>
    %137 = vector.shape_cast %136 : vector<1x1x128xf32> to vector<1x128xf32>
    %138 = vector.shape_cast %135 : vector<1x128xf32> to vector<1x1x128xf32>
    tpu.vector_store %arg9[%c27, %c0_83, %c0_84], %138 {strides = array<i32>} : memref<32x1x128xf32, #tpu.memory_space<vmem>>, vector<1x1x128xf32>,
    %139 = vector.extract_strided_slice %19 {offsets = [28, 0], sizes = [1, 128], strides = [1, 1]} : vector<32x128xf32> to vector<1x128xf32>
    %c28 = arith.constant 28 : index
    %c0_85 = arith.constant 0 : index
    %c0_86 = arith.constant 0 : index
    %140 = vector.load %arg9[%c28, %c0_85, %c0_86] : memref<32x1x128xf32, #tpu.memory_space<vmem>>, vector<1x1x128xf32>
    %141 = vector.shape_cast %140 : vector<1x1x128xf32> to vector<1x128xf32>
    %142 = vector.shape_cast %139 : vector<1x128xf32> to vector<1x1x128xf32>
    tpu.vector_store %arg9[%c28, %c0_85, %c0_86], %142 {strides = array<i32>} : memref<32x1x128xf32, #tpu.memory_space<vmem>>, vector<1x1x128xf32>,
    %143 = vector.extract_strided_slice %19 {offsets = [29, 0], sizes = [1, 128], strides = [1, 1]} : vector<32x128xf32> to vector<1x128xf32>
    %c29 = arith.constant 29 : index
    %c0_87 = arith.constant 0 : index
    %c0_88 = arith.constant 0 : index
    %144 = vector.load %arg9[%c29, %c0_87, %c0_88] : memref<32x1x128xf32, #tpu.memory_space<vmem>>, vector<1x1x128xf32>
    %145 = vector.shape_cast %144 : vector<1x1x128xf32> to vector<1x128xf32>
    %146 = vector.shape_cast %143 : vector<1x128xf32> to vector<1x1x128xf32>
    tpu.vector_store %arg9[%c29, %c0_87, %c0_88], %146 {strides = array<i32>} : memref<32x1x128xf32, #tpu.memory_space<vmem>>, vector<1x1x128xf32>,
    %147 = vector.extract_strided_slice %19 {offsets = [30, 0], sizes = [1, 128], strides = [1, 1]} : vector<32x128xf32> to vector<1x128xf32>
    %c30 = arith.constant 30 : index
    %c0_89 = arith.constant 0 : index
    %c0_90 = arith.constant 0 : index
    %148 = vector.load %arg9[%c30, %c0_89, %c0_90] : memref<32x1x128xf32, #tpu.memory_space<vmem>>, vector<1x1x128xf32>
    %149 = vector.shape_cast %148 : vector<1x1x128xf32> to vector<1x128xf32>
    %150 = vector.shape_cast %147 : vector<1x128xf32> to vector<1x1x128xf32>
    tpu.vector_store %arg9[%c30, %c0_89, %c0_90], %150 {strides = array<i32>} : memref<32x1x128xf32, #tpu.memory_space<vmem>>, vector<1x1x128xf32>,
    %151 = vector.extract_strided_slice %19 {offsets = [31, 0], sizes = [1, 128], strides = [1, 1]} : vector<32x128xf32> to vector<1x128xf32>
    %c31 = arith.constant 31 : index
    %c0_91 = arith.constant 0 : index
    %c0_92 = arith.constant 0 : index
    %152 = vector.load %arg9[%c31, %c0_91, %c0_92] : memref<32x1x128xf32, #tpu.memory_space<vmem>>, vector<1x1x128xf32>
    %153 = vector.shape_cast %152 : vector<1x1x128xf32> to vector<1x128xf32>
    %154 = vector.shape_cast %151 : vector<1x128xf32> to vector<1x1x128xf32>
    tpu.vector_store %arg9[%c31, %c0_91, %c0_92], %154 {strides = array<i32>} : memref<32x1x128xf32, #tpu.memory_space<vmem>>, vector<1x1x128xf32>,
    %cst_93 = arith.constant 0.000000e+00 : f32
    %155 = vector.broadcast %cst_93 : f32 to vector<32x128xf32>
    %c0_i32 = arith.constant 0 : i32
    %c8_i32 = arith.constant 8 : i32
    %156 = arith.addi %c0_i32, %c8_i32 : i32
    %c1_i32 = arith.constant 1 : i32
    %157:2 = scf.for %arg10 = %c0_i32 to %156 step %c1_i32 iter_args(%arg11 = %155, %arg12 = %12) -> (vector<32x128xf32>, vector<32x128xf32>)  : i32 {
      %c4_i32 = arith.constant 4 : i32
      %239 = arith.muli %arg10, %c4_i32 : i32
      %c0_i32_133 = arith.constant 0 : i32
      %240 = arith.addi %239, %c0_i32_133 : i32
      %241 = arith.index_cast %240 : i32 to index
      %c0_134 = arith.constant 0 : index
      %c0_135 = arith.constant 0 : index
      %242 = vector.load %arg9[%241, %c0_134, %c0_135] : memref<32x1x128xf32, #tpu.memory_space<vmem>>, vector<1x1x128xf32>
      %243 = vector.shape_cast %242 : vector<1x1x128xf32> to vector<1x128xf32>
      %244 = vector.broadcast %243 : vector<1x128xf32> to vector<32x128xf32>
      %245 = arith.mulf %244, %arg12 : vector<32x128xf32>
      %246 = arith.addf %arg11, %245 : vector<32x128xf32>
      %c31_i32 = arith.constant 31 : i32
      %247 = tpu.dynamic_rotate %arg12 by %c31_i32 dim 0 : vector<32x128xf32>, i32 -> vector<32x128xf32>
      %c4_i32_136 = arith.constant 4 : i32
      %248 = arith.muli %arg10, %c4_i32_136 : i32
      %c1_i32_137 = arith.constant 1 : i32
      %249 = arith.addi %248, %c1_i32_137 : i32
      %250 = arith.index_cast %249 : i32 to index
      %c0_138 = arith.constant 0 : index
      %c0_139 = arith.constant 0 : index
      %251 = vector.load %arg9[%250, %c0_138, %c0_139] : memref<32x1x128xf32, #tpu.memory_space<vmem>>, vector<1x1x128xf32>
      %252 = vector.shape_cast %251 : vector<1x1x128xf32> to vector<1x128xf32>
      %253 = vector.broadcast %252 : vector<1x128xf32> to vector<32x128xf32>
      %254 = arith.mulf %253, %247 : vector<32x128xf32>
      %255 = arith.addf %246, %254 : vector<32x128xf32>
      %c31_i32_140 = arith.constant 31 : i32
      %256 = tpu.dynamic_rotate %247 by %c31_i32_140 dim 0 : vector<32x128xf32>, i32 -> vector<32x128xf32>
      %c4_i32_141 = arith.constant 4 : i32
      %257 = arith.muli %arg10, %c4_i32_141 : i32
      %c2_i32 = arith.constant 2 : i32
      %258 = arith.addi %257, %c2_i32 : i32
      %259 = arith.index_cast %258 : i32 to index
      %c0_142 = arith.constant 0 : index
      %c0_143 = arith.constant 0 : index
      %260 = vector.load %arg9[%259, %c0_142, %c0_143] : memref<32x1x128xf32, #tpu.memory_space<vmem>>, vector<1x1x128xf32>
      %261 = vector.shape_cast %260 : vector<1x1x128xf32> to vector<1x128xf32>
      %262 = vector.broadcast %261 : vector<1x128xf32> to vector<32x128xf32>
      %263 = arith.mulf %262, %256 : vector<32x128xf32>
      %264 = arith.addf %255, %263 : vector<32x128xf32>
      %c31_i32_144 = arith.constant 31 : i32
      %265 = tpu.dynamic_rotate %256 by %c31_i32_144 dim 0 : vector<32x128xf32>, i32 -> vector<32x128xf32>
      %c4_i32_145 = arith.constant 4 : i32
      %266 = arith.muli %arg10, %c4_i32_145 : i32
      %c3_i32 = arith.constant 3 : i32
      %267 = arith.addi %266, %c3_i32 : i32
      %268 = arith.index_cast %267 : i32 to index
      %c0_146 = arith.constant 0 : index
      %c0_147 = arith.constant 0 : index
      %269 = vector.load %arg9[%268, %c0_146, %c0_147] : memref<32x1x128xf32, #tpu.memory_space<vmem>>, vector<1x1x128xf32>
      %270 = vector.shape_cast %269 : vector<1x1x128xf32> to vector<1x128xf32>
      %271 = vector.broadcast %270 : vector<1x128xf32> to vector<32x128xf32>
      %272 = arith.mulf %271, %265 : vector<32x128xf32>
      %273 = arith.addf %264, %272 : vector<32x128xf32>
      %c31_i32_148 = arith.constant 31 : i32
      %274 = tpu.dynamic_rotate %265 by %c31_i32_148 dim 0 : vector<32x128xf32>, i32 -> vector<32x128xf32>
      scf.yield %273, %274 : vector<32x128xf32>, vector<32x128xf32>
    }
    %c8_i32_94 = arith.constant 8 : i32
    %cst_95 = arith.constant 3.125000e-02 : f32
    %158 = vector.broadcast %cst_95 : f32 to vector<32x128xf32>
    %159 = arith.mulf %157#0, %158 : vector<32x128xf32>
    %cst_96 = arith.constant dense<0xFF800000> : vector<128xf32>
    %160 = vector.multi_reduction <maximumf>, %159, %cst_96 [0] : vector<32x128xf32> to vector<128xf32>
    %161 = vector.shape_cast %160 : vector<128xf32> to vector<1x128xf32>
    %162 = vector.broadcast %161 : vector<1x128xf32> to vector<32x128xf32>
    %163 = arith.subf %159, %162 : vector<32x128xf32>
    %164 = math.exp %163 : vector<32x128xf32>
    %cst_97 = arith.constant dense<0.000000e+00> : vector<128xf32>
    %165 = vector.multi_reduction <add>, %164, %cst_97 [0] : vector<32x128xf32> to vector<128xf32>
    %166 = vector.shape_cast %165 : vector<128xf32> to vector<1x128xf32>
    %cst_98 = arith.constant 1.000000e+00 : f32
    %167 = vector.broadcast %cst_98 : f32 to vector<1x128xf32>
    %168 = arith.divf %167, %166 : vector<1x128xf32>
    %169 = tpu.iota {dimensions = array<i32: 0>} : vector<32x128xi32>
    %cst_99 = arith.constant dense<0xFF800000> : vector<128xf32>
    %170 = vector.multi_reduction <maximumf>, %159, %cst_99 [0] : vector<32x128xf32> to vector<128xf32>
    %171 = vector.shape_cast %170 : vector<128xf32> to vector<1x128xf32>
    %172 = vector.broadcast %171 : vector<1x128xf32> to vector<32x128xf32>
    %173 = arith.cmpf oeq, %159, %172 : vector<32x128xf32>
    %c32_i32 = arith.constant 32 : i32
    %174 = vector.broadcast %c32_i32 : i32 to vector<32x128xi32>
    %175 = arith.select %173, %169, %174 : vector<32x128xi1>, vector<32x128xi32>
    %cst_100 = arith.constant dense<2147483647> : vector<128xi32>
    %176 = vector.multi_reduction <minsi>, %175, %cst_100 [0] : vector<32x128xi32> to vector<128xi32>
    %177 = vector.shape_cast %176 : vector<128xi32> to vector<1x128xi32>
    %178 = arith.subf %171, %161 : vector<1x128xf32>
    %179 = math.exp %178 : vector<1x128xf32>
    %180 = arith.mulf %179, %168 : vector<1x128xf32>
    %181 = vector.broadcast %177 : vector<1x128xi32> to vector<32x128xi32>
    %182 = arith.cmpi eq, %169, %181 : vector<32x128xi32>
    %cst_101 = arith.constant -1.000000e+30 : f32
    %183 = vector.broadcast %cst_101 : f32 to vector<32x128xf32>
    %184 = arith.select %182, %183, %159 : vector<32x128xi1>, vector<32x128xf32>
    %cst_102 = arith.constant dense<0xFF800000> : vector<128xf32>
    %185 = vector.multi_reduction <maximumf>, %184, %cst_102 [0] : vector<32x128xf32> to vector<128xf32>
    %186 = vector.shape_cast %185 : vector<128xf32> to vector<1x128xf32>
    %187 = vector.broadcast %186 : vector<1x128xf32> to vector<32x128xf32>
    %188 = arith.cmpf oeq, %184, %187 : vector<32x128xf32>
    %c32_i32_103 = arith.constant 32 : i32
    %189 = vector.broadcast %c32_i32_103 : i32 to vector<32x128xi32>
    %190 = arith.select %188, %169, %189 : vector<32x128xi1>, vector<32x128xi32>
    %cst_104 = arith.constant dense<2147483647> : vector<128xi32>
    %191 = vector.multi_reduction <minsi>, %190, %cst_104 [0] : vector<32x128xi32> to vector<128xi32>
    %192 = vector.shape_cast %191 : vector<128xi32> to vector<1x128xi32>
    %193 = arith.subf %186, %161 : vector<1x128xf32>
    %194 = math.exp %193 : vector<1x128xf32>
    %195 = arith.mulf %194, %168 : vector<1x128xf32>
    %196 = vector.broadcast %192 : vector<1x128xi32> to vector<32x128xi32>
    %197 = arith.cmpi eq, %169, %196 : vector<32x128xi32>
    %cst_105 = arith.constant -1.000000e+30 : f32
    %198 = vector.broadcast %cst_105 : f32 to vector<32x128xf32>
    %199 = arith.select %197, %198, %184 : vector<32x128xi1>, vector<32x128xf32>
    %cst_106 = arith.constant dense<0xFF800000> : vector<128xf32>
    %200 = vector.multi_reduction <maximumf>, %199, %cst_106 [0] : vector<32x128xf32> to vector<128xf32>
    %201 = vector.shape_cast %200 : vector<128xf32> to vector<1x128xf32>
    %202 = vector.broadcast %201 : vector<1x128xf32> to vector<32x128xf32>
    %203 = arith.cmpf oeq, %199, %202 : vector<32x128xf32>
    %c32_i32_107 = arith.constant 32 : i32
    %204 = vector.broadcast %c32_i32_107 : i32 to vector<32x128xi32>
    %205 = arith.select %203, %169, %204 : vector<32x128xi1>, vector<32x128xi32>
    %cst_108 = arith.constant dense<2147483647> : vector<128xi32>
    %206 = vector.multi_reduction <minsi>, %205, %cst_108 [0] : vector<32x128xi32> to vector<128xi32>
    %207 = vector.shape_cast %206 : vector<128xi32> to vector<1x128xi32>
    %208 = arith.subf %201, %161 : vector<1x128xf32>
    %209 = math.exp %208 : vector<1x128xf32>
    %210 = arith.mulf %209, %168 : vector<1x128xf32>
    %cst_109 = arith.constant 0.000000e+00 : f32
    %211 = vector.broadcast %cst_109 : f32 to vector<32x128xf32>
    %cst_110 = arith.constant 0.000000e+00 : f32
    %212 = vector.broadcast %cst_110 : f32 to vector<32x128xf32>
    %cst_111 = arith.constant 0.000000e+00 : f32
    %213 = vector.broadcast %cst_111 : f32 to vector<32x128xf32>
    %c0_i32_112 = arith.constant 0 : i32
    %c8_i32_113 = arith.constant 8 : i32
    %214 = arith.addi %c0_i32_112, %c8_i32_113 : i32
    %c1_i32_114 = arith.constant 1 : i32
    %215:4 = scf.for %arg10 = %c0_i32_112 to %214 step %c1_i32_114 iter_args(%arg11 = %211, %arg12 = %212, %arg13 = %213, %arg14 = %26) -> (vector<32x128xf32>, vector<32x128xf32>, vector<32x128xf32>, vector<32x128xf32>)  : i32 {
      %c4_i32 = arith.constant 4 : i32
      %239 = arith.muli %arg10, %c4_i32 : i32
      %c0_i32_133 = arith.constant 0 : i32
      %240 = arith.addi %239, %c0_i32_133 : i32
      %241 = vector.broadcast %240 : i32 to vector<1x128xi32>
      %242 = arith.cmpi eq, %177, %241 : vector<1x128xi32>
      %243 = vector.shape_cast %242 : vector<1x128xi1> to vector<1x128xi1>
      %244 = vector.broadcast %243 : vector<1x128xi1> to vector<32x128xi1>
      %245 = arith.select %244, %arg14, %arg11 : vector<32x128xi1>, vector<32x128xf32>
      %246 = vector.broadcast %240 : i32 to vector<1x128xi32>
      %247 = arith.cmpi eq, %192, %246 : vector<1x128xi32>
      %248 = vector.shape_cast %247 : vector<1x128xi1> to vector<1x128xi1>
      %249 = vector.broadcast %248 : vector<1x128xi1> to vector<32x128xi1>
      %250 = arith.select %249, %arg14, %arg12 : vector<32x128xi1>, vector<32x128xf32>
      %251 = vector.broadcast %240 : i32 to vector<1x128xi32>
      %252 = arith.cmpi eq, %207, %251 : vector<1x128xi32>
      %253 = vector.shape_cast %252 : vector<1x128xi1> to vector<1x128xi1>
      %254 = vector.broadcast %253 : vector<1x128xi1> to vector<32x128xi1>
      %255 = arith.select %254, %arg14, %arg13 : vector<32x128xi1>, vector<32x128xf32>
      %c1_i32_134 = arith.constant 1 : i32
      %256 = tpu.dynamic_rotate %arg14 by %c1_i32_134 dim 0 : vector<32x128xf32>, i32 -> vector<32x128xf32>
      %c4_i32_135 = arith.constant 4 : i32
      %257 = arith.muli %arg10, %c4_i32_135 : i32
      %c1_i32_136 = arith.constant 1 : i32
      %258 = arith.addi %257, %c1_i32_136 : i32
      %259 = vector.broadcast %258 : i32 to vector<1x128xi32>
      %260 = arith.cmpi eq, %177, %259 : vector<1x128xi32>
      %261 = vector.shape_cast %260 : vector<1x128xi1> to vector<1x128xi1>
      %262 = vector.broadcast %261 : vector<1x128xi1> to vector<32x128xi1>
      %263 = arith.select %262, %256, %245 : vector<32x128xi1>, vector<32x128xf32>
      %264 = vector.broadcast %258 : i32 to vector<1x128xi32>
      %265 = arith.cmpi eq, %192, %264 : vector<1x128xi32>
      %266 = vector.shape_cast %265 : vector<1x128xi1> to vector<1x128xi1>
      %267 = vector.broadcast %266 : vector<1x128xi1> to vector<32x128xi1>
      %268 = arith.select %267, %256, %250 : vector<32x128xi1>, vector<32x128xf32>
      %269 = vector.broadcast %258 : i32 to vector<1x128xi32>
      %270 = arith.cmpi eq, %207, %269 : vector<1x128xi32>
      %271 = vector.shape_cast %270 : vector<1x128xi1> to vector<1x128xi1>
      %272 = vector.broadcast %271 : vector<1x128xi1> to vector<32x128xi1>
      %273 = arith.select %272, %256, %255 : vector<32x128xi1>, vector<32x128xf32>
      %c1_i32_137 = arith.constant 1 : i32
      %274 = tpu.dynamic_rotate %256 by %c1_i32_137 dim 0 : vector<32x128xf32>, i32 -> vector<32x128xf32>
      %c4_i32_138 = arith.constant 4 : i32
      %275 = arith.muli %arg10, %c4_i32_138 : i32
      %c2_i32 = arith.constant 2 : i32
      %276 = arith.addi %275, %c2_i32 : i32
      %277 = vector.broadcast %276 : i32 to vector<1x128xi32>
      %278 = arith.cmpi eq, %177, %277 : vector<1x128xi32>
      %279 = vector.shape_cast %278 : vector<1x128xi1> to vector<1x128xi1>
      %280 = vector.broadcast %279 : vector<1x128xi1> to vector<32x128xi1>
      %281 = arith.select %280, %274, %263 : vector<32x128xi1>, vector<32x128xf32>
      %282 = vector.broadcast %276 : i32 to vector<1x128xi32>
      %283 = arith.cmpi eq, %192, %282 : vector<1x128xi32>
      %284 = vector.shape_cast %283 : vector<1x128xi1> to vector<1x128xi1>
      %285 = vector.broadcast %284 : vector<1x128xi1> to vector<32x128xi1>
      %286 = arith.select %285, %274, %268 : vector<32x128xi1>, vector<32x128xf32>
      %287 = vector.broadcast %276 : i32 to vector<1x128xi32>
      %288 = arith.cmpi eq, %207, %287 : vector<1x128xi32>
      %289 = vector.shape_cast %288 : vector<1x128xi1> to vector<1x128xi1>
      %290 = vector.broadcast %289 : vector<1x128xi1> to vector<32x128xi1>
      %291 = arith.select %290, %274, %273 : vector<32x128xi1>, vector<32x128xf32>
      %c1_i32_139 = arith.constant 1 : i32
      %292 = tpu.dynamic_rotate %274 by %c1_i32_139 dim 0 : vector<32x128xf32>, i32 -> vector<32x128xf32>
      %c4_i32_140 = arith.constant 4 : i32
      %293 = arith.muli %arg10, %c4_i32_140 : i32
      %c3_i32 = arith.constant 3 : i32
      %294 = arith.addi %293, %c3_i32 : i32
      %295 = vector.broadcast %294 : i32 to vector<1x128xi32>
      %296 = arith.cmpi eq, %177, %295 : vector<1x128xi32>
      %297 = vector.shape_cast %296 : vector<1x128xi1> to vector<1x128xi1>
      %298 = vector.broadcast %297 : vector<1x128xi1> to vector<32x128xi1>
      %299 = arith.select %298, %292, %281 : vector<32x128xi1>, vector<32x128xf32>
      %300 = vector.broadcast %294 : i32 to vector<1x128xi32>
      %301 = arith.cmpi eq, %192, %300 : vector<1x128xi32>
      %302 = vector.shape_cast %301 : vector<1x128xi1> to vector<1x128xi1>
      %303 = vector.broadcast %302 : vector<1x128xi1> to vector<32x128xi1>
      %304 = arith.select %303, %292, %286 : vector<32x128xi1>, vector<32x128xf32>
      %305 = vector.broadcast %294 : i32 to vector<1x128xi32>
      %306 = arith.cmpi eq, %207, %305 : vector<1x128xi32>
      %307 = vector.shape_cast %306 : vector<1x128xi1> to vector<1x128xi1>
      %308 = vector.broadcast %307 : vector<1x128xi1> to vector<32x128xi1>
      %309 = arith.select %308, %292, %291 : vector<32x128xi1>, vector<32x128xf32>
      %c1_i32_141 = arith.constant 1 : i32
      %310 = tpu.dynamic_rotate %292 by %c1_i32_141 dim 0 : vector<32x128xf32>, i32 -> vector<32x128xf32>
      scf.yield %299, %304, %309, %310 : vector<32x128xf32>, vector<32x128xf32>, vector<32x128xf32>, vector<32x128xf32>
    }
    %c8_i32_115 = arith.constant 8 : i32
    %216 = vector.broadcast %180 : vector<1x128xf32> to vector<32x128xf32>
    %217 = arith.mulf %215#0, %216 : vector<32x128xf32>
    %c0_116 = arith.constant 0 : index
    %c0_117 = arith.constant 0 : index
    %c0_118 = arith.constant 0 : index
    %218 = vector.load %arg6[%c0_116, %c0_117, %c0_118] : memref<3x128x128xf32, #tpu.memory_space<vmem>>, vector<1x128x128xf32>
    %219 = vector.shape_cast %218 : vector<1x128x128xf32> to vector<128x128xf32>
    %cst_119 = arith.constant dense<0.000000e+00> : vector<32x128xf32>
    %220 = tpu.matmul %217, %219, %cst_119 {dimension_numbers = #tpu.dot_dimension_numbers<[1], [0], [0], [1], [0, 0, 1, 1], [], []>, precision = #tpu.contract_precision<fp32>} : vector<32x128xf32>, vector<128x128xf32>, vector<32x128xf32> -> vector<32x128xf32>
    %221 = vector.broadcast %195 : vector<1x128xf32> to vector<32x128xf32>
    %222 = arith.mulf %215#1, %221 : vector<32x128xf32>
    %c1_120 = arith.constant 1 : index
    %c0_121 = arith.constant 0 : index
    %c0_122 = arith.constant 0 : index
    %223 = vector.load %arg6[%c1_120, %c0_121, %c0_122] : memref<3x128x128xf32, #tpu.memory_space<vmem>>, vector<1x128x128xf32>
    %224 = vector.shape_cast %223 : vector<1x128x128xf32> to vector<128x128xf32>
    %cst_123 = arith.constant dense<0.000000e+00> : vector<32x128xf32>
    %225 = tpu.matmul %222, %224, %cst_123 {dimension_numbers = #tpu.dot_dimension_numbers<[1], [0], [0], [1], [0, 0, 1, 1], [], []>, precision = #tpu.contract_precision<fp32>} : vector<32x128xf32>, vector<128x128xf32>, vector<32x128xf32> -> vector<32x128xf32>
    %226 = arith.addf %220, %225 : vector<32x128xf32>
    %227 = vector.broadcast %210 : vector<1x128xf32> to vector<32x128xf32>
    %228 = arith.mulf %215#2, %227 : vector<32x128xf32>
    %c2_124 = arith.constant 2 : index
    %c0_125 = arith.constant 0 : index
    %c0_126 = arith.constant 0 : index
    %229 = vector.load %arg6[%c2_124, %c0_125, %c0_126] : memref<3x128x128xf32, #tpu.memory_space<vmem>>, vector<1x128x128xf32>
    %230 = vector.shape_cast %229 : vector<1x128x128xf32> to vector<128x128xf32>
    %cst_127 = arith.constant dense<0.000000e+00> : vector<32x128xf32>
    %231 = tpu.matmul %228, %230, %cst_127 {dimension_numbers = #tpu.dot_dimension_numbers<[1], [0], [0], [1], [0, 0, 1, 1], [], []>, precision = #tpu.contract_precision<fp32>} : vector<32x128xf32>, vector<128x128xf32>, vector<32x128xf32> -> vector<32x128xf32>
    %232 = arith.addf %226, %231 : vector<32x128xf32>
    %c0_128 = arith.constant 0 : index
    %c0_129 = arith.constant 0 : index
    %233 = vector.load %arg7[%c0_128, %c0_129] : memref<1x128xf32, #tpu.memory_space<vmem>>, vector<1x128xf32>
    %234 = vector.broadcast %233 : vector<1x128xf32> to vector<32x128xf32>
    %235 = arith.addf %232, %234 : vector<32x128xf32>
    %c0_130 = arith.constant 0 : index
    %c0_131 = arith.constant 0 : index
    %c0_132 = arith.constant 0 : index
    %236 = vector.load %arg8[%c0_130, %c0_131, %c0_132] : memref<1x32x128xf32, #tpu.memory_space<vmem>>, vector<1x32x128xf32>
    %237 = vector.shape_cast %236 : vector<1x32x128xf32> to vector<32x128xf32>
    %238 = vector.shape_cast %235 : vector<32x128xf32> to vector<1x32x128xf32>
    tpu.vector_store %arg8[%c0_130, %c0_131, %c0_132], %238 {strides = array<i32>} : memref<1x32x128xf32, #tpu.memory_space<vmem>>, vector<1x32x128xf32>,
    return
  }
  func.func @transform_0(%arg0: i32) -> (i32, i32, i32) {
    %c0_i32 = arith.constant 0 : i32
    %c0_i32_0 = arith.constant 0 : i32
    %c0_i32_1 = arith.constant 0 : i32
    return %arg0, %c0_i32, %c0_i32_0 : i32, i32, i32
  }
  func.func @transform_1(%arg0: i32) -> (i32, i32, i32) {
    %c0_i32 = arith.constant 0 : i32
    %c0_i32_0 = arith.constant 0 : i32
    %c0_i32_1 = arith.constant 0 : i32
    return %arg0, %c0_i32, %c0_i32_0 : i32, i32, i32
  }
  func.func @transform_2(%arg0: i32) -> (i32, i32, i32) {
    %c0_i32 = arith.constant 0 : i32
    %c0_i32_0 = arith.constant 0 : i32
    %c0_i32_1 = arith.constant 0 : i32
    return %arg0, %c0_i32, %c0_i32_0 : i32, i32, i32
  }
  func.func @transform_3(%arg0: i32) -> (i32, i32, i32) {
    %c0_i32 = arith.constant 0 : i32
    %c0_i32_0 = arith.constant 0 : i32
    %c0_i32_1 = arith.constant 0 : i32
    %c0_i32_2 = arith.constant 0 : i32
    return %c0_i32, %c0_i32_0, %c0_i32_1 : i32, i32, i32
  }
  func.func @transform_4(%arg0: i32) -> (i32, i32, i32) {
    %c0_i32 = arith.constant 0 : i32
    %c0_i32_0 = arith.constant 0 : i32
    %c0_i32_1 = arith.constant 0 : i32
    %c0_i32_2 = arith.constant 0 : i32
    return %c0_i32, %c0_i32_0, %c0_i32_1 : i32, i32, i32
  }
  func.func @transform_5(%arg0: i32) -> (i32, i32, i32) {
    %c0_i32 = arith.constant 0 : i32
    %c0_i32_0 = arith.constant 0 : i32
    %c0_i32_1 = arith.constant 0 : i32
    %c0_i32_2 = arith.constant 0 : i32
    return %c0_i32, %c0_i32_0, %c0_i32_1 : i32, i32, i32
  }
  func.func @transform_6(%arg0: i32) -> (i32, i32) {
    %c0_i32 = arith.constant 0 : i32
    %c0_i32_0 = arith.constant 0 : i32
    %c0_i32_1 = arith.constant 0 : i32
    return %c0_i32, %c0_i32_0 : i32, i32
  }
  func.func @transform_7(%arg0: i32) -> (i32, i32, i32) {
    %c0_i32 = arith.constant 0 : i32
    %c0_i32_0 = arith.constant 0 : i32
    %c0_i32_1 = arith.constant 0 : i32
    return %arg0, %c0_i32, %c0_i32_0 : i32, i32, i32
  }
}

</mosaic_0001>

<bundles_post_ra>
// kernel: auto_correlation_pallas.1
= control target key start
LH: loop header
LB: loop body
LE: loop exit
PB: predicated region body
PF: predicated region fallthrough
CT: control target
= control target key end

     0   :  { %12 = vsyncpa [#allocation4], 0  ;;  %s12664_s0 = inlined_call_operand.vmem [shape: f32[2,32,128], index: 0, kind: input, shape index: {}]   ;;  %s12665_s1 = inlined_call_operand.vmem [shape: f32[2,32,128], index: 1, kind: input, shape index: {}]   ;;  %s12666_s2 = inlined_call_operand.vmem [shape: f32[2,32,128], index: 2, kind: input, shape index: {}]   ;;  %s12667_s3 = inlined_call_operand.vmem [shape: f32[3,128,128], index: 3, kind: input, shape index: {}]   ;;  %s12668_s4 = inlined_call_operand.vmem [shape: f32[3,1,128], index: 4, kind: input, shape index: {}]   ;;  %s12669_s5 = inlined_call_operand.vmem [shape: f32[3,128,128], index: 5, kind: input, shape index: {}]   ;;  %s12670_s6 = inlined_call_operand.vmem [shape: f32[1,128], index: 6, kind: input, shape index: {}]   ;;  %s12671_s7 = inlined_call_operand.hbm [shape: f32[2,32,128], index: 7, kind: output, shape index: {}]  }
   0x1   :  { %14 = vsyncpa [#allocation4 + $0x1], 0  ;;  %s9841_s24 = smov 0   ;;  %s9843_s25 = smov 0  }
   0x2   :  { %s9845_s26 = smov 0   ;;  %s9847_s27 = smov 0  }
   0x3 LB: > { %s9862_s28 = sadd.s32 4294967295, %s9692_s27   ;;  %s5779_s29 = sadd.s32 4294967294, %s9692_s27   ;;  %s9692_s27 = sphi %s9847_s27, %s12851_s27   ;;  %s9688_s26 = sphi %s9845_s26, %s12850_s26   ;;  %s9684_s25 = sphi %s9843_s25, %s12849_s25   ;;  %s9680_s24 = sphi %s9841_s24, %s12848_s24  }
   0x4   : > { %s9866_s30 = sadd.s32 1, %s9692_s27   ;;  %s189_s8 = sadd.s32 1, %s9688_s26 }
   0x5   : > { %s186_s9 = ssub.s32 %s9692_s27, %s9866_s30  ;;  %p199_p0 = scmp.ne.s32.totalorder %s9688_s26, %s9684_s25 }
   0x6   : > { %p187_p1 = scmp.eq.s32.totalorder %s186_s9, 0  ;;  %p200_p2 = scmp.eq.s32.totalorder %s9862_s28, 1 }
   0x7   : > { %p205_p3 = scmp.ne.s32.totalorder %s9684_s25, %s9680_s24  ;;  %p206_p4 = scmp.eq.s32.totalorder %s5779_s29, 1 }
   0x8   : > { %s9877_s10 = scalar_select %p187_p1, %s9688_s26, %s189_s8  }
   0x9   : > { %p9879_p5 = por %p200_p2, %p199_p0  ;;  %p9883_p6 = por %p206_p4, %p205_p3 }
   0xa   : > { %p5782_p7 = scmp.ge.s32.totalorder %s9692_s27, 1  ;;  %p260_p8 = scmp.lt.s32.totalorder %s9692_s27, 3 }
   0xc   : > { %p261_p9 = pnand %p5782_p7, %p260_p8 }
   0xe   : > { %264 = sbr.rel (%p261_p9) target bundleno = 1799 (0x707), region = 48 }
  0x15   : > { %s299_s13 = sand.u32 1, %s9684_s25   ;;  %v329_v0 = vld [vmem:[%s12667_s3] sm:$0xff]  ;;  %v330_v1 = vld [vmem:[%s12667_s3 + $0x8] sm:$0xff]  ;;  %v331_v2 = vld [vmem:[%s12667_s3 + $0x10] sm:$0xff]  ;;  %p302_p10 = scmp.lt.s32.totalorder %s9862_s28, 1 }
  0x16   : > { %s9902_s20 = sshll.u32 %s299_s13, 5  ;;  %v353_v3 = vand.u32 4294901760, %v329_v0  ;;  %v356_v4 = vand.u32 4294901760, %v330_v1  ;;  %v332_v5 = vld [vmem:[%s12667_s3 + $0x18] sm:$0xff]  ;;  %v359_v6 = vand.u32 4294901760, %v331_v2  ;;  %v333_v7 = vld [vmem:[%s12667_s3 + $0x20] sm:$0xff] }
  0x17   : > { %v362_v8 = vand.u32 4294901760, %v332_v5  ;;  %v334_v9 = vld [vmem:[%s12667_s3 + $0x28] sm:$0xff]  ;;  %v365_v11 = vand.u32 4294901760, %v333_v7  ;;  %v9920_v14 = vld [vmem:[%s12667_s3 + $0x30] sm:$0xff]  ;;  %v9925_v15 = vld [vmem:[%s12667_s3 + $0x38] sm:$0xff]  ;;  %s303_s18 = scalar_select %p302_p10, %s9862_s28, 1 }
  0x18   : > { %v9913_v10 = vpack.c.bf16 %v356_v4, %v353_v3  ;;  %v368_v12 = vand.u32 4294901760, %v334_v9  ;;  %v371_v17 = vand.u32 4294901760, %v9920_v14  ;;  %v374_v18 = vand.u32 4294901760, %v9925_v15  ;;  %v9942_v19 = vld [vmem:[%s12667_s3 + $0x40] sm:$0xff]  ;;  %v9947_v20 = vld [vmem:[%s12667_s3 + $0x48] sm:$0xff]  ;;  %v339_v27 = vld [vmem:[%s12667_s3 + $0x50] sm:$0xff] }
  0x19   : > { %v9915_v13 = vpack.c.bf16 %v362_v8, %v359_v6  ;;  %s9937_s19 = sshll.u32 %s303_s18, 5  ;;  %v377_v25 = vand.u32 4294901760, %v9942_v19  ;;  %v380_v26 = vand.u32 4294901760, %v9947_v20  ;;  %v340_v28 = vld [vmem:[%s12667_s3 + $0x58] sm:$0xff]  ;;  %v9975_v29 = vsub.f32 %v329_v0, %v353_v3  ;;  %v341_v36 = vld [vmem:[%s12667_s3 + $0x60] sm:$0xff]  ;;  %v342_v39 = vld [vmem:[%s12667_s3 + $0x68] sm:$0xff] }
  0x1a   : > { %7970 = vmatprep.subr.bf16.mxu0 %v9913_v10  ;;  %v9933_v16 = vpack.c.bf16 %v368_v12, %v365_v11  ;;  %s9953_s14 = scalar_lea.vmem %s12664_s0, %s9937_s19  ;;  %v9965_v24 = vpack.c.bf16 %v374_v18, %v371_v17  ;;  %v9980_v31 = vsub.f32 %v330_v1, %v356_v4  ;;  %v9982_v32 = vsub.f32 %v331_v2, %v359_v6  ;;  %v343_v40 = vld [vmem:[%s12667_s3 + $0x70] sm:$0xff]  ;;  %v344_v41 = vld [vmem:[%s12667_s3 + $0x78] sm:$0xff]  ;;  %s10228_s18 = scalar_lea.vmem %s12665_s1, %s9937_s19 }
  0x1b   : > { %7972 = vmatpush3.bf16.msra.mxu0 %v9913_v10  ;;  %v317_v21 = vld [vmem:[%s9953_s14] sm:$0xff]  ;;  %v318_v23 = vld [vmem:[%s9953_s14 + $0x8] sm:$0xff]  ;;  %v383_v34 = vand.u32 4294901760, %v339_v27  ;;  %v386_v35 = vand.u32 4294901760, %v340_v28  ;;  %v9992_v38 = vpack.c.bf16 %v380_v26, %v377_v25  ;;  %v476_v42 = vand.u32 4294901760, %v9975_v29  ;;  %v319_v62 = vld [vmem:[%s9953_s14 + $0x10] sm:$0xff]  ;;  %s10622_s29 = scalar_lea.vmem %s12666_s2, %s9937_s19 }
  0x1c   : > { %7974 = vmatprep.subr.bf16.mxu0 %v9915_v13  ;;  %v9957_v22 = vand.u32 4294901760, %v317_v21  ;;  %v9984_v33 = vand.u32 4294901760, %v318_v23  ;;  %v10004_v43 = vsub.f32 %v332_v5, %v362_v8  ;;  %v10006_v44 = vsub.f32 %v333_v7, %v365_v11  ;;  %v320_v6 = vld [vmem:[%s9953_s14 + $0x18] sm:$0xff]  ;;  %s11062_s19 = scalar_lea.vmem [#allocation3], %s9902_s20  ;;  %s11084_s20 = smov 0  }
  0x1d   : > { %v483_v46 = vand.u32 4294901760, %v9980_v31  ;;  %v490_v47 = vand.u32 4294901760, %v9982_v32  ;;  %v10013_v48 = vsub.f32 %v334_v9, %v368_v12  ;;  %v389_v49 = vand.u32 4294901760, %v341_v36 }
  0x1e   : > { %v9978_v30 = vsub.f32 %v317_v21, %v9957_v22  ;;  %v10016_v50 = vsub.f32 %v318_v23, %v9984_v33  ;;  %v392_v51 = vand.u32 4294901760, %v342_v39  ;;  %v395_v52 = vand.u32 4294901760, %v343_v40 }
  0x1f   : > { %7976 = vmatpush3.bf16.msra.mxu0 %v9915_v13  ;;  %v398_v53 = vand.u32 4294901760, %v344_v41  ;;  %v10020_v55 = vpack.c.bf16 %v386_v35, %v383_v34  ;;  %v477_v56 = vsub.f32 %v9975_v29, %v476_v42  ;;  %v497_v57 = vand.u32 4294901760, %v10004_v43 }
  0x20   : > { %7978 = vmatprep.subr.bf16.mxu0 %v9933_v16  ;;  %v12674_v37 = vand.u32 4294901760, %v9978_v30  ;;  %v504_v58 = vand.u32 4294901760, %v10006_v44  ;;  %v484_v59 = vsub.f32 %v9980_v31, %v483_v46  ;;  %v10033_v60 = vsub.f32 %v9982_v32, %v490_v47 }
  0x21   : > { %v511_v61 = vand.u32 4294901760, %v10013_v48  ;;  %v12673_v63 = vand.u32 4294901760, %v10016_v50  ;;  %v10039_v0 = vpack.c.bf16 %v392_v51, %v389_v49  ;;  %v10041_v1 = vpack.c.bf16 %v398_v53, %v395_v52 }
  0x22   : > { %v436_v45 = vsub.f32 %v9978_v30, %v12674_v37  ;;  %v478_v2 = vand.u32 4294901760, %v477_v56  ;;  %v498_v3 = vsub.f32 %v10004_v43, %v497_v57  ;;  %v10046_v4 = vsub.f32 %v10006_v44, %v504_v58 }
  0x23   : > { %7980 = vmatpush3.bf16.msra.mxu0 %v9933_v16  ;;  %v10048_v5 = vand.u32 4294901760, %v319_v62  ;;  %v485_v7 = vand.u32 4294901760, %v484_v59  ;;  %v492_v8 = vand.u32 4294901760, %v10033_v60  ;;  %v512_v9 = vsub.f32 %v10013_v48, %v511_v61 }
  0x24   : > { %7982 = vmatprep.subr.bf16.mxu0 %v9965_v24  ;;  %v437_v54 = vand.u32 4294901760, %v436_v45  ;;  %v10056_v11 = vsub.f32 %v9920_v14, %v371_v17  ;;  %v446_v12 = vsub.f32 %v10016_v50, %v12673_v63  ;;  %v10064_v21 = vsub.f32 %v9925_v15, %v374_v18 }
  0x25   : > { %v10067_v23 = vsub.f32 %v9942_v19, %v377_v25  ;;  %v10070_v45 = vsub.f32 %v319_v62, %v10048_v5  ;;  %v10074_v14 = vsub.f32 %v9947_v20, %v380_v26  ;;  %v10076_v17 = vsub.f32 %v339_v27, %v383_v34 }
  0x26   : > { %6633 = vmatprep.mubr.f32.mxu0 %v437_v54  ;;  %v10078_v54 = vsub.f32 %v340_v28, %v386_v35  ;;  %v10080_v56 = vand.u32 4294901760, %v320_v6  ;;  %v10083_v15 = vsub.f32 %v341_v36, %v389_v49  ;;  %v10085_v18 = vsub.f32 %v342_v39, %v392_v51 }
  0x27   : > { %7984 = vmatpush3.bf16.msra.mxu0 %v9965_v24  ;;  %v12672_v19 = vand.u32 4294901760, %v10070_v45  ;;  %v10088_v25 = vsub.f32 %v343_v40, %v395_v52  ;;  %v8001_v59 = vpack.c.bf16 %v485_v7, %v478_v2  ;;  %v499_v60 = vand.u32 4294901760, %v498_v3 }
  0x28   : > { %7986 = vmatprep.subr.bf16.mxu0 %v9992_v38  ;;  %v10090_v20 = vsub.f32 %v344_v41, %v398_v53  ;;  %v10093_v26 = vsub.f32 %v320_v6, %v10080_v56  ;;  %v447_v27 = vand.u32 4294901760, %v446_v12  ;;  %v518_v28 = vand.u32 4294901760, %v10056_v11 }
  0x29   : > { %v525_v34 = vand.u32 4294901760, %v10064_v21  ;;  %v532_v35 = vand.u32 4294901760, %v10067_v23  ;;  %v539_v36 = vand.u32 4294901760, %v10074_v14  ;;  %v546_v39 = vand.u32 4294901760, %v10076_v17 }
  0x2a   : > { %v456_v40 = vsub.f32 %v10070_v45, %v12672_v19  ;;  %v12675_v41 = vand.u32 4294901760, %v10093_v26  ;;  %v553_v49 = vand.u32 4294901760, %v10078_v54  ;;  %v560_v51 = vand.u32 4294901760, %v10083_v15 }
  0x2b   : > { %7988 = vmatpush3.bf16.msra.mxu0 %v9992_v38  ;;  %v567_v52 = vand.u32 4294901760, %v10085_v18  ;;  %v574_v53 = vand.u32 4294901760, %v10088_v25  ;;  %v581_v62 = vand.u32 4294901760, %v10090_v20  ;;  %v10115_v2 = vpack.c.bf16 %v483_v46, %v476_v42 }
  0x2c   : > { %7990 = vmatprep.subr.bf16.mxu0 %v10020_v55  ;;  %v10119_v3 = vpack.c.bf16 %v497_v57, %v490_v47  ;;  %v10121_v6 = vpack.c.bf16 %v511_v61, %v504_v58  ;;  %v466_v7 = vsub.f32 %v10093_v26, %v12675_v41  ;;  %v10126_v12 = vpack.c.bf16 %v525_v34, %v518_v28 }
  0x2d   : > { %v10128_v19 = vpack.c.bf16 %v539_v36, %v532_v35  ;;  %v10130_v63 = vpack.c.bf16 %v553_v49, %v546_v39  ;;  %v506_v42 = vand.u32 4294901760, %v10046_v4  ;;  %v457_v46 = vand.u32 4294901760, %v456_v40 }
  0x2e   : > { %12735 = vst [vmem:[#allocation6_spill] sm:$0xff] %v10126_v12  ;;  %v10134_v37 = vpack.c.bf16 %v567_v52, %v560_v51  ;;  %v10136_v47 = vpack.c.bf16 %v581_v62, %v574_v53  ;;  %v8005_v57 = vpack.c.bf16 %v499_v60, %v492_v8  ;;  %v513_v58 = vand.u32 4294901760, %v512_v9 }
  0x2f   : > { %7992 = vmatpush3.bf16.msra.mxu0 %v10020_v55  ;;  %12736 = vst [vmem:[#allocation7_spill] sm:$0xff] %v10128_v19  ;;  %12737 = vst [vmem:[#allocation8_spill] sm:$0xff] %v10130_v63  ;;  %v519_v61 = vsub.f32 %v10056_v11, %v518_v28  ;;  %v526_v41 = vsub.f32 %v10064_v21, %v525_v34  ;;  %v467_v19 = vand.u32 4294901760, %v466_v7 }
  0x30   : > { %7994 = vmatprep.subr.bf16.mxu0 %v10039_v0  ;;  %12738 = vst [vmem:[#allocation9_spill] sm:$0xff] %v10134_v37  ;;  %v533_v63 = vsub.f32 %v10067_v23, %v532_v35  ;;  %v8009_v4 = vpack.c.bf16 %v513_v58, %v506_v42  ;;  %v540_v37 = vsub.f32 %v10074_v14, %v539_v36 }
  0x31   : > { %v520_v40 = vand.u32 4294901760, %v519_v61  ;;  %v527_v12 = vand.u32 4294901760, %v526_v41  ;;  %v561_v28 = vsub.f32 %v10083_v15, %v560_v51 }
  0x32   : > { %v534_v8 = vand.u32 4294901760, %v533_v63  ;;  %v541_v60 = vand.u32 4294901760, %v540_v37  ;;  %v575_v37 = vsub.f32 %v10088_v25, %v574_v53  ;;  %v8037_v53 = vpack.c.bf16 %v10004_v43, %v9982_v32 }
  0x33   : > { %7996 = vmatpush3.bf16.msra.mxu0 %v10039_v0  ;;  %v8013_v9 = vpack.c.bf16 %v527_v12, %v520_v40  ;;  %v562_v63 = vand.u32 4294901760, %v561_v28  ;;  %v8053_v32 = vpack.c.bf16 %v10078_v54, %v10076_v17  ;;  %v8057_v43 = vpack.c.bf16 %v10085_v18, %v10083_v15  ;;  %v5794_v15 = vld [vmem:[%s12667_s3 + $0x98] sm:$0xff]  ;;  %v10293_v40 = vld [vmem:[%s12667_s3 + $0xc0] sm:$0xff]  ;;  %v10327_v28 = vld [vmem:[%s12667_s3 + $0xe8] sm:$0xff] }
  0x34   : > { %7998 = vmatprep.subr.bf16.mxu0 %v10041_v1  ;;  %v8017_v34 = vpack.c.bf16 %v541_v60, %v534_v8  ;;  %v576_v12 = vand.u32 4294901760, %v575_v37  ;;  %v1172_v8 = vand.u32 4294901760, %v10293_v40  ;;  %v10310_v60 = vld [vmem:[%s12667_s3 + $0xd0] sm:$0xff] }
  0x37   : > { %8000 = vmatpush3.bf16.msra.mxu0 %v10041_v1 }
  0x38   : > { %8002 = vmatprep.subr.bf16.mxu0 %v8001_v59 }
  0x3a   : > { %6634 = vmatmul.mubr.f32.vlgmr.msra.gmra.mrb[0].mxu0 %v447_v27  ;;  %v547_v27 = vsub.f32 %v10076_v17, %v546_v39  ;;  %v582_v39 = vsub.f32 %v10090_v20, %v581_v62  ;;  %v8041_v62 = vpack.c.bf16 %v10013_v48, %v10006_v44  ;;  %v8061_v44 = vpack.c.bf16 %v10090_v20, %v10088_v25 }
  0x3b   : > { %8004 = vmatpush3.bf16.msra.mxu0 %v8001_v59  ;;  %6636 = vmatprep.mubr.f32.mxu0 %v457_v46  ;;  %v554_v59 = vsub.f32 %v10078_v54, %v553_v49  ;;  %v12739_v48 = vand.u32 4294901760, %v9978_v30  ;;  %v5793_v54 = vld [vmem:[%s12667_s3 + $0x90] sm:$0xff]  ;;  %v1157_v20 = vand.u32 4294901760, %v5794_v15 }
  0x3c   : > { %8006 = vmatprep.subr.bf16.mxu0 %v8005_v57  ;;  %v548_v35 = vand.u32 4294901760, %v547_v27  ;;  %v583_v51 = vand.u32 4294901760, %v582_v39  ;;  %v1154_v25 = vand.u32 4294901760, %v5793_v54  ;;  %v322_v27 = vld [vmem:[%s10228_s18 + $0x8] sm:$0xff]  ;;  %v1187_v39 = vand.u32 4294901760, %v10327_v28 }
  0x3d   : > { %v555_v41 = vand.u32 4294901760, %v554_v59  ;;  %v10322_v59 = vld [vmem:[%s12667_s3 + $0xe0] sm:$0xff] }
  0x3e   : > { %6637 = vmatmul.mubr.f32.gmra.mrb[2].mxu0 %v467_v19  ;;  %v568_v19 = vsub.f32 %v10085_v18, %v567_v52  ;;  %v8029_v42 = vpack.c.bf16 %v583_v51, %v576_v12  ;;  %v8033_v52 = vpack.c.bf16 %v9980_v31, %v9975_v29  ;;  %v8045_v29 = vpack.c.bf16 %v10064_v21, %v10056_v11 }
  0x3f   : > { %8008 = vmatpush3.bf16.msra.mxu0 %v8005_v57  ;;  %6671 = vmatprep.mubr.f32.mxu0 %v9957_v22  ;;  %v8021_v36 = vpack.c.bf16 %v555_v41, %v548_v35  ;;  %v8049_v31 = vpack.c.bf16 %v10074_v14, %v10067_v23  ;;  %v12741_v11 = vand.u32 4294901760, %v10070_v45  ;;  %v12742_v21 = vand.u32 4294901760, %v10093_v26  ;;  %v12744_v23 = vld [vmem:[#allocation7_spill] sm:$0xff]  ;;  %v12746_v14 = vld [vmem:[#allocation9_spill] sm:$0xff] }
  0x40   : > { %8010 = vmatprep.subr.bf16.mxu0 %v8009_v4  ;;  %v569_v7 = vand.u32 4294901760, %v568_v19  ;;  %v1178_v19 = vand.u32 4294901760, %v10310_v60  ;;  %v1184_v37 = vand.u32 4294901760, %v10322_v59 }
  0x42   : > { %v8025_v49 = vpack.c.bf16 %v569_v7, %v562_v63  ;;  %v10341_v7 = vand.u32 4294901760, %v322_v27 }
  0x43   : > { %8012 = vmatpush3.bf16.msra.mxu0 %v8009_v4 }
  0x44   : > { %8014 = vmatprep.subr.bf16.mxu0 %v8013_v9 }
  0x47   : > { %8016 = vmatpush3.bf16.msra.mxu0 %v8013_v9 }
  0x48   : > { %8018 = vmatprep.subr.bf16.mxu0 %v8017_v34 }
  0x4b   : > { %8020 = vmatpush3.bf16.msra.mxu0 %v8017_v34 }
  0x4c   : > { %8022 = vmatprep.subr.bf16.mxu0 %v8021_v36 }
  0x4f   : > { %8024 = vmatpush3.bf16.msra.mxu0 %v8021_v36  ;;  %v323_v36 = vld [vmem:[%s10228_s18 + $0x10] sm:$0xff] }
  0x50   : > { %8026 = vmatprep.subr.bf16.mxu0 %v8025_v49 }
  0x53   : > { %8028 = vmatpush3.bf16.msra.mxu0 %v8025_v49  ;;  %v10349_v49 = vld [vmem:[%s12667_s3 + $0xf0] sm:$0xff] }
  0x54   : > { %8030 = vmatprep.subr.bf16.mxu0 %v8029_v42 }
  0x57   : > { %8032 = vmatpush3.bf16.msra.mxu0 %v8029_v42  ;;  %v10353_v42 = vand.u32 4294901760, %v323_v36 }
  0x58   : > { %8034 = vmatprep.subr.bf16.mxu0 %v8033_v52 }
  0x5a   : > { %6672 = vmatmul.mubr.f32.vlgmr.msra.gmra.mrb[0].mxu0 %v9984_v33 }
  0x5b   : > { %8036 = vmatpush3.bf16.msra.mxu0 %v8033_v52  ;;  %6674 = vmatprep.mubr.f32.mxu0 %v10048_v5  ;;  %v324_v52 = vld [vmem:[%s10228_s18 + $0x18] sm:$0xff] }
  0x5c   : > { %8038 = vmatprep.subr.bf16.mxu0 %v8037_v53 }
  0x5e   : > { %6675 = vmatmul.mubr.f32.gmra.mrb[2].mxu0 %v10080_v56 }
  0x5f   : > { %8040 = vmatpush3.bf16.msra.mxu0 %v8037_v53  ;;  %6709 = vmatprep.mubr.f32.mxu0 %v9978_v30  ;;  %v12740_v30 = vand.u32 4294901760, %v10016_v50 }
  0x60   : > { %8042 = vmatprep.subr.bf16.mxu0 %v8041_v62 }
  0x63   : > { %8044 = vmatpush3.bf16.msra.mxu0 %v8041_v62  ;;  %v10366_v62 = vld [vmem:[%s12667_s3 + $0xf8] sm:$0xff] }
  0x64   : > { %8046 = vmatprep.subr.bf16.mxu0 %v8045_v29 }
  0x67   : > { %8048 = vmatpush3.bf16.msra.mxu0 %v8045_v29  ;;  %v10368_v29 = vsub.f32 %v5793_v54, %v1154_v25 }
  0x68   : > { %8050 = vmatprep.subr.bf16.mxu0 %v8049_v31 }
  0x6b   : > { %8052 = vmatpush3.bf16.msra.mxu0 %v8049_v31  ;;  %v10370_v31 = vsub.f32 %v5794_v15, %v1157_v20 }
  0x6c   : > { %8054 = vmatprep.subr.bf16.mxu0 %v8053_v32 }
  0x6f   : > { %8056 = vmatpush3.bf16.msra.mxu0 %v8053_v32  ;;  %v10373_v32 = vsub.f32 %v322_v27, %v10341_v7 }
  0x70   : > { %8058 = vmatprep.subr.bf16.mxu0 %v8057_v43 }
  0x73   : > { %8060 = vmatpush3.bf16.msra.mxu0 %v8057_v43  ;;  %v10379_v43 = vpack.c.bf16 %v1187_v39, %v1184_v37 }
  0x74   : > { %8062 = vmatprep.subr.bf16.mxu0 %v8061_v44 }
  0x77   : > { %8064 = vmatpush3.bf16.msra.mxu0 %v8061_v44  ;;  %v1190_v44 = vand.u32 4294901760, %v10349_v49 }
  0x78   : > { %8066 = vmatprep.subr.bf16.mxu0 %v9913_v10 }
  0x7a   : > { %6710 = vmatmul.mubr.f32.vlgmr.msra.gmra.mrb[0].mxu0 %v10016_v50  ;;  %v12743_v50 = vld [vmem:[#allocation6_spill] sm:$0xff] }
  0x7b   : > { %8068 = vmatpush3.bf16.msra.mxu0 %v9913_v10  ;;  %6712 = vmatprep.mubr.f32.mxu0 %v10070_v45  ;;  %v12745_v45 = vld [vmem:[#allocation8_spill] sm:$0xff] }
  0x7c   : > { %8070 = vmatprep.subr.bf16.mxu0 %v9915_v13 }
  0x7e   : > { %6713 = vmatmul.mubr.f32.gmra.mrb[2].mxu0 %v10093_v26  ;;  %v10262_v26 = vld [vmem:[%s12667_s3 + $0xa0] sm:$0xff] }
  0x7f   : > { %8072 = vmatpush3.bf16.msra.mxu0 %v9915_v13  ;;  %6747 = vmatprep.mubr.f32.mxu0 %v12739_v48  ;;  %v10382_v48 = vand.u32 4294901760, %v324_v52 }
  0x80   : > { %8074 = vmatprep.subr.bf16.mxu0 %v9933_v16 }
  0x83   : > { %8076 = vmatpush3.bf16.msra.mxu0 %v9933_v16 }
  0x84   : > { %8078 = vmatprep.subr.bf16.mxu0 %v9965_v24 }
  0x87   : > { %8080 = vmatpush3.bf16.msra.mxu0 %v9965_v24 }
  0x88   : > { %8082 = vmatprep.subr.bf16.mxu0 %v9992_v38 }
  0x8b   : > { %8084 = vmatpush3.bf16.msra.mxu0 %v9992_v38 }
  0x8c   : > { %8086 = vmatprep.subr.bf16.mxu0 %v10020_v55 }
  0x8f   : > { %8088 = vmatpush3.bf16.msra.mxu0 %v10020_v55 }
  0x90   : > { %8090 = vmatprep.subr.bf16.mxu0 %v10039_v0 }
  0x93   : > { %8092 = vmatpush3.bf16.msra.mxu0 %v10039_v0 }
  0x94   : > { %8094 = vmatprep.subr.bf16.mxu0 %v10041_v1 }
  0x97   : > { %8096 = vmatpush3.bf16.msra.mxu0 %v10041_v1 }
  0x98   : > { %8098 = vmatprep.subr.bf16.mxu0 %v10115_v2 }
  0x9a   : > { %6748 = vmatmul.mubr.f32.vlgmr.msra.gmra.mrb[0].mxu0 %v12740_v30  ;;  %v1193_v30 = vand.u32 4294901760, %v10366_v62 }
  0x9b   : > { %8100 = vmatpush3.bf16.msra.mxu0 %v10115_v2  ;;  %6750 = vmatprep.mubr.f32.mxu0 %v12741_v11  ;;  %v10267_v2 = vld [vmem:[%s12667_s3 + $0xa8] sm:$0xff] }
  0x9c   : > { %8102 = vmatprep.subr.bf16.mxu0 %v10119_v3  ;;  %v1163_v46 = vand.u32 4294901760, %v10267_v2  ;;  %v10417_v54 = vpack.c.bf16 %v1193_v30, %v1190_v44 }
  0x9e   : > { %6751 = vmatmul.mubr.f32.gmra.mrb[2].mxu0 %v12742_v21 }
  0x9f   : > { %8104 = vmatpush3.bf16.msra.mxu0 %v10119_v3  ;;  %6785 = vmatprep.mubr.f32.mxu0 %v9957_v22  ;;  %v10274_v3 = vpack.c.bf16 %v1157_v20, %v1154_v25 }
  0xa0   : > { %8106 = vmatprep.subr.bf16.mxu0 %v10121_v6 }
  0xa3   : > { %8108 = vmatpush3.bf16.msra.mxu0 %v10121_v6  ;;  %v1160_v6 = vand.u32 4294901760, %v10262_v26 }
  0xa4   : > { %8110 = vmatprep.subr.bf16.mxu0 %v12743_v50 }
  0xa5   : > { %v10288_v58 = vpack.c.bf16 %v1163_v46, %v1160_v6 }
  0xa7   : > { %8112 = vmatpush3.bf16.msra.mxu0 %v12743_v50  ;;  %v10393_v50 = vsub.f32 %v323_v36, %v10353_v42 }
  0xa8   : > { %8114 = vmatprep.subr.bf16.mxu0 %v12744_v23 }
  0xa9   : > { %v12685_v20 = vand.u32 4294901760, %v10393_v50 }
  0xab   : > { %8116 = vmatpush3.bf16.msra.mxu0 %v12744_v23  ;;  %v1285_v23 = vand.u32 4294901760, %v10368_v29  ;;  %v1251_v36 = vsub.f32 %v10393_v50, %v12685_v20 }
  0xac   : > { %8118 = vmatprep.subr.bf16.mxu0 %v12745_v45 }
  0xaf   : > { %8120 = vmatpush3.bf16.msra.mxu0 %v12745_v45  ;;  %v1292_v45 = vand.u32 4294901760, %v10370_v31 }
  0xb0   : > { %8122 = vmatprep.subr.bf16.mxu0 %v12746_v14 }
  0xb3   : > { %8124 = vmatpush3.bf16.msra.mxu0 %v12746_v14  ;;  %v10399_v14 = vsub.f32 %v10262_v26, %v1160_v6  ;;  %v1286_v26 = vsub.f32 %v10368_v29, %v1285_v23 }
  0xb4   : > { %8126 = vmatprep.subr.bf16.mxu0 %v10136_v47 }
  0xb7   : > { %8128 = vmatpush3.bf16.msra.mxu0 %v10136_v47  ;;  %v5797_v47 = vld [vmem:[%s12667_s3 + $0xb0] sm:$0xff] }
  0xb8   : > { %8130 = vmatprep.subr.bf16.mxu0 %v9913_v10  ;;  %v1166_v61 = vand.u32 4294901760, %v5797_v47 }
  0xba   : > { %6786 = vmatmul.mubr.f32.vlgmr.msra.gmra.mrb[0].mxu0 %v9984_v33 }
  0xbb   : > { %8132 = vmatpush3.bf16.msra.mxu0 %v9913_v10  ;;  %6788 = vmatprep.mubr.f32.mxu0 %v10048_v5  ;;  %v321_v10 = vld [vmem:[%s10228_s18] sm:$0xff] }
  0xbc   : > { %8134 = vmatprep.subr.bf16.mxu0 %v9915_v13 }
  0xbe   : > { %6789 = vmatmul.mubr.f32.gmra.mrb[2].mxu0 %v10080_v56 }
  0xbf   : > { %8136 = vmatpush3.bf16.msra.mxu0 %v9915_v13  ;;  %6823 = vmatprep.mubr.f32.mxu0 %v9957_v22  ;;  %v10234_v13 = vand.u32 4294901760, %v321_v10  ;;  %v5792_v22 = vld [vmem:[%s12667_s3 + $0x88] sm:$0xff] }
  0xc0   : > { %8138 = vmatprep.subr.bf16.mxu0 %v9933_v16  ;;  %v1151_v17 = vand.u32 4294901760, %v5792_v22 }
  0xc2   : > { %v10331_v35 = vsub.f32 %v5792_v22, %v1151_v17  ;;  %v10405_v22 = vsub.f32 %v5797_v47, %v1166_v61 }
  0xc3   : > { %8140 = vmatpush3.bf16.msra.mxu0 %v9933_v16  ;;  %v5791_v16 = vld [vmem:[%s12667_s3 + $0x80] sm:$0xff] }
  0xc4   : > { %8142 = vmatprep.subr.bf16.mxu0 %v9965_v24  ;;  %v1278_v51 = vand.u32 4294901760, %v10331_v35  ;;  %v12681_v47 = vand.u32 4294901760, %v10405_v22 }
  0xc6   : > { %v1279_v21 = vsub.f32 %v10331_v35, %v1278_v51 }
  0xc7   : > { %8144 = vmatpush3.bf16.msra.mxu0 %v9965_v24  ;;  %v10245_v24 = vsub.f32 %v321_v10, %v10234_v13  ;;  %v10402_v10 = vsub.f32 %v10267_v2, %v1163_v46  ;;  %v1293_v2 = vsub.f32 %v10370_v31, %v1292_v45 }
  0xc8   : > { %8146 = vmatprep.subr.bf16.mxu0 %v9992_v38  ;;  %v1280_v25 = vand.u32 4294901760, %v1279_v21 }
  0xc9   : > { %v1230_v18 = vand.u32 4294901760, %v10245_v24  ;;  %v12682_v6 = vand.u32 4294901760, %v10402_v10 }
  0xcb   : > { %8148 = vmatpush3.bf16.msra.mxu0 %v9992_v38  ;;  %v1148_v38 = vand.u32 4294901760, %v5791_v16 }
  0xcc   : > { %8150 = vmatprep.subr.bf16.mxu0 %v10020_v55 }
  0xcd   : > { %v10329_v34 = vsub.f32 %v5791_v16, %v1148_v38  ;;  %v12686_v16 = vand.u32 4294901760, %v10373_v32 }
  0xcf   : > { %8152 = vmatpush3.bf16.msra.mxu0 %v10020_v55  ;;  %v10257_v55 = vpack.c.bf16 %v1151_v17, %v1148_v38  ;;  %v1271_v12 = vand.u32 4294901760, %v10329_v34  ;;  %v10410_v17 = vsub.f32 %v324_v52, %v10382_v48  ;;  %v1241_v46 = vsub.f32 %v10373_v32, %v12686_v16 }
  0xd0   : > { %8154 = vmatprep.subr.bf16.mxu0 %v10039_v0  ;;  %v1287_v52 = vand.u32 4294901760, %v1286_v26 }
  0xd1   : > { %v1272_v11 = vsub.f32 %v10329_v34, %v1271_v12  ;;  %v1242_v21 = vand.u32 4294901760, %v1241_v46 }
  0xd3   : > { %8156 = vmatpush3.bf16.msra.mxu0 %v10039_v0  ;;  %v1231_v0 = vsub.f32 %v10245_v24, %v1230_v18  ;;  %v1273_v15 = vand.u32 4294901760, %v1272_v11  ;;  %v1294_v11 = vand.u32 4294901760, %v1293_v2  ;;  %v10469_v2 = vsub.f32 %v10310_v60, %v1178_v19 }
  0xd4   : > { %8158 = vmatprep.subr.bf16.mxu0 %v10041_v1 }
  0xd5   : > { %v1232_v57 = vand.u32 4294901760, %v1231_v0  ;;  %v12683_v0 = vand.u32 4294901760, %v10399_v14 }
  0xd7   : > { %8160 = vmatpush3.bf16.msra.mxu0 %v10041_v1  ;;  %v5798_v1 = vld [vmem:[%s12667_s3 + $0xb8] sm:$0xff] }
  0xd8   : > { %8162 = vmatprep.subr.bf16.mxu0 %v10257_v55  ;;  %v1169_v4 = vand.u32 4294901760, %v5798_v1 }
  0xda   : > { %6824 = vmatmul.mubr.f32.vlgmr.msra.gmra.mrb[0].mxu0 %v9984_v33  ;;  %v10298_v33 = vld [vmem:[%s12667_s3 + $0xc8] sm:$0xff]  ;;  %v10407_v38 = vsub.f32 %v5798_v1, %v1169_v4 }
  0xdb   : > { %8164 = vmatpush3.bf16.msra.mxu0 %v10257_v55  ;;  %6826 = vmatprep.mubr.f32.mxu0 %v10048_v5  ;;  %v10303_v5 = vpack.c.bf16 %v1169_v4, %v1166_v61  ;;  %v1175_v9 = vand.u32 4294901760, %v10298_v33  ;;  %v12684_v61 = vand.u32 4294901760, %v10410_v17  ;;  %v8193_v4 = vpack.c.bf16 %v1280_v25, %v1273_v15 }
  0xdc   : > { %8166 = vmatprep.subr.bf16.mxu0 %v10274_v3  ;;  %v12680_v1 = vand.u32 4294901760, %v10407_v38 }
  0xdd   : > { %v10336_v41 = vpack.c.bf16 %v1175_v9, %v1172_v8  ;;  %v10442_v27 = vsub.f32 %v10298_v33, %v1175_v9  ;;  %v1314_v33 = vsub.f32 %v10405_v22, %v12681_v47  ;;  %v1261_v25 = vsub.f32 %v10410_v17, %v12684_v61 }
  0xde   : > { %6827 = vmatmul.mubr.f32.gmra.mrb[2].mxu0 %v10080_v56  ;;  %v10315_v56 = vld [vmem:[%s12667_s3 + $0xd8] sm:$0xff]  ;;  %v1321_v9 = vsub.f32 %v10407_v38, %v12680_v1  ;;  %v1252_v1 = vand.u32 4294901760, %v1251_v36  ;;  %v8197_v47 = vpack.c.bf16 %v1294_v11, %v1287_v52  ;;  %v10487_v52 = vsub.f32 %v10322_v59, %v1184_v37 }
  0xdf   : > { %8168 = vmatpush3.bf16.msra.mxu0 %v10274_v3  ;;  %6861 = vmatprep.mubr.f32.mxu0 %v1232_v57  ;;  %v1181_v63 = vand.u32 4294901760, %v10315_v56  ;;  %v10435_v57 = vsub.f32 %v10293_v40, %v1172_v8  ;;  %v1300_v40 = vsub.f32 %v10399_v14, %v12683_v0  ;;  %v1307_v8 = vsub.f32 %v10402_v10, %v12682_v6 }
  0xe0   : > { %8170 = vmatprep.subr.bf16.mxu0 %v10288_v58  ;;  %v1334_v26 = vand.u32 4294901760, %v10442_v27  ;;  %v1315_v61 = vand.u32 4294901760, %v1314_v33  ;;  %v1322_v20 = vand.u32 4294901760, %v1321_v9  ;;  %v1262_v16 = vand.u32 4294901760, %v1261_v25 }
  0xe1   : > { %v10361_v53 = vpack.c.bf16 %v1181_v63, %v1178_v19  ;;  %v1327_v15 = vand.u32 4294901760, %v10435_v57  ;;  %v10474_v46 = vsub.f32 %v10315_v56, %v1181_v63  ;;  %v1301_v6 = vand.u32 4294901760, %v1300_v40 }
  0xe2   : > { %v1308_v0 = vand.u32 4294901760, %v1307_v8  ;;  %v1335_v19 = vsub.f32 %v10442_v27, %v1334_v26  ;;  %v1341_v56 = vand.u32 4294901760, %v10469_v2  ;;  %v8205_v11 = vpack.c.bf16 %v1322_v20, %v1315_v61 }
  0xe3   : > { %8172 = vmatpush3.bf16.msra.mxu0 %v10288_v58  ;;  %v1328_v60 = vsub.f32 %v10435_v57, %v1327_v15  ;;  %v1348_v63 = vand.u32 4294901760, %v10474_v46  ;;  %v1355_v59 = vand.u32 4294901760, %v10487_v52  ;;  %v10506_v37 = vsub.f32 %v10349_v49, %v1190_v44 }
  0xe4   : > { %8174 = vmatprep.subr.bf16.mxu0 %v10303_v5  ;;  %v8201_v36 = vpack.c.bf16 %v1308_v0, %v1301_v6  ;;  %v1336_v8 = vand.u32 4294901760, %v1335_v19 }
  0xe5   : > { %v1329_v40 = vand.u32 4294901760, %v1328_v60  ;;  %v1349_v0 = vsub.f32 %v10474_v46, %v1348_v63  ;;  %v1369_v49 = vand.u32 4294901760, %v10506_v37 }
  0xe7   : > { %8176 = vmatpush3.bf16.msra.mxu0 %v10303_v5  ;;  %v1350_v6 = vand.u32 4294901760, %v1349_v0  ;;  %v1370_v33 = vsub.f32 %v10506_v37, %v1369_v49  ;;  %v8241_v0 = vpack.c.bf16 %v10442_v27, %v10435_v57 }
  0xe8   : > { %8178 = vmatprep.subr.bf16.mxu0 %v10336_v41 }
  0xe9   : > { %v1371_v60 = vand.u32 4294901760, %v1370_v33 }
  0xeb   : > { %8180 = vmatpush3.bf16.msra.mxu0 %v10336_v41 }
  0xec   : > { %8182 = vmatprep.subr.bf16.mxu0 %v10361_v53 }
  0xef   : > { %8184 = vmatpush3.bf16.msra.mxu0 %v10361_v53 }
  0xf0   : > { %8186 = vmatprep.subr.bf16.mxu0 %v10379_v43 }
  0xf3   : > { %8188 = vmatpush3.bf16.msra.mxu0 %v10379_v43 }
  0xf4   : > { %8190 = vmatprep.subr.bf16.mxu0 %v10417_v54 }
  0xf7   : > { %8192 = vmatpush3.bf16.msra.mxu0 %v10417_v54 }
  0xf8   : > { %8194 = vmatprep.subr.bf16.mxu0 %v8193_v4 }
  0xfa   : > { %6862 = vmatmul.mubr.f32.vlgmr.msra.gmra.mrb[4].mxu0 %v1242_v21 }
  0xfb   : > { %8196 = vmatpush3.bf16.msra.mxu0 %v8193_v4  ;;  %6864 = vmatprep.mubr.f32.mxu0 %v1252_v1  ;;  %v10492_v4 = vsub.f32 %v10327_v28, %v1187_v39  ;;  %v1342_v1 = vsub.f32 %v10469_v2, %v1341_v56  ;;  %v10511_v39 = vsub.f32 %v10366_v62, %v1193_v30 }
  0xfc   : > { %8198 = vmatprep.subr.bf16.mxu0 %v8197_v47 }
  0xfd   : > { %v1362_v28 = vand.u32 4294901760, %v10492_v4  ;;  %v1343_v20 = vand.u32 4294901760, %v1342_v1  ;;  %v1376_v44 = vand.u32 4294901760, %v10511_v39  ;;  %v8237_v1 = vpack.c.bf16 %v10407_v38, %v10405_v22 }
  0xfe   : > { %6865 = vmatmul.mubr.f32.gmra.mrb[6].mxu0 %v1262_v16  ;;  %v8209_v16 = vpack.c.bf16 %v1336_v8, %v1329_v40  ;;  %v8229_v40 = vpack.c.bf16 %v10370_v31, %v10368_v29  ;;  %v8233_v8 = vpack.c.bf16 %v10402_v10, %v10399_v14  ;;  %v12752_v29 = vand.u32 4294901760, %v10405_v22  ;;  %v5811_v22 = vld [vmem:[%s12667_s3 + $0x110] sm:$0xff] }
  0xff   : > { %8200 = vmatpush3.bf16.msra.mxu0 %v8197_v47  ;;  %6899 = vmatprep.mubr.f32.mxu0 %v10234_v13  ;;  %v1356_v47 = vsub.f32 %v10487_v52, %v1355_v59  ;;  %v1363_v61 = vsub.f32 %v10492_v4, %v1362_v28  ;;  %v8213_v62 = vpack.c.bf16 %v1350_v6, %v1343_v20  ;;  %v12753_v31 = vand.u32 4294901760, %v10407_v38  ;;  %v5812_v38 = vld [vmem:[%s12667_s3 + $0x118] sm:$0xff] }
 0x100   : > { %8202 = vmatprep.subr.bf16.mxu0 %v8201_v36  ;;  %v1377_v9 = vsub.f32 %v10511_v39, %v1376_v44  ;;  %v8249_v20 = vpack.c.bf16 %v10492_v4, %v10487_v52  ;;  %v8253_v6 = vpack.c.bf16 %v10511_v39, %v10506_v37  ;;  %v1949_v57 = vand.u32 4294901760, %v5811_v22  ;;  %v10693_v37 = vld [vmem:[%s12667_s3 + $0x140] sm:$0xff] }
 0x101   : > { %v1357_v30 = vand.u32 4294901760, %v1356_v47  ;;  %v1364_v21 = vand.u32 4294901760, %v1363_v61  ;;  %v12747_v47 = vand.u32 4294901760, %v10373_v32  ;;  %v12748_v61 = vand.u32 4294901760, %v10393_v50 }
 0x102   : > { %v1378_v19 = vand.u32 4294901760, %v1377_v9  ;;  %v1952_v27 = vand.u32 4294901760, %v5812_v38  ;;  %v1967_v39 = vand.u32 4294901760, %v10693_v37 }
 0x103   : > { %8204 = vmatpush3.bf16.msra.mxu0 %v8201_v36  ;;  %v8217_v25 = vpack.c.bf16 %v1364_v21, %v1357_v30  ;;  %v10722_v30 = vld [vmem:[%s12667_s3 + $0x160] sm:$0xff]  ;;  %v10727_v21 = vld [vmem:[%s12667_s3 + $0x168] sm:$0xff] }
 0x104   : > { %8206 = vmatprep.subr.bf16.mxu0 %v8205_v11  ;;  %v8221_v36 = vpack.c.bf16 %v1378_v19, %v1371_v60 }
 0x107   : > { %8208 = vmatpush3.bf16.msra.mxu0 %v8205_v11  ;;  %v8225_v11 = vpack.c.bf16 %v10331_v35, %v10329_v34  ;;  %v12749_v34 = vand.u32 4294901760, %v10399_v14  ;;  %v12750_v35 = vand.u32 4294901760, %v10402_v10  ;;  %v8317_v14 = vpack.c.bf16 %v1376_v44, %v1369_v49  ;;  %v10710_v44 = vld [vmem:[%s12667_s3 + $0x150] sm:$0xff] }
 0x108   : > { %8210 = vmatprep.subr.bf16.mxu0 %v8209_v16  ;;  %v1973_v60 = vand.u32 4294901760, %v10710_v44 }
 0x10b   : > { %8212 = vmatpush3.bf16.msra.mxu0 %v8209_v16  ;;  %v8245_v16 = vpack.c.bf16 %v10474_v46, %v10469_v2  ;;  %v10668_v2 = vpack.c.bf16 %v1952_v27, %v1949_v57 }
 0x10c   : > { %8214 = vmatprep.subr.bf16.mxu0 %v8213_v62 }
 0x10f   : > { %8216 = vmatpush3.bf16.msra.mxu0 %v8213_v62  ;;  %v326_v62 = vld [vmem:[%s10622_s29 + $0x8] sm:$0xff] }
 0x110   : > { %8218 = vmatprep.subr.bf16.mxu0 %v8217_v25 }
 0x113   : > { %8220 = vmatpush3.bf16.msra.mxu0 %v8217_v25 }
 0x114   : > { %8222 = vmatprep.subr.bf16.mxu0 %v8221_v36 }
 0x117   : > { %8224 = vmatpush3.bf16.msra.mxu0 %v8221_v36  ;;  %v327_v36 = vld [vmem:[%s10622_s29 + $0x10] sm:$0xff] }
 0x118   : > { %8226 = vmatprep.subr.bf16.mxu0 %v8225_v11 }
 0x11a   : > { %6900 = vmatmul.mubr.f32.vlgmr.msra.gmra.mrb[4].mxu0 %v10341_v7 }
 0x11b   : > { %8228 = vmatpush3.bf16.msra.mxu0 %v8225_v11  ;;  %6902 = vmatprep.mubr.f32.mxu0 %v10353_v42  ;;  %v10743_v11 = vand.u32 4294901760, %v326_v62 }
 0x11c   : > { %8230 = vmatprep.subr.bf16.mxu0 %v8229_v40 }
 0x11e   : > { %6903 = vmatmul.mubr.f32.gmra.mrb[6].mxu0 %v10382_v48 }
 0x11f   : > { %8232 = vmatpush3.bf16.msra.mxu0 %v8229_v40  ;;  %6937 = vmatprep.mubr.f32.mxu0 %v10245_v24  ;;  %v8289_v24 = vpack.c.bf16 %v1278_v51, %v1271_v12  ;;  %v8297_v12 = vpack.c.bf16 %v12750_v35, %v12749_v34  ;;  %v12751_v51 = vand.u32 4294901760, %v10410_v17  ;;  %v1979_v40 = vand.u32 4294901760, %v10722_v30 }
 0x120   : > { %8234 = vmatprep.subr.bf16.mxu0 %v8233_v8  ;;  %v10775_v34 = vsub.f32 %v326_v62, %v10743_v11 }
 0x123   : > { %8236 = vmatpush3.bf16.msra.mxu0 %v8233_v8  ;;  %v1982_v8 = vand.u32 4294901760, %v10727_v21 }
 0x124   : > { %8238 = vmatprep.subr.bf16.mxu0 %v8237_v1 }
 0x127   : > { %8240 = vmatpush3.bf16.msra.mxu0 %v8237_v1  ;;  %v10751_v1 = vld [vmem:[%s12667_s3 + $0x170] sm:$0xff] }
 0x128   : > { %8242 = vmatprep.subr.bf16.mxu0 %v8241_v0  ;;  %v1985_v35 = vand.u32 4294901760, %v10751_v1 }
 0x12b   : > { %8244 = vmatpush3.bf16.msra.mxu0 %v8241_v0  ;;  %v10756_v0 = vld [vmem:[%s12667_s3 + $0x178] sm:$0xff] }
 0x12c   : > { %8246 = vmatprep.subr.bf16.mxu0 %v8245_v16 }
 0x12f   : > { %8248 = vmatpush3.bf16.msra.mxu0 %v8245_v16 }
 0x130   : > { %8250 = vmatprep.subr.bf16.mxu0 %v8249_v20 }
 0x133   : > { %8252 = vmatpush3.bf16.msra.mxu0 %v8249_v20 }
 0x134   : > { %8254 = vmatprep.subr.bf16.mxu0 %v8253_v6 }
 0x137   : > { %8256 = vmatpush3.bf16.msra.mxu0 %v8253_v6  ;;  %v10760_v6 = vand.u32 4294901760, %v327_v36 }
 0x138   : > { %8258 = vmatprep.subr.bf16.mxu0 %v10257_v55 }
 0x13a   : > { %6938 = vmatmul.mubr.f32.vlgmr.msra.gmra.mrb[4].mxu0 %v10373_v32  ;;  %v8301_v32 = vpack.c.bf16 %v12753_v31, %v12752_v29  ;;  %v5790_v29 = vld [vmem:[%s12668_s4] ss:$0 sm:$0xff]  ;;  %v10789_v31 = vpack.c.bf16 %v1982_v8, %v1979_v40 }
 0x13b   : > { %8260 = vmatpush3.bf16.msra.mxu0 %v10257_v55  ;;  %6940 = vmatprep.mubr.f32.mxu0 %v10393_v50  ;;  %v8305_v50 = vpack.c.bf16 %v1334_v26, %v1327_v15  ;;  %v10656_v15 = vld [vmem:[%s12667_s3 + $0x120] sm:$0xff]  ;;  %v10661_v26 = vld [vmem:[%s12667_s3 + $0x128] sm:$0xff] }
 0x13c   : > { %8262 = vmatprep.subr.bf16.mxu0 %v10274_v3  ;;  %v1955_v46 = vand.u32 4294901760, %v10656_v15 }
 0x13e   : > { %6941 = vmatmul.mubr.f32.gmra.mrb[6].mxu0 %v10410_v17 }
 0x13f   : > { %8264 = vmatpush3.bf16.msra.mxu0 %v10274_v3  ;;  %6975 = vmatprep.mubr.f32.mxu0 %v1230_v18  ;;  %v8293_v18 = vpack.c.bf16 %v1292_v45, %v1285_v23  ;;  %v8309_v23 = vpack.c.bf16 %v1348_v63, %v1341_v56  ;;  %v8313_v45 = vpack.c.bf16 %v1362_v28, %v1355_v59  ;;  %v1958_v56 = vand.u32 4294901760, %v10661_v26  ;;  %v10675_v63 = vld [vmem:[%s12667_s3 + $0x130] sm:$0xff] }
 0x140   : > { %8266 = vmatprep.subr.bf16.mxu0 %v10288_v58  ;;  %v1961_v59 = vand.u32 4294901760, %v10675_v63 }
 0x141   : > { %v10686_v4 = vpack.c.bf16 %v1958_v56, %v1955_v46 }
 0x143   : > { %8268 = vmatpush3.bf16.msra.mxu0 %v10288_v58 }
 0x144   : > { %8270 = vmatprep.subr.bf16.mxu0 %v10303_v5 }
 0x147   : > { %8272 = vmatpush3.bf16.msra.mxu0 %v10303_v5 }
 0x148   : > { %8274 = vmatprep.subr.bf16.mxu0 %v10336_v41 }
 0x14b   : > { %8276 = vmatpush3.bf16.msra.mxu0 %v10336_v41 }
 0x14c   : > { %8278 = vmatprep.subr.bf16.mxu0 %v10361_v53 }
 0x14f   : > { %8280 = vmatpush3.bf16.msra.mxu0 %v10361_v53 }
 0x150   : > { %8282 = vmatprep.subr.bf16.mxu0 %v10379_v43 }
 0x153   : > { %8284 = vmatpush3.bf16.msra.mxu0 %v10379_v43 }
 0x154   : > { %8286 = vmatprep.subr.bf16.mxu0 %v10417_v54 }
 0x157   : > { %8288 = vmatpush3.bf16.msra.mxu0 %v10417_v54 }
 0x158   : > { %8290 = vmatprep.subr.bf16.mxu0 %v8289_v24 }
 0x15a   : > { %6976 = vmatmul.mubr.f32.vlgmr.msra.gmra.mrb[4].mxu0 %v12747_v47  ;;  %v10770_v47 = vsub.f32 %v5811_v22, %v1949_v57 }
 0x15b   : > { %8292 = vmatpush3.bf16.msra.mxu0 %v8289_v24  ;;  %6978 = vmatprep.mubr.f32.mxu0 %v12748_v61  ;;  %v328_v24 = vld [vmem:[%s10622_s29 + $0x18] sm:$0xff]  ;;  %v10772_v61 = vsub.f32 %v5812_v38, %v1952_v27 }
 0x15c   : > { %8294 = vmatprep.subr.bf16.mxu0 %v8293_v18 }
 0x15e   : > { %6979 = vmatmul.mubr.f32.gmra.mrb[6].mxu0 %v12751_v51  ;;  %v10779_v51 = vand.u32 4294901760, %v328_v24 }
 0x15f   : > { %8296 = vmatpush3.bf16.msra.mxu0 %v8293_v18  ;;  %7013 = vmatprep.mubr.f32.mxu0 %v10234_v13 }
 0x160   : > { %8298 = vmatprep.subr.bf16.mxu0 %v8297_v12 }
 0x163   : > { %8300 = vmatpush3.bf16.msra.mxu0 %v8297_v12  ;;  %v1988_v12 = vand.u32 4294901760, %v10756_v0 }
 0x164   : > { %8302 = vmatprep.subr.bf16.mxu0 %v8301_v32 }
 0x165   : > { %v10819_v57 = vpack.c.bf16 %v1988_v12, %v1985_v35 }
 0x167   : > { %8304 = vmatpush3.bf16.msra.mxu0 %v8301_v32 }
 0x168   : > { %8306 = vmatprep.subr.bf16.mxu0 %v8305_v50 }
 0x16b   : > { %8308 = vmatpush3.bf16.msra.mxu0 %v8305_v50 }
 0x16c   : > { %8310 = vmatprep.subr.bf16.mxu0 %v8309_v23 }
 0x16f   : > { %8312 = vmatpush3.bf16.msra.mxu0 %v8309_v23  ;;  %v10798_v23 = vsub.f32 %v327_v36, %v10760_v6 }
 0x170   : > { %8314 = vmatprep.subr.bf16.mxu0 %v8313_v45 }
 0x173   : > { %8316 = vmatpush3.bf16.msra.mxu0 %v8313_v45  ;;  %v12688_v45 = vand.u32 4294901760, %v10770_v47 }
 0x174   : > { %8318 = vmatprep.subr.bf16.mxu0 %v8317_v14 }
 0x177   : > { %8320 = vmatpush3.bf16.msra.mxu0 %v8317_v14  ;;  %v12687_v14 = vand.u32 4294901760, %v10772_v61 }
 0x178   : > { %8322 = vmatprep.subr.bf16.mxu0 %v10257_v55 }
 0x17a   : > { %7014 = vmatmul.mubr.f32.vlgmr.msra.gmra.mrb[4].mxu0 %v10341_v7 }
 0x17b   : > { %8324 = vmatpush3.bf16.msra.mxu0 %v10257_v55  ;;  %7016 = vmatprep.mubr.f32.mxu0 %v10353_v42  ;;  %v325_v55 = vld [vmem:[%s10622_s29] sm:$0xff] }
 0x17c   : > { %8326 = vmatprep.subr.bf16.mxu0 %v10274_v3 }
 0x17e   : > { %7017 = vmatmul.mubr.f32.gmra.mrb[6].mxu0 %v10382_v48 }
 0x17f   : > { %8328 = vmatpush3.bf16.msra.mxu0 %v10274_v3  ;;  %7051 = vmatprep.mubr.f32.mxu0 %v10234_v13  ;;  %v10628_v13 = vand.u32 4294901760, %v325_v55  ;;  %v5809_v3 = vld [vmem:[%s12667_s3 + $0x100] sm:$0xff] }
 0x180   : > { %8330 = vmatprep.subr.bf16.mxu0 %v10288_v58 }
 0x183   : > { %8332 = vmatpush3.bf16.msra.mxu0 %v10288_v58  ;;  %v5810_v58 = vld [vmem:[%s12667_s3 + $0x108] sm:$0xff] }
 0x184   : > { %8334 = vmatprep.subr.bf16.mxu0 %v10303_v5  ;;  %v1946_v10 = vand.u32 4294901760, %v5810_v58 }
 0x186   : > { %v10731_v9 = vsub.f32 %v5810_v58, %v1946_v10 }
 0x187   : > { %8336 = vmatpush3.bf16.msra.mxu0 %v10303_v5  ;;  %v10639_v5 = vsub.f32 %v325_v55, %v10628_v13  ;;  %v10804_v55 = vsub.f32 %v10656_v15, %v1955_v46  ;;  %v10825_v15 = vsub.f32 %v328_v24, %v10779_v51 }
 0x188   : > { %8338 = vmatprep.subr.bf16.mxu0 %v10336_v41  ;;  %v12696_v20 = vand.u32 4294901760, %v10731_v9 }
 0x189   : > { %v2025_v17 = vand.u32 4294901760, %v10639_v5 }
 0x18a   : > { %v2074_v50 = vsub.f32 %v10731_v9, %v12696_v20 }
 0x18b   : > { %8340 = vmatpush3.bf16.msra.mxu0 %v10336_v41  ;;  %v1943_v41 = vand.u32 4294901760, %v5809_v3 }
 0x18c   : > { %8342 = vmatprep.subr.bf16.mxu0 %v10361_v53  ;;  %v2075_v46 = vand.u32 4294901760, %v2074_v50 }
 0x18d   : > { %v10729_v33 = vsub.f32 %v5809_v3, %v1943_v41  ;;  %v10807_v3 = vsub.f32 %v10661_v26, %v1958_v56  ;;  %v12694_v56 = vand.u32 4294901760, %v10798_v23 }
 0x18f   : > { %8344 = vmatpush3.bf16.msra.mxu0 %v10361_v53  ;;  %v10651_v53 = vpack.c.bf16 %v1946_v10, %v1943_v41  ;;  %v12697_v16 = vand.u32 4294901760, %v10729_v33  ;;  %v12689_v41 = vand.u32 4294901760, %v10775_v34  ;;  %v10811_v10 = vsub.f32 %v10675_v63, %v1961_v59 }
 0x190   : > { %8346 = vmatprep.subr.bf16.mxu0 %v10379_v43  ;;  %v2081_v63 = vsub.f32 %v10770_v47, %v12688_v45 }
 0x191   : > { %v2067_v32 = vsub.f32 %v10729_v33, %v12697_v16  ;;  %v2036_v62 = vsub.f32 %v10775_v34, %v12689_v41  ;;  %v12690_v36 = vand.u32 4294901760, %v10811_v10  ;;  %v2046_v41 = vsub.f32 %v10798_v23, %v12694_v56 }
 0x193   : > { %8348 = vmatpush3.bf16.msra.mxu0 %v10379_v43  ;;  %v2026_v43 = vsub.f32 %v10639_v5, %v2025_v17 }
 0x194   : > { %8350 = vmatprep.subr.bf16.mxu0 %v10417_v54 }
 0x195   : > { %v2027_v52 = vand.u32 4294901760, %v2026_v43  ;;  %v2068_v43 = vand.u32 4294901760, %v2067_v32 }
 0x197   : > { %8352 = vmatpush3.bf16.msra.mxu0 %v10417_v54  ;;  %v10680_v54 = vld [vmem:[%s12667_s3 + $0x138] sm:$0xff]  ;;  %v8385_v45 = vpack.c.bf16 %v2075_v46, %v2068_v43  ;;  %v2037_v46 = vand.u32 4294901760, %v2036_v62  ;;  %v10886_v62 = vsub.f32 %v10710_v44, %v1973_v60 }
 0x198   : > { %8354 = vmatprep.subr.bf16.mxu0 %v10651_v53  ;;  %v1964_v28 = vand.u32 4294901760, %v10680_v54 }
 0x19a   : > { %7052 = vmatmul.mubr.f32.vlgmr.msra.gmra.mrb[4].mxu0 %v10341_v7  ;;  %v10698_v7 = vld [vmem:[%s12667_s3 + $0x148] sm:$0xff]  ;;  %v10822_v27 = vsub.f32 %v10680_v54, %v1964_v28  ;;  %v2088_v54 = vsub.f32 %v10772_v61, %v12687_v14 }
 0x19b   : > { %8356 = vmatpush3.bf16.msra.mxu0 %v10651_v53  ;;  %7054 = vmatprep.mubr.f32.mxu0 %v10353_v42  ;;  %v10703_v42 = vpack.c.bf16 %v1964_v28, %v1961_v59  ;;  %v1970_v49 = vand.u32 4294901760, %v10698_v7  ;;  %v12692_v59 = vand.u32 4294901760, %v10807_v3 }
 0x19c   : > { %8358 = vmatprep.subr.bf16.mxu0 %v10668_v2  ;;  %v12691_v50 = vand.u32 4294901760, %v10822_v27 }
 0x19d   : > { %v10738_v25 = vpack.c.bf16 %v1970_v49, %v1967_v39  ;;  %v2102_v43 = vsub.f32 %v10807_v3, %v12692_v59 }
 0x19e   : > { %7055 = vmatmul.mubr.f32.gmra.mrb[6].mxu0 %v10382_v48  ;;  %v10715_v48 = vld [vmem:[%s12667_s3 + $0x158] sm:$0xff] }
 0x19f   : > { %8360 = vmatpush3.bf16.msra.mxu0 %v10668_v2  ;;  %7089 = vmatprep.mubr.f32.mxu0 %v2027_v52  ;;  %v1976_v19 = vand.u32 4294901760, %v10715_v48  ;;  %v12693_v52 = vand.u32 4294901760, %v10804_v55  ;;  %v2103_v56 = vand.u32 4294901760, %v2102_v43 }
 0x1a0   : > { %8362 = vmatprep.subr.bf16.mxu0 %v10686_v4 }
 0x1a1   : > { %v10768_v18 = vpack.c.bf16 %v1976_v19, %v1973_v60 }
 0x1a3   : > { %8364 = vmatpush3.bf16.msra.mxu0 %v10686_v4 }
 0x1a4   : > { %8366 = vmatprep.subr.bf16.mxu0 %v10703_v42 }
 0x1a7   : > { %8368 = vmatpush3.bf16.msra.mxu0 %v10703_v42 }
 0x1a8   : > { %8370 = vmatprep.subr.bf16.mxu0 %v10738_v25 }
 0x1ab   : > { %8372 = vmatpush3.bf16.msra.mxu0 %v10738_v25 }
 0x1ac   : > { %8374 = vmatprep.subr.bf16.mxu0 %v10768_v18 }
 0x1ad   : > { %v6825_v58 = vpop.f32.mrb[0].mxu0 }
 0x1ae   : > { %v10813_v22 = vadd.f32 %v6825_v58, %v5790_v29   ;;  %v1100_v38 = vpop.f32.mrb[1].mxu0  ;;  %v10850_v58 = vsub.f32 %v10693_v37, %v1967_v39  ;;  %v2082_v37 = vand.u32 4294901760, %v2081_v63  ;;  %v2089_v39 = vand.u32 4294901760, %v2088_v54 }
 0x1af   : > { %v10827_v26 = vadd.f32 %v5790_v29, %v1100_v38   ;;  %8376 = vmatpush3.bf16.msra.mxu0 %v10768_v18  ;;  %v12695_v38 = vand.u32 4294901760, %v10825_v15 }
 0x1b0   : > { %8378 = vmatprep.subr.bf16.mxu0 %v10789_v31  ;;  %v2122_v63 = vand.u32 4294901760, %v10850_v58  ;;  %v8389_v59 = vpack.c.bf16 %v2089_v39, %v2082_v37  ;;  %v10904_v37 = vsub.f32 %v10722_v30, %v1979_v40  ;;  %v10923_v40 = vsub.f32 %v10751_v1, %v1985_v35 }
 0x1b1   : > { %v6828_v28 = vpop.f32.mrb[2].mxu0  ;;  %v2056_v54 = vsub.f32 %v10825_v15, %v12695_v38 }
 0x1b2   : > { %v10844_v24 = vadd.f32 %v6828_v28, %v5790_v29   ;;  %v1112_v32 = vpop.f32.mrb[3].mxu0  ;;  %v10859_v28 = vsub.f32 %v10698_v7, %v1970_v49  ;;  %v2109_v7 = vsub.f32 %v10811_v10, %v12690_v36  ;;  %v2116_v49 = vsub.f32 %v10822_v27, %v12691_v50 }
 0x1b3   : > { %v10853_v14 = vadd.f32 %v5790_v29, %v1112_v32   ;;  %8380 = vmatpush3.bf16.msra.mxu0 %v10789_v31  ;;  %v2095_v29 = vsub.f32 %v10804_v55, %v12693_v52  ;;  %v10891_v36 = vsub.f32 %v10715_v48, %v1976_v19  ;;  %v2047_v50 = vand.u32 4294901760, %v2046_v41 }
 0x1b4   : > { %8382 = vmatprep.subr.bf16.mxu0 %v10819_v57  ;;  %v2129_v32 = vand.u32 4294901760, %v10859_v28  ;;  %v2110_v38 = vand.u32 4294901760, %v2109_v7  ;;  %v2117_v20 = vand.u32 4294901760, %v2116_v49  ;;  %v2057_v16 = vand.u32 4294901760, %v2056_v54 }
 0x1b5   : > { %v2096_v52 = vand.u32 4294901760, %v2095_v29  ;;  %v2123_v44 = vsub.f32 %v10850_v58, %v2122_v63  ;;  %v2136_v48 = vand.u32 4294901760, %v10886_v62  ;;  %v2143_v19 = vand.u32 4294901760, %v10891_v36 }
 0x1b6   : > { %v2130_v60 = vsub.f32 %v10859_v28, %v2129_v32  ;;  %v8397_v39 = vpack.c.bf16 %v2117_v20, %v2110_v38  ;;  %v2150_v30 = vand.u32 4294901760, %v10904_v37  ;;  %v2164_v1 = vand.u32 4294901760, %v10923_v40 }
 0x1b7   : > { %8384 = vmatpush3.bf16.msra.mxu0 %v10819_v57  ;;  %v8393_v41 = vpack.c.bf16 %v2103_v56, %v2096_v52  ;;  %v2124_v29 = vand.u32 4294901760, %v2123_v44  ;;  %v2144_v56 = vsub.f32 %v10891_v36, %v2143_v19 }
 0x1b8   : > { %8386 = vmatprep.subr.bf16.mxu0 %v8385_v45  ;;  %v2131_v43 = vand.u32 4294901760, %v2130_v60  ;;  %v2165_v7 = vsub.f32 %v10923_v40, %v2164_v1 }
 0x1b9   : > { %v2145_v52 = vand.u32 4294901760, %v2144_v56  ;;  %v8433_v56 = vpack.c.bf16 %v10859_v28, %v10850_v58 }
 0x1ba   : > { %7090 = vmatmul.mubr.f32.vlgmr.msra.gmra.mrb[8].mxu0 %v2037_v46  ;;  %v2166_v44 = vand.u32 4294901760, %v2165_v7  ;;  %v12759_v7 = vand.u32 4294901760, %v10798_v23 }
 0x1bb   : > { %8388 = vmatpush3.bf16.msra.mxu0 %v8385_v45  ;;  %7092 = vmatprep.mubr.f32.mxu0 %v2047_v50  ;;  %v10909_v45 = vsub.f32 %v10727_v21, %v1982_v8  ;;  %v2137_v50 = vsub.f32 %v10886_v62, %v2136_v48  ;;  %v10928_v8 = vsub.f32 %v10756_v0, %v1988_v12 }
 0x1bc   : > { %8390 = vmatprep.subr.bf16.mxu0 %v8389_v59 }
 0x1bd   : > { %v2157_v21 = vand.u32 4294901760, %v10909_v45  ;;  %v2138_v20 = vand.u32 4294901760, %v2137_v50  ;;  %v2171_v35 = vand.u32 4294901760, %v10928_v8  ;;  %v8429_v50 = vpack.c.bf16 %v10822_v27, %v10811_v10 }
 0x1be   : > { %7093 = vmatmul.mubr.f32.gmra.mrb[10].mxu0 %v2057_v16  ;;  %v8401_v16 = vpack.c.bf16 %v2131_v43, %v2124_v29  ;;  %v8421_v29 = vpack.c.bf16 %v10772_v61, %v10770_v47  ;;  %v8425_v43 = vpack.c.bf16 %v10807_v3, %v10804_v55 }
 0x1bf   : > { %8392 = vmatpush3.bf16.msra.mxu0 %v8389_v59  ;;  %7127 = vmatprep.mubr.f32.mxu0 %v10628_v13  ;;  %v2151_v59 = vsub.f32 %v10904_v37, %v2150_v30  ;;  %v2158_v38 = vsub.f32 %v10909_v45, %v2157_v21  ;;  %v8405_v0 = vpack.c.bf16 %v2145_v52, %v2138_v20 }
 0x1c0   : > { %8394 = vmatprep.subr.bf16.mxu0 %v8393_v41  ;;  %v2172_v49 = vsub.f32 %v10928_v8, %v2171_v35  ;;  %v8441_v20 = vpack.c.bf16 %v10909_v45, %v10904_v37  ;;  %v8445_v52 = vpack.c.bf16 %v10928_v8, %v10923_v40 }
 0x1c1   : > { %v2152_v12 = vand.u32 4294901760, %v2151_v59  ;;  %v2159_v46 = vand.u32 4294901760, %v2158_v38  ;;  %v12756_v38 = vand.u32 4294901760, %v10770_v47  ;;  %v12763_v47 = vand.u32 4294901760, %v10811_v10 }
 0x1c2   : > { %v2173_v60 = vand.u32 4294901760, %v2172_v49  ;;  %v8509_v10 = vpack.c.bf16 %v2171_v35, %v2164_v1 }
 0x1c3   : > { %8396 = vmatpush3.bf16.msra.mxu0 %v8393_v41  ;;  %v8409_v54 = vpack.c.bf16 %v2159_v46, %v2152_v12  ;;  %v12758_v46 = vand.u32 4294901760, %v10775_v34 }
 0x1c4   : > { %8398 = vmatprep.subr.bf16.mxu0 %v8397_v39  ;;  %v8413_v41 = vpack.c.bf16 %v2173_v60, %v2166_v44 }
 0x1c7   : > { %8400 = vmatpush3.bf16.msra.mxu0 %v8397_v39  ;;  %v8417_v39 = vpack.c.bf16 %v10731_v9, %v10729_v33 }
 0x1c8   : > { %8402 = vmatprep.subr.bf16.mxu0 %v8401_v16 }
 0x1cb   : > { %8404 = vmatpush3.bf16.msra.mxu0 %v8401_v16  ;;  %v8437_v16 = vpack.c.bf16 %v10891_v36, %v10886_v62  ;;  %v11078_v62 = vmov 0.0  }
 0x1cc   : > { %8406 = vmatprep.subr.bf16.mxu0 %v8405_v0 }
 0x1cf   : > { %8408 = vmatpush3.bf16.msra.mxu0 %v8405_v0  ;;  %v12757_v0 = vand.u32 4294901760, %v10772_v61  ;;  %v12764_v61 = vand.u32 4294901760, %v10822_v27 }
 0x1d0   : > { %8410 = vmatprep.subr.bf16.mxu0 %v8409_v54 }
 0x1d1   : > { %v8485_v12 = vpack.c.bf16 %v12757_v0, %v12756_v38 }
 0x1d3   : > { %8412 = vmatpush3.bf16.msra.mxu0 %v8409_v54  ;;  %v12762_v54 = vand.u32 4294901760, %v10825_v15 }
 0x1d4   : > { %8414 = vmatprep.subr.bf16.mxu0 %v8413_v41 }
 0x1d7   : > { %8416 = vmatpush3.bf16.msra.mxu0 %v8413_v41 }
 0x1d8   : > { %8418 = vmatprep.subr.bf16.mxu0 %v8417_v39 }
 0x1da   : > { %7128 = vmatmul.mubr.f32.vlgmr.msra.gmra.mrb[8].mxu0 %v10743_v11 }
 0x1db   : > { %8420 = vmatpush3.bf16.msra.mxu0 %v8417_v39  ;;  %7130 = vmatprep.mubr.f32.mxu0 %v10760_v6 }
 0x1dc   : > { %8422 = vmatprep.subr.bf16.mxu0 %v8421_v29 }
 0x1de   : > { %7131 = vmatmul.mubr.f32.gmra.mrb[10].mxu0 %v10779_v51 }
 0x1df   : > { %8424 = vmatpush3.bf16.msra.mxu0 %v8421_v29  ;;  %7165 = vmatprep.mubr.f32.mxu0 %v10639_v5  ;;  %v12754_v5 = vand.u32 4294901760, %v10729_v33  ;;  %v12760_v33 = vand.u32 4294901760, %v10804_v55  ;;  %v8501_v55 = vpack.c.bf16 %v2143_v19, %v2136_v48  ;;  %v11080_v48 = vmov 0.0  }
 0x1e0   : > { %8426 = vmatprep.subr.bf16.mxu0 %v8425_v43  ;;  %v11082_v19 = vmov 0.0  }
 0x1e3   : > { %8428 = vmatpush3.bf16.msra.mxu0 %v8425_v43 }
 0x1e4   : > { %8430 = vmatprep.subr.bf16.mxu0 %v8429_v50 }
 0x1e7   : > { %8432 = vmatpush3.bf16.msra.mxu0 %v8429_v50 }
 0x1e8   : > { %8434 = vmatprep.subr.bf16.mxu0 %v8433_v56 }
 0x1eb   : > { %8436 = vmatpush3.bf16.msra.mxu0 %v8433_v56 }
 0x1ec   : > { %8438 = vmatprep.subr.bf16.mxu0 %v8437_v16 }
 0x1ef   : > { %8440 = vmatpush3.bf16.msra.mxu0 %v8437_v16 }
 0x1f0   : > { %8442 = vmatprep.subr.bf16.mxu0 %v8441_v20 }
 0x1f3   : > { %8444 = vmatpush3.bf16.msra.mxu0 %v8441_v20 }
 0x1f4   : > { %8446 = vmatprep.subr.bf16.mxu0 %v8445_v52 }
 0x1f7   : > { %8448 = vmatpush3.bf16.msra.mxu0 %v8445_v52 }
 0x1f8   : > { %8450 = vmatprep.subr.bf16.mxu0 %v10651_v53 }
 0x1fa   : > { %7166 = vmatmul.mubr.f32.vlgmr.msra.gmra.mrb[8].mxu0 %v10775_v34  ;;  %v8493_v34 = vpack.c.bf16 %v12764_v61, %v12763_v47 }
 0x1fb   : > { %8452 = vmatpush3.bf16.msra.mxu0 %v10651_v53  ;;  %7168 = vmatprep.mubr.f32.mxu0 %v10798_v23  ;;  %v8497_v23 = vpack.c.bf16 %v2129_v32, %v2122_v63  ;;  %v11076_v32 = vmov 0.0  }
 0x1fc   : > { %8454 = vmatprep.subr.bf16.mxu0 %v10668_v2 }
 0x1fe   : > { %7169 = vmatmul.mubr.f32.gmra.mrb[10].mxu0 %v10825_v15 }
 0x1ff   : > { %8456 = vmatpush3.bf16.msra.mxu0 %v10668_v2  ;;  %7203 = vmatprep.mubr.f32.mxu0 %v2025_v17  ;;  %v12755_v17 = vand.u32 4294901760, %v10731_v9  ;;  %v12761_v9 = vand.u32 4294901760, %v10807_v3  ;;  %v8505_v3 = vpack.c.bf16 %v2157_v21, %v2150_v30 }
 0x200   : > { %8458 = vmatprep.subr.bf16.mxu0 %v10686_v4 }
 0x201   : > { %v8481_v59 = vpack.c.bf16 %v12755_v17, %v12754_v5  ;;  %v8489_v49 = vpack.c.bf16 %v12761_v9, %v12760_v33 }
 0x203   : > { %8460 = vmatpush3.bf16.msra.mxu0 %v10686_v4 }
 0x204   : > { %8462 = vmatprep.subr.bf16.mxu0 %v10703_v42 }
 0x207   : > { %8464 = vmatpush3.bf16.msra.mxu0 %v10703_v42 }
 0x208   : > { %8466 = vmatprep.subr.bf16.mxu0 %v10738_v25 }
 0x20b   : > { %8468 = vmatpush3.bf16.msra.mxu0 %v10738_v25 }
 0x20c   : > { %8470 = vmatprep.subr.bf16.mxu0 %v10768_v18 }
 0x20f   : > { %8472 = vmatpush3.bf16.msra.mxu0 %v10768_v18 }
 0x210   : > { %8474 = vmatprep.subr.bf16.mxu0 %v10789_v31 }
 0x213   : > { %8476 = vmatpush3.bf16.msra.mxu0 %v10789_v31 }
 0x214   : > { %8478 = vmatprep.subr.bf16.mxu0 %v10819_v57 }
 0x217   : > { %8480 = vmatpush3.bf16.msra.mxu0 %v10819_v57 }
 0x218   : > { %8482 = vmatprep.subr.bf16.mxu0 %v8481_v59 }
 0x21a   : > { %7204 = vmatmul.mubr.f32.vlgmr.msra.gmra.mrb[8].mxu0 %v12758_v46 }
 0x21b   : > { %8484 = vmatpush3.bf16.msra.mxu0 %v8481_v59  ;;  %7206 = vmatprep.mubr.f32.mxu0 %v12759_v7 }
 0x21c   : > { %8486 = vmatprep.subr.bf16.mxu0 %v8485_v12 }
 0x21e   : > { %7207 = vmatmul.mubr.f32.gmra.mrb[10].mxu0 %v12762_v54 }
 0x21f   : > { %8488 = vmatpush3.bf16.msra.mxu0 %v8485_v12  ;;  %7241 = vmatprep.mubr.f32.mxu0 %v10628_v13 }
 0x220   : > { %8490 = vmatprep.subr.bf16.mxu0 %v8489_v49 }
 0x223   : > { %8492 = vmatpush3.bf16.msra.mxu0 %v8489_v49 }
 0x224   : > { %8494 = vmatprep.subr.bf16.mxu0 %v8493_v34 }
 0x227   : > { %8496 = vmatpush3.bf16.msra.mxu0 %v8493_v34 }
 0x228   : > { %8498 = vmatprep.subr.bf16.mxu0 %v8497_v23 }
 0x22b   : > { %8500 = vmatpush3.bf16.msra.mxu0 %v8497_v23 }
 0x22c   : > { %8502 = vmatprep.subr.bf16.mxu0 %v8501_v55 }
 0x22f   : > { %8504 = vmatpush3.bf16.msra.mxu0 %v8501_v55 }
 0x230   : > { %8506 = vmatprep.subr.bf16.mxu0 %v8505_v3 }
 0x233   : > { %8508 = vmatpush3.bf16.msra.mxu0 %v8505_v3 }
 0x234   : > { %8510 = vmatprep.subr.bf16.mxu0 %v8509_v10 }
 0x237   : > { %8512 = vmatpush3.bf16.msra.mxu0 %v8509_v10 }
 0x238   : > { %8514 = vmatprep.subr.bf16.mxu0 %v10651_v53 }
 0x23a   : > { %7242 = vmatmul.mubr.f32.vlgmr.msra.gmra.mrb[8].mxu0 %v10743_v11 }
 0x23b   : > { %8516 = vmatpush3.bf16.msra.mxu0 %v10651_v53  ;;  %7244 = vmatprep.mubr.f32.mxu0 %v10760_v6 }
 0x23c   : > { %8518 = vmatprep.subr.bf16.mxu0 %v10668_v2 }
 0x23e   : > { %7245 = vmatmul.mubr.f32.gmra.mrb[10].mxu0 %v10779_v51 }
 0x23f   : > { %8520 = vmatpush3.bf16.msra.mxu0 %v10668_v2  ;;  %7279 = vmatprep.mubr.f32.mxu0 %v10628_v13  ;;  %v5808_v13 = vld [vmem:[%s12668_s4 + $0x1] ss:$0 sm:$0xff] }
 0x240   : > { %8522 = vmatprep.subr.bf16.mxu0 %v10686_v4 }
 0x243   : > { %8524 = vmatpush3.bf16.msra.mxu0 %v10686_v4 }
 0x244   : > { %8526 = vmatprep.subr.bf16.mxu0 %v10703_v42 }
 0x247   : > { %8528 = vmatpush3.bf16.msra.mxu0 %v10703_v42 }
 0x248   : > { %8530 = vmatprep.subr.bf16.mxu0 %v10738_v25 }
 0x24b   : > { %8532 = vmatpush3.bf16.msra.mxu0 %v10738_v25 }
 0x24c   : > { %8534 = vmatprep.subr.bf16.mxu0 %v10768_v18 }
 0x24f   : > { %8536 = vmatpush3.bf16.msra.mxu0 %v10768_v18 }
 0x250   : > { %8538 = vmatprep.subr.bf16.mxu0 %v10789_v31 }
 0x253   : > { %8540 = vmatpush3.bf16.msra.mxu0 %v10789_v31 }
 0x254   : > { %8542 = vmatprep.subr.bf16.mxu0 %v10819_v57 }
 0x257   : > { %8544 = vmatpush3.bf16.msra.mxu0 %v10819_v57 }
 0x25a   : > { %7280 = vmatmul.mubr.f32.vlgmr.msra.gmra.mrb[8].mxu0 %v10743_v11 }
 0x25b   : > { %7282 = vmatprep.mubr.f32.mxu0 %v10760_v6  ;;  %v5826_v6 = vld [vmem:[%s12668_s4 + $0x2] ss:$0 sm:$0xff] }
 0x25e   : > { %7283 = vmatmul.mubr.f32.gmra.mrb[10].mxu0 %v10779_v51 }
 0x26d   : > { %v7053_v53 = vpop.f32.mrb[4].mxu0 }
 0x26e   : > { %v9125_v2 = vadd.f32 %v7053_v53, %v5808_v13  ;;  %v1895_v4 = vpop.f32.mrb[5].mxu0 }
 0x26f   : > { %v9126_v42 = vadd.f32 %v5808_v13, %v1895_v4 }
 0x270   : > { %2728 = vst [vmem:[#allocation2 + $0x8] ss:$4 sps:$4 sm:$0x33] %v9125_v2   ;;  %2732 = vst [vmem:[#allocation2 + $0x8] ss:$4 sps:$4 sm:$0xcc] %v9125_v2  }
 0x271   : > { %2712 = vst [vmem:[#allocation2] ss:$4 sps:$4 sm:$0x33] %v9126_v42   ;;  %2716 = vst [vmem:[#allocation2] ss:$4 sps:$4 sm:$0xcc] %v9126_v42  }
 0x272   : > { %v7056_v25 = vpop.f32.mrb[6].mxu0 }
 0x273   : > { %v9127_v18 = vadd.f32 %v7056_v25, %v5808_v13  ;;  %v1907_v11 = vpop.f32.mrb[7].mxu0 }
 0x274   : > { %v9128_v31 = vadd.f32 %v5808_v13, %v1907_v11 }
 0x275   : > { %2760 = vst [vmem:[#allocation2 + $0x18] ss:$4 sps:$4 sm:$0x33] %v9127_v18   ;;  %2764 = vst [vmem:[#allocation2 + $0x18] ss:$4 sps:$4 sm:$0xcc] %v9127_v18  }
 0x276   : > { %2744 = vst [vmem:[#allocation2 + $0x10] ss:$4 sps:$4 sm:$0x33] %v9128_v31   ;;  %2748 = vst [vmem:[#allocation2 + $0x10] ss:$4 sps:$4 sm:$0xcc] %v9128_v31  }
 0x32d   : > { %v7281_v51 = vpop.f32.mrb[8].mxu0 }
 0x32e   : > { %v11053_v57 = vadd.f32 %v7281_v51, %v5826_v6   ;;  %v2690_v27 = vpop.f32.mrb[9].mxu0 }
 0x32f   : > { %v11055_v15 = vadd.f32 %v5826_v6, %v2690_v27  }
 0x331   : > { %v7284_v36 = vpop.f32.mrb[10].mxu0 }
 0x332   : > { %v11057_v58 = vadd.f32 %v7284_v36, %v5826_v6   ;;  %v2702_v28 = vpop.f32.mrb[11].mxu0 }
 0x333   : > { %v11059_v63 = vadd.f32 %v5826_v6, %v2702_v28  }
 0x334 LB: >> { %s5827_s14 = sshll.u32 %s9728_s20, 2  ;;  %v2810_v8 = vlaneseq  ;;  %v2806_v1 = vrot.slane %v9708_v26, 1  ;;  %v2807_v35 = vrot.slane %v9704_v22, 1  ;;  %v2808_v44 = vrot.slane %v9700_v14, 1  ;;  %s2780_s20 = sadd.s32 1, %s9728_s20   ;;  %s9728_s20 = sphi %s11084_s20, %s2780_s20   ;;  %v9724_v19 = vphi %v11082_v19, %v12768_v19   ;;  %v9720_v48 = vphi %v11080_v48, %v12767_v48   ;;  %v9716_v62 = vphi %v11078_v62, %v12766_v62   ;;  %v9712_v32 = vphi %v11076_v32, %v12765_v32   ;;  %v9708_v26 = vphi %v10827_v26, %v2890_v26   ;;  %v9704_v22 = vphi %v10813_v22, %v2889_v22   ;;  %v9700_v14 = vphi %v10853_v14, %v2888_v14   ;;  %v9696_v24 = vphi %v10844_v24, %v2891_v24  }
 0x335   : >> { %s11098_s17 = scalar_lea.vmem [#allocation2], %s5827_s14  ;;  %v2809_v60 = vrot.slane %v9696_v24, 1  ;;  %p2777_p11 = scmp.ge.s32.totalorder %s2780_s20, 8  }
 0x336   : >> { %v5828_v37 = vld [vmem:[%s11098_s17] ss:$0 sm:$0xff]  ;;  %v11101_v41 = vshrl.u32 %v2810_v8, 7  ;;  %v5831_v29 = vld [vmem:[%s11098_s17 + $0x1] ss:$0 sm:$0xff]  ;;  %s11281_s21 = smov (%p2777_p11), 0  }
 0x337   : >> { %v2798_v45 = vmul.f32 %v9708_v26, %v5828_v37  ;;  %v2799_v30 = vmul.f32 %v9704_v22, %v5828_v37  ;;  %v2800_v21 = vmul.f32 %v9700_v14, %v5828_v37  ;;  %v2801_v40 = vmul.f32 %v9696_v24, %v5828_v37  ;;  %v5834_v12 = vld [vmem:[%s11098_s17 + $0x2] ss:$0 sm:$0xff]  ;;  %v5837_v4 = vld [vmem:[%s11098_s17 + $0x3] ss:$0 sm:$0xff] }
 0x338   : >> { %vm2812_vm0 = vcmp.lt.s32.totalorder %v11101_v41, 7 }
 0x339   : >> { %v2802_v39 = vadd.f32 %v9724_v19, %v2798_v45  ;;  %v2803_v43 = vadd.f32 %v9720_v48, %v2799_v30  ;;  %v2804_v50 = vadd.f32 %v9716_v62, %v2800_v21  ;;  %v2805_v56 = vadd.f32 %v9712_v32, %v2801_v40 }
 0x33a   : >> { %v2813_v16 = vsel %vm2812_vm0, %v2808_v44, %v2809_v60  ;;  %v2814_v20 = vsel %vm2812_vm0, %v2807_v35, %v2808_v44  ;;  %v2815_v14 = vsel %vm2812_vm0, %v2806_v1, %v2807_v35  ;;  %v2816_v22 = vsel %vm2812_vm0, %v2809_v60, %v2806_v1 }
 0x33b   : >> { %v2826_v26 = vmul.f32 %v5831_v29, %v2815_v14  ;;  %v2827_v24 = vmul.f32 %v5831_v29, %v2814_v20  ;;  %v2828_v52 = vmul.f32 %v5831_v29, %v2813_v16  ;;  %v2829_v5 = vmul.f32 %v5831_v29, %v2816_v22 }
 0x33c   : >> { %v2834_v17 = vrot.slane %v2815_v14, 1  ;;  %v2835_v59 = vrot.slane %v2814_v20, 1  ;;  %v2836_v38 = vrot.slane %v2813_v16, 1  ;;  %v2837_v0 = vrot.slane %v2816_v22, 1 }
 0x33d   : >> { %v2830_v46 = vadd.f32 %v2826_v26, %v2802_v39  ;;  %v2831_v7 = vadd.f32 %v2827_v24, %v2803_v43  ;;  %v2832_v33 = vadd.f32 %v2828_v52, %v2804_v50  ;;  %v2833_v9 = vadd.f32 %v2829_v5, %v2805_v56 }
 0x33e   : >> { %v2838_v49 = vsel %vm2812_vm0, %v2836_v38, %v2837_v0  ;;  %v2839_v54 = vsel %vm2812_vm0, %v2835_v59, %v2836_v38  ;;  %v2840_v47 = vsel %vm2812_vm0, %v2834_v17, %v2835_v59  ;;  %v2841_v61 = vsel %vm2812_vm0, %v2837_v0, %v2834_v17 }
 0x33f   : >> { %v2851_v34 = vmul.f32 %v5834_v12, %v2840_v47  ;;  %v2852_v23 = vmul.f32 %v5834_v12, %v2839_v54  ;;  %v2853_v55 = vmul.f32 %v5834_v12, %v2838_v49  ;;  %v2854_v3 = vmul.f32 %v5834_v12, %v2841_v61 }
 0x340   : >> { %v2859_v10 = vrot.slane %v2840_v47, 1  ;;  %v2860_v13 = vrot.slane %v2839_v54, 1  ;;  %v2861_v53 = vrot.slane %v2838_v49, 1  ;;  %v2862_v2 = vrot.slane %v2841_v61, 1 }
 0x341   : >> { %v2855_v42 = vadd.f32 %v2851_v34, %v2830_v46  ;;  %v2856_v25 = vadd.f32 %v2852_v23, %v2831_v7  ;;  %v2857_v18 = vadd.f32 %v2853_v55, %v2832_v33  ;;  %v2858_v11 = vadd.f32 %v2854_v3, %v2833_v9  ;;  %2779 = sbr.rel (!%p2777_p11) target bundleno = 820 (0x334), region = 144 }
 0x342   : >> { %v2863_v31 = vsel %vm2812_vm0, %v2861_v53, %v2862_v2  ;;  %v2864_v6 = vsel %vm2812_vm0, %v2860_v13, %v2861_v53  ;;  %v2865_v51 = vsel %vm2812_vm0, %v2859_v10, %v2860_v13  ;;  %v2866_v27 = vsel %vm2812_vm0, %v2862_v2, %v2859_v10 }
 0x343   : >> { %v2876_v36 = vmul.f32 %v5837_v4, %v2865_v51  ;;  %v2877_v28 = vmul.f32 %v5837_v4, %v2864_v6  ;;  %v2878_v32 = vmul.f32 %v5837_v4, %v2863_v31  ;;  %v2879_v62 = vmul.f32 %v5837_v4, %v2866_v27 }
 0x344   : >> { %v2884_v48 = vrot.slane %v2865_v51, 1  ;;  %v2885_v19 = vrot.slane %v2864_v6, 1  ;;  %v2886_v37 = vrot.slane %v2863_v31, 1  ;;  %v2887_v45 = vrot.slane %v2866_v27, 1 }
 0x345   : >> { %v2880_v30 = vadd.f32 %v2876_v36, %v2855_v42   ;;  %v2881_v21 = vadd.f32 %v2877_v28, %v2856_v25   ;;  %v2882_v40 = vadd.f32 %v2878_v32, %v2857_v18   ;;  %v2883_v8 = vadd.f32 %v2879_v62, %v2858_v11  }
 0x346   : >> { %v2888_v14 = vsel %vm2812_vm0, %v2886_v37, %v2887_v45   ;;  %v2889_v22 = vsel %vm2812_vm0, %v2885_v19, %v2886_v37   ;;  %v2890_v26 = vsel %vm2812_vm0, %v2884_v48, %v2885_v19   ;;  %v2891_v24 = vsel %vm2812_vm0, %v2887_v45, %v2884_v48  }
 0x347   : >> { %v12765_v32 = vmov %v2883_v8  ;;  %v12766_v62 = vmov %v2882_v40  ;;  %v12767_v48 = vmov %v2881_v21  ;;  %v12768_v19 = vmov %v2880_v30 }
 0x348   : > { %v11158_v1 = vmul.f32 0.03125, %v2880_v30  ;;  %v11160_v35 = vmul.f32 0.03125, %v2881_v21  ;;  %v11162_v44 = vmul.f32 0.03125, %v2882_v40  ;;  %v11164_v60 = vmul.f32 0.03125, %v2883_v8 }
 0x349   : > { %v11173_v22 = vadd.s32 8, %v11101_v41  ;;  %v11176_v26 = vadd.s32 16, %v11101_v41  ;;  %v11179_v24 = vadd.s32 24, %v11101_v41 }
 0x34a   : > { %v2896_v39 = vmax.f32 %v11158_v1, %v11160_v35  ;;  %v2897_v29 = vmax.f32 %v11162_v44, %v11164_v60 }
 0x34c   : > { %v2898_v43 = vmax.f32 %v2896_v39, %v2897_v29 }
 0x34e   : > { %v2899_v50 = vrot.slane %v2898_v43, 4 }
 0x350   : > { %v2900_v56 = vmax.f32 %v2898_v43, %v2899_v50 }
 0x352   : > { %v2901_v16 = vrot.slane %v2900_v56, 2 }
 0x354   : > { %v2902_v20 = vmax.f32 %v2900_v56, %v2901_v16 }
 0x356   : > { %v2903_v52 = vrot.slane %v2902_v20, 1 }
 0x358   : > { %v11170_v14 = vmax.f32 %v2902_v20, %v2903_v52 }
 0x35a   : > { %v2905_v5 = vsub.f32 %v11158_v1, %v11170_v14  ;;  %v2906_v17 = vsub.f32 %v11160_v35, %v11170_v14  ;;  %v2907_v59 = vsub.f32 %v11162_v44, %v11170_v14  ;;  %v2908_v38 = vsub.f32 %v11164_v60, %v11170_v14 }
 0x35b   : > { %vm2933_vm1 = vcmp.eq.f32.partialorder %v11158_v1, %v11170_v14  ;;  %vm2934_vm2 = vcmp.eq.f32.partialorder %v11160_v35, %v11170_v14  ;;  %vm2935_vm3 = vcmp.eq.f32.partialorder %v11162_v44, %v11170_v14  ;;  %vm2936_vm4 = vcmp.eq.f32.partialorder %v11164_v60, %v11170_v14 }
 0x35c   : > { %v2909_v0 = vmul.f32 1.442695, %v2905_v5  ;;  %v2911_v12 = vmul.f32 1.442695, %v2906_v17  ;;  %v2913_v46 = vmul.f32 1.442695, %v2907_v59  ;;  %v2956_v48 = vsub.f32 %v11170_v14, %v11170_v14 }
 0x35d   : > { %v2915_v7 = vmul.f32 1.442695, %v2908_v38  ;;  %v2937_v33 = vsel %vm2933_vm1, %v11101_v41, 32  ;;  %v2938_v9 = vsel %vm2934_vm2, %v11173_v22, 32  ;;  %v2939_v49 = vsel %vm2935_vm3, %v11176_v26, 32 }
 0x35e   : > { %9510 = vpow2.f32 %v2909_v0  ;;  %v2940_v54 = vsel %vm2936_vm4, %v11179_v24, 32  ;;  %vm2941_vm5 = vcmp.lt.s32.totalorder %v2937_v33, %v2938_v9  ;;  %v2957_v21 = vmul.f32 1.442695, %v2956_v48 }
 0x35f   : > { %9512 = vpow2.f32 %v2911_v12  ;;  %v2942_v47 = vsel %vm2941_vm5, %v2937_v33, %v2938_v9  ;;  %vm2943_vm6 = vcmp.lt.s32.totalorder %v2939_v49, %v2940_v54 }
 0x360   : > { %9514 = vpow2.f32 %v2913_v46  ;;  %v2944_v61 = vsel %vm2943_vm6, %v2939_v49, %v2940_v54 }
 0x361   : > { %9516 = vpow2.f32 %v2915_v7  ;;  %vm2945_vm7 = vcmp.lt.s32.totalorder %v2942_v47, %v2944_v61 }
 0x362   : > { %v2946_v34 = vsel %vm2945_vm7, %v2942_v47, %v2944_v61  ;;  %9518 = vpow2.f32 %v2957_v21 }
 0x363   : > { %v2947_v23 = vrot.slane %v2946_v34, 4 }
 0x365   : > { %vm2948_vm8 = vcmp.lt.s32.totalorder %v2946_v34, %v2947_v23 }
 0x366   : > { %v2949_v55 = vsel %vm2948_vm8, %v2946_v34, %v2947_v23 }
 0x367   : > { %v2950_v3 = vrot.slane %v2949_v55, 2 }
 0x368   : > { %v9511_v10 = vpop.eup %9510 }
 0x369   : > { %v9513_v13 = vpop.eup %9512  ;;  %vm2951_vm9 = vcmp.lt.s32.totalorder %v2949_v55, %v2950_v3 }
 0x36a   : > { %v9515_v53 = vpop.eup %9514  ;;  %v2917_v2 = vadd.f32 %v9513_v13, %v9511_v10  ;;  %v2952_v4 = vsel %vm2951_vm9, %v2949_v55, %v2950_v3 }
 0x36b   : > { %v9517_v42 = vpop.eup %9516  ;;  %v2953_v25 = vrot.slane %v2952_v4, 1 }
 0x36c   : > { %v2918_v18 = vadd.f32 %v9515_v53, %v2917_v2  ;;  %v9519_v20 = vpop.eup %9518 }
 0x36d   : > { %vm2954_vm10 = vcmp.lt.s32.totalorder %v2952_v4, %v2953_v25 }
 0x36e   : > { %v2919_v11 = vadd.f32 %v9517_v42, %v2918_v18  ;;  %v11201_v31 = vsel %vm2954_vm10, %v2952_v4, %v2953_v25 }
 0x36f   : > { %vm2960_vm11 = vcmp.eq.s32.totalorder %v11101_v41, %v11201_v31  ;;  %vm2961_vm12 = vcmp.eq.s32.totalorder %v11173_v22, %v11201_v31  ;;  %vm2962_vm13 = vcmp.eq.s32.totalorder %v11176_v26, %v11201_v31  ;;  %vm2963_vm14 = vcmp.eq.s32.totalorder %v11179_v24, %v11201_v31 }
 0x370   : > { %v2920_v6 = vrot.slane %v2919_v11, 4  ;;  %v2964_v51 = vsel %vm2960_vm11, -1e+30, %v11158_v1  ;;  %v2965_v27 = vsel %vm2961_vm12, -1e+30, %v11160_v35 }
 0x371   : > { %v2966_v36 = vsel %vm2962_vm13, -1e+30, %v11162_v44  ;;  %v2967_v28 = vsel %vm2963_vm14, -1e+30, %v11164_v60  ;;  %v2968_v32 = vmax.f32 %v2964_v51, %v2965_v27 }
 0x372   : > { %v2921_v62 = vadd.f32 %v2920_v6, %v2919_v11  ;;  %v2969_v19 = vmax.f32 %v2966_v36, %v2967_v28 }
 0x374   : > { %v2922_v37 = vrot.slane %v2921_v62, 2  ;;  %v2970_v45 = vmax.f32 %v2968_v32, %v2969_v19 }
 0x376   : > { %v2923_v30 = vadd.f32 %v2922_v37, %v2921_v62  ;;  %v2971_v40 = vrot.slane %v2970_v45, 4 }
 0x378   : > { %v2924_v8 = vrot.slane %v2923_v30, 1  ;;  %v2972_v39 = vmax.f32 %v2970_v45, %v2971_v40 }
 0x37a   : > { %v2925_v1 = vadd.f32 %v2924_v8, %v2923_v30  ;;  %v2973_v35 = vrot.slane %v2972_v39, 2  ;;  %v11259_v8 = vmov 0.0  }
 0x37c   : > { %9520 = vrcp.f32 %v2925_v1  ;;  %v2974_v44 = vmax.f32 %v2972_v39, %v2973_v35  ;;  %v11261_v39 = vmov 0.0   ;;  %v11263_v1 = vmov 0.0  }
 0x37d   : > { %v11265_v35 = vmov 0.0  }
 0x37e   : > { %v2975_v29 = vrot.slane %v2974_v44, 1 }
 0x380   : > { %v2976_v60 = vmax.f32 %v2974_v44, %v2975_v29  ;;  %v11267_v44 = vmov 0.0   ;;  %v11269_v29 = vmov 0.0  }
 0x382   : > { %vm2977_vm15 = vcmp.eq.f32.partialorder %v2964_v51, %v2976_v60  ;;  %vm2978_vm0 = vcmp.eq.f32.partialorder %v2965_v27, %v2976_v60  ;;  %vm2979_vm1 = vcmp.eq.f32.partialorder %v2966_v36, %v2976_v60  ;;  %vm2980_vm2 = vcmp.eq.f32.partialorder %v2967_v28, %v2976_v60 }
 0x383   : > { %v2981_v43 = vsel %vm2977_vm15, %v11101_v41, 32  ;;  %v2982_v50 = vsel %vm2978_vm0, %v11173_v22, 32  ;;  %v2983_v56 = vsel %vm2979_vm1, %v11176_v26, 32  ;;  %v2984_v16 = vsel %vm2980_vm2, %v11179_v24, 32 }
 0x384   : > { %vm2985_vm3 = vcmp.lt.s32.totalorder %v2981_v43, %v2982_v50  ;;  %vm2987_vm4 = vcmp.lt.s32.totalorder %v2983_v56, %v2984_v16  ;;  %v3000_v52 = vsub.f32 %v2976_v60, %v11170_v14  ;;  %v11271_v60 = vmov 0.0  }
 0x385   : > { %v2986_v5 = vsel %vm2985_vm3, %v2981_v43, %v2982_v50  ;;  %v2988_v17 = vsel %vm2987_vm4, %v2983_v56, %v2984_v16  ;;  %v11273_v43 = vmov 0.0   ;;  %v11275_v50 = vmov 0.0  }
 0x386   : > { %v9521_v59 = vpop.eup %9520  ;;  %vm2989_vm5 = vcmp.lt.s32.totalorder %v2986_v5, %v2988_v17  ;;  %v3001_v38 = vmul.f32 1.442695, %v3000_v52  ;;  %v11277_v56 = vmov 0.0   ;;  %v11279_v16 = vmov 0.0  }
 0x387   : > { %v11222_v0 = vmul.f32 %v9521_v59, %v9519_v20  ;;  %v2990_v12 = vsel %vm2989_vm5, %v2986_v5, %v2988_v17 }
 0x388   : > { %v2991_v46 = vrot.slane %v2990_v12, 4  ;;  %9522 = vpow2.f32 %v3001_v38 }
 0x389   : > { %12769 = vst [vmem:[#allocation6_spill] sm:$0xff] %v11222_v0 }
 0x38a   : > { %vm2992_vm6 = vcmp.lt.s32.totalorder %v2990_v12, %v2991_v46 }
 0x38b   : > { %v2993_v7 = vsel %vm2992_vm6, %v2990_v12, %v2991_v46 }
 0x38c   : > { %v2994_v33 = vrot.slane %v2993_v7, 2 }
 0x38e   : > { %vm2995_vm7 = vcmp.lt.s32.totalorder %v2993_v7, %v2994_v33 }
 0x38f   : > { %v2996_v9 = vsel %vm2995_vm7, %v2993_v7, %v2994_v33 }
 0x390   : > { %v2997_v49 = vrot.slane %v2996_v9, 1 }
 0x392   : > { %v9523_v54 = vpop.eup %9522  ;;  %vm2998_vm8 = vcmp.lt.s32.totalorder %v2996_v9, %v2997_v49 }
 0x393   : > { %v11224_v47 = vsel %vm2998_vm8, %v2996_v9, %v2997_v49  ;;  %v11226_v61 = vmul.f32 %v9523_v54, %v9521_v59 }
 0x394   : > { %vm3004_vm9 = vcmp.eq.s32.totalorder %v11101_v41, %v11224_v47  ;;  %vm3005_vm10 = vcmp.eq.s32.totalorder %v11173_v22, %v11224_v47  ;;  %vm3006_vm11 = vcmp.eq.s32.totalorder %v11176_v26, %v11224_v47  ;;  %vm3007_vm12 = vcmp.eq.s32.totalorder %v11179_v24, %v11224_v47 }
 0x395   : > { %v3008_v34 = vsel %vm3004_vm9, -1e+30, %v2964_v51  ;;  %v3009_v23 = vsel %vm3005_vm10, -1e+30, %v2965_v27  ;;  %v3010_v55 = vsel %vm3006_vm11, -1e+30, %v2966_v36 }
 0x396   : > { %v3011_v3 = vsel %vm3007_vm12, -1e+30, %v2967_v28  ;;  %v3012_v10 = vmax.f32 %v3008_v34, %v3009_v23 }
 0x397   : > { %v3013_v13 = vmax.f32 %v3010_v55, %v3011_v3 }
 0x399   : > { %v3014_v53 = vmax.f32 %v3012_v10, %v3013_v13 }
 0x39b   : > { %v3015_v2 = vrot.slane %v3014_v53, 4 }
 0x39d   : > { %v3016_v4 = vmax.f32 %v3014_v53, %v3015_v2 }
 0x39f   : > { %v3017_v42 = vrot.slane %v3016_v4, 2 }
 0x3a1   : > { %v3018_v25 = vmax.f32 %v3016_v4, %v3017_v42 }
 0x3a3   : > { %v3019_v18 = vrot.slane %v3018_v25, 1 }
 0x3a5   : > { %v3020_v11 = vmax.f32 %v3018_v25, %v3019_v18 }
 0x3a7   : > { %vm3021_vm13 = vcmp.eq.f32.partialorder %v3008_v34, %v3020_v11  ;;  %vm3022_vm14 = vcmp.eq.f32.partialorder %v3009_v23, %v3020_v11  ;;  %vm3023_vm15 = vcmp.eq.f32.partialorder %v3010_v55, %v3020_v11  ;;  %vm3024_vm0 = vcmp.eq.f32.partialorder %v3011_v3, %v3020_v11 }
 0x3a8   : > { %v3025_v6 = vsel %vm3021_vm13, %v11101_v41, 32  ;;  %v3026_v51 = vsel %vm3022_vm14, %v11173_v22, 32  ;;  %v3027_v27 = vsel %vm3023_vm15, %v11176_v26, 32  ;;  %v3028_v36 = vsel %vm3024_vm0, %v11179_v24, 32 }
 0x3a9   : > { %vm3029_vm1 = vcmp.lt.s32.totalorder %v3025_v6, %v3026_v51  ;;  %vm3031_vm2 = vcmp.lt.s32.totalorder %v3027_v27, %v3028_v36  ;;  %v3044_v28 = vsub.f32 %v3020_v11, %v11170_v14  ;;  %v11257_v14 = vmov 0.0  }
 0x3aa   : > { %v3030_v32 = vsel %vm3029_vm1, %v3025_v6, %v3026_v51  ;;  %v3032_v62 = vsel %vm3031_vm2, %v3027_v27, %v3028_v36 }
 0x3ab   : > { %vm3033_vm3 = vcmp.lt.s32.totalorder %v3030_v32, %v3032_v62  ;;  %v3045_v48 = vmul.f32 1.442695, %v3044_v28 }
 0x3ac   : > { %v3034_v19 = vsel %vm3033_vm3, %v3030_v32, %v3032_v62 }
 0x3ad   : > { %v3035_v37 = vrot.slane %v3034_v19, 4  ;;  %9524 = vpow2.f32 %v3045_v48 }
 0x3af   : > { %vm3036_vm4 = vcmp.lt.s32.totalorder %v3034_v19, %v3035_v37 }
 0x3b0   : > { %v3037_v45 = vsel %vm3036_vm4, %v3034_v19, %v3035_v37 }
 0x3b1   : > { %v3038_v30 = vrot.slane %v3037_v45, 2 }
 0x3b3   : > { %vm3039_vm5 = vcmp.lt.s32.totalorder %v3037_v45, %v3038_v30 }
 0x3b4   : > { %v3040_v22 = vsel %vm3039_vm5, %v3037_v45, %v3038_v30 }
 0x3b5   : > { %v3041_v21 = vrot.slane %v3040_v22, 1 }
 0x3b7   : > { %v9525_v26 = vpop.eup %9524  ;;  %vm3042_vm6 = vcmp.lt.s32.totalorder %v3040_v22, %v3041_v21 }
 0x3b8   : > { %v11241_v24 = vsel %vm3042_vm6, %v3040_v22, %v3041_v21  ;;  %v11243_v40 = vmul.f32 %v9525_v26, %v9521_v59 }
 0x3ba   : > { %12770 = vst [vmem:[#allocation7_spill] sm:$0xff] %v11243_v40 }
 0x3bb LB: >> { %s5838_s22 = sshll.u32 %s9796_s21, 2  ;;  %v3093_v52 = vrot.slane %v9744_v15, 7  ;;  %v3094_v17 = vrot.slane %v9740_v57, 7  ;;  %v3095_v59 = vrot.slane %v9736_v63, 7  ;;  %v3096_v38 = vrot.slane %v9732_v58, 7  ;;  %s3053_s21 = sadd.s32 1, %s9796_s21   ;;  %s9796_s21 = sphi %s11281_s21, %s3053_s21   ;;  %v9792_v16 = vphi %v11279_v16, %v12806_v16   ;;  %v9788_v56 = vphi %v11277_v56, %v12804_v56   ;;  %v9784_v50 = vphi %v11275_v50, %v12803_v50   ;;  %v9780_v43 = vphi %v11273_v43, %v12802_v43   ;;  %v9776_v60 = vphi %v11271_v60, %v12801_v60   ;;  %v9772_v29 = vphi %v11269_v29, %v12800_v29   ;;  %v9768_v44 = vphi %v11267_v44, %v12799_v44   ;;  %v9764_v35 = vphi %v11265_v35, %v12798_v35   ;;  %v9760_v1 = vphi %v11263_v1, %v12797_v1   ;;  %v9756_v39 = vphi %v11261_v39, %v12795_v39   ;;  %v9752_v8 = vphi %v11259_v8, %v12794_v8   ;;  %v9748_v14 = vphi %v11257_v14, %v12792_v14   ;;  %v9744_v15 = vphi %v11055_v15, %v3194_v15   ;;  %v9740_v57 = vphi %v11053_v57, %v3193_v57   ;;  %v9736_v63 = vphi %v11059_v63, %v12791_v63   ;;  %v9732_v58 = vphi %v11057_v58, %v12790_v58  }
 0x3bc   : >> { %v3071_v20 = vstv %s5838_s22  ;;  %s3102_s18 = sadd.s32 1, %s5838_s22  ;;  %s3133_s29 = sadd.s32 2, %s5838_s22  ;;  %vm3097_vm10 = vcmp.lt.s32.totalorder %v11101_v41, 1 }
 0x3bd   : >> { %vm3072_vm7 = vcmp.eq.s32.totalorder %v11201_v31, %v3071_v20  ;;  %vm3079_vm8 = vcmp.eq.s32.totalorder %v11224_v47, %v3071_v20  ;;  %vm3086_vm9 = vcmp.eq.s32.totalorder %v11241_v24, %v3071_v20  ;;  %s3164_s23 = sadd.s32 3, %s5838_s22  ;;  %v3103_v3 = vstv %s3102_s18  ;;  %p11442_p12 = scmp.ge.s32.totalorder %s3053_s21, 8  }
 0x3be   : >> { %v3075_v5 = vsel %vm3072_vm7, %v9744_v15, %v9792_v16  ;;  %v3076_v12 = vsel %vm3072_vm7, %v9740_v57, %v9788_v56  ;;  %v3077_v46 = vsel %vm3072_vm7, %v9736_v63, %v9784_v50  ;;  %v3078_v7 = vsel %vm3072_vm7, %v9732_v58, %v9780_v43  ;;  %v5843_v41 = vld [vmem:[%s12669_s5 + $0xa0] sm:$0xff] (%p11442_p12)  ;;  %s5880_s16 = sshll.u32 (%p11442_p12), %s9862_s28, 9  ;;  %s5600_s20 = sshll.u32 (%p11442_p12), %s11062_s19, 4  ;;  %s12617_s20 = int_to_ptr.vmem [resolvable:$true] %s5600_s20 }
 0x3bf   : >> { %v3082_v33 = vsel %vm3079_vm8, %v9744_v15, %v9776_v60  ;;  %v3083_v9 = vsel %vm3079_vm8, %v9740_v57, %v9772_v29  ;;  %v3084_v49 = vsel %vm3079_vm8, %v9736_v63, %v9768_v44  ;;  %v3085_v54 = vsel %vm3079_vm8, %v9732_v58, %v9764_v35  ;;  %s12615_s22 = scalar_lea.hbm (%p11442_p12), %s12671_s7, %s5880_s16  ;;  %s12623_s28 = scalar_lea.sflag (%p11442_p12), [#allocation4], %s299_s13 }
 0x3c0   : >> { %v3089_v34 = vsel %vm3086_vm9, %v9744_v15, %v9760_v1  ;;  %v3090_v23 = vsel %vm3086_vm9, %v9740_v57, %v9756_v39  ;;  %v3091_v55 = vsel %vm3086_vm9, %v9736_v63, %v9752_v8  ;;  %v3092_v10 = vsel %vm3086_vm9, %v9732_v58, %v9748_v14  ;;  %s9526_s18 = scalar_lea.vmem (%p11442_p12), %s12617_s20, 512  ;;  %s9798_s21 = smov (%p11442_p12), [#allocation3]  }
 0x3c1   : >> { %v3101_v13 = vsel %vm3097_vm10, %v3096_v38, %v3093_v52  ;;  %v3134_v53 = vstv %s3133_s29  ;;  %v11325_v2 = vstv %s3164_s23  ;;  %v3098_v15 = vsel %vm3097_vm10, %v3095_v59, %v3096_v38  ;;  %p9527_p13 = scmp.ne.s32.totalorder (%p11442_p12), %s12617_s20, %s9526_s18  ;;  %s9530_s29 = sshll.u32 (%p11442_p12), %s9798_s21, 4  ;;  %s9531_s29 = int_to_ptr.vmem [resolvable:$false] %s9530_s29 }
 0x3c2   : >> { %vm3104_vm11 = vcmp.eq.s32.totalorder %v11201_v31, %v3103_v3  ;;  %vm3111_vm12 = vcmp.eq.s32.totalorder %v11224_v47, %v3103_v3  ;;  %vm3118_vm13 = vcmp.eq.s32.totalorder %v11241_v24, %v3103_v3  ;;  %v3099_v57 = vsel %vm3097_vm10, %v3094_v17, %v3095_v59  ;;  %s9532_s23 = scalar_lea.vmem (%p11442_p12), %s9531_s29, 1024  ;;  %p9533_p2 = scmp.lt.s32.totalorder (%p11442_p12), %s12617_s20, %s9531_s29 }
 0x3c3   : >> { %v3100_v58 = vsel %vm3097_vm10, %v3093_v52, %v3094_v17  ;;  %v3107_v63 = vsel %vm3104_vm11, %v3101_v13, %v3075_v5  ;;  %v3125_v4 = vrot.slane %v3101_v13, 7  ;;  %v3109_v25 = vsel %vm3104_vm11, %v3099_v57, %v3077_v46  ;;  %p9528_p0 = pnand (%p11442_p12), %p9527_p13, %p9879_p5  ;;  %p9534_p3 = scmp.lt.s32.totalorder (%p11442_p12), %s9532_s23, %s9526_s18 }
 0x3c4   : >> { %v3108_v42 = vsel %vm3104_vm11, %v3100_v58, %v3076_v12  ;;  %v3110_v18 = vsel %vm3104_vm11, %v3098_v15, %v3078_v7  ;;  %v3114_v11 = vsel %vm3111_vm12, %v3101_v13, %v3082_v33  ;;  %v3115_v6 = vsel %vm3111_vm12, %v3100_v58, %v3083_v9 }
 0x3c5   : >> { %v3116_v51 = vsel %vm3111_vm12, %v3099_v57, %v3084_v49  ;;  %v3117_v27 = vsel %vm3111_vm12, %v3098_v15, %v3085_v54  ;;  %v3121_v36 = vsel %vm3118_vm13, %v3101_v13, %v3089_v34  ;;  %v3126_v28 = vrot.slane %v3100_v58, 7  ;;  %p9529_p1 = pneg (%p11442_p12), %p9528_p0  ;;  %p9535_p4 = por (%p11442_p12), %p9534_p3, %p9533_p2 }
 0x3c6   : >> { %v3127_v32 = vrot.slane %v3099_v57, 7  ;;  %v3128_v62 = vrot.slane %v3098_v15, 7  ;;  %vm3135_vm14 = vcmp.eq.s32.totalorder %v11201_v31, %v3134_v53  ;;  %v3122_v48 = vsel %vm3118_vm13, %v3100_v58, %v3090_v23 }
 0x3c7   : >> { %v3123_v19 = vsel %vm3118_vm13, %v3099_v57, %v3091_v55  ;;  %v3124_v37 = vsel %vm3118_vm13, %v3098_v15, %v3092_v10  ;;  %vm3142_vm15 = vcmp.eq.s32.totalorder %v11224_v47, %v3134_v53  ;;  %vm3149_vm0 = vcmp.eq.s32.totalorder %v11241_v24, %v3134_v53  ;;  %p9536_p7 = pnand (%p11442_p12), %p9535_p4, %p9529_p1 }
 0x3c8   : >> { %v3132_v45 = vsel %vm3097_vm10, %v3128_v62, %v3125_v4  ;;  %vm3166_vm1 = vcmp.eq.s32.totalorder %v11201_v31, %v11325_v2  ;;  %vm3173_vm2 = vcmp.eq.s32.totalorder %v11224_v47, %v11325_v2  ;;  %v3129_v30 = vsel %vm3097_vm10, %v3127_v32, %v3128_v62  ;;  %v5844_v31 = vld [vmem:[%s12669_s5 + $0xa8] sm:$0xff] (%p11442_p12)  ;;  %v11518_v62 = vld [vmem:[%s12669_s5 + $0xb0] sm:$0xff] (%p11442_p12) }
 0x3c9   : >> { %v3130_v22 = vsel %vm3097_vm10, %v3126_v28, %v3127_v32  ;;  %v3131_v21 = vsel %vm3097_vm10, %v3125_v4, %v3126_v28  ;;  %v3138_v26 = vsel %vm3135_vm14, %v3132_v45, %v3107_v63  ;;  %v3141_v39 = vsel %vm3135_vm14, %v3129_v30, %v3110_v18 }
 0x3ca   : >> { %v3139_v14 = vsel %vm3135_vm14, %v3131_v21, %v3108_v42  ;;  %v3140_v8 = vsel %vm3135_vm14, %v3130_v22, %v3109_v25  ;;  %v3145_v1 = vsel %vm3142_vm15, %v3132_v45, %v3114_v11  ;;  %v3146_v35 = vsel %vm3142_vm15, %v3131_v21, %v3115_v6  ;;  %v5840_v42 = vld [vmem:[%s12669_s5 + $0x88] sm:$0xff] (%p11442_p12)  ;;  %v5841_v25 = vld [vmem:[%s12669_s5 + $0x90] sm:$0xff] (%p11442_p12)  ;;  %v5842_v6 = vld [vmem:[%s12669_s5 + $0x98] sm:$0xff] (%p11442_p12) }
 0x3cb   : >> { %v3147_v44 = vsel %vm3142_vm15, %v3130_v22, %v3116_v51  ;;  %v3148_v29 = vsel %vm3142_vm15, %v3129_v30, %v3117_v27  ;;  %v3152_v60 = vsel %vm3149_vm0, %v3132_v45, %v3121_v36  ;;  %v3156_v43 = vrot.slane %v3132_v45, 7 }
 0x3cc   : >> { %v3157_v50 = vrot.slane %v3131_v21, 7  ;;  %v3158_v56 = vrot.slane %v3130_v22, 7  ;;  %v3159_v16 = vrot.slane %v3129_v30, 7  ;;  %v3153_v20 = vsel %vm3149_vm0, %v3131_v21, %v3122_v48  ;;  %v11523_v48 = vld [vmem:[%s12669_s5 + $0xb8] sm:$0xff] (%p11442_p12)  ;;  %v11542_v21 = vld [vmem:[%s12669_s5 + $0xc8] sm:$0xff] (%p11442_p12) }
 0x3cd   : >> { %v3154_v52 = vsel %vm3149_vm0, %v3130_v22, %v3123_v19  ;;  %v3155_v5 = vsel %vm3149_vm0, %v3129_v30, %v3124_v37  ;;  %vm3180_vm3 = vcmp.eq.s32.totalorder %v11241_v24, %v11325_v2  ;;  %v5839_v2 = vld [vmem:[%s12669_s5 + $0x80] sm:$0xff] (%p11442_p12)  ;;  %v3240_v11 = vand.u32 (%p11442_p12), 4294901760, %v5840_v42 }
 0x3ce   : >> { %v3160_v17 = vsel %vm3097_vm10, %v3158_v56, %v3159_v16  ;;  %v3161_v59 = vsel %vm3097_vm10, %v3157_v50, %v3158_v56  ;;  %v3162_v38 = vsel %vm3097_vm10, %v3156_v43, %v3157_v50  ;;  %v3163_v12 = vsel %vm3097_vm10, %v3159_v16, %v3156_v43  ;;  %v11537_v22 = vld [vmem:[%s12669_s5 + $0xc0] sm:$0xff] (%p11442_p12) }
 0x3cf   : >> { %v11380_v16 = vsel %vm3166_vm1, %v3163_v12, %v3138_v26   ;;  %v11385_v56 = vsel %vm3166_vm1, %v3162_v38, %v3139_v14   ;;  %v11390_v50 = vsel %vm3166_vm1, %v3161_v59, %v3140_v8   ;;  %v11395_v43 = vsel %vm3166_vm1, %v3160_v17, %v3141_v39  }
 0x3d0   : >> { %12771 = vst [vmem:[#allocation8_spill] sm:$0xff] %v11380_v16  ;;  %12773 = vst [vmem:[#allocation9_spill] sm:$0xff] %v11385_v56  ;;  %v12774_v7 = vmov %v11385_v56  ;;  %v12776_v33 = vmov %v11390_v50  ;;  %v12778_v9 = vmov %v11395_v43  ;;  %v3176_v49 = vsel %vm3173_vm2, %v3163_v12, %v3145_v1  }
 0x3d1   : >> { %12775 = vst [vmem:[#allocation10_spill] sm:$0xff] %v11390_v50  ;;  %12777 = vst [vmem:[#allocation11_spill] sm:$0xff] %v11395_v43  ;;  %v3177_v54 = vsel %vm3173_vm2, %v3162_v38, %v3146_v35   ;;  %v11406_v44 = vsel %vm3173_vm2, %v3161_v59, %v3147_v44   ;;  %v11411_v35 = vsel %vm3173_vm2, %v3160_v17, %v3148_v29   ;;  %v3187_v53 = vrot.slane %v3163_v12, 7 }
 0x3d2   : >> { %v12779_v34 = vmov %v11406_v44  ;;  %v12780_v23 = vmov %v11411_v35  ;;  %v11416_v1 = vsel %vm3180_vm3, %v3163_v12, %v3152_v60   ;;  %v11421_v39 = vsel %vm3180_vm3, %v3162_v38, %v3153_v20  }
 0x3d3   : >> { %12781 = vst [vmem:[#allocation12_spill] sm:$0xff] %v11416_v1  ;;  %12783 = vst [vmem:[#allocation13_spill] sm:$0xff] %v11421_v39  ;;  %v12784_v3 = vmov %v11421_v39  ;;  %v11426_v8 = vsel %vm3180_vm3, %v3161_v59, %v3154_v52   ;;  %v11431_v14 = vsel %vm3180_vm3, %v3160_v17, %v3155_v5   ;;  %v3188_v15 = vrot.slane %v3162_v38, 7  ;;  %v5851_v52 = vld [vmem:[%s12669_s5 + $0xe0] sm:$0xff] (%p11442_p12) }
 0x3d4   : >> { %12785 = vst [vmem:[#allocation14_spill] sm:$0xff] %v11426_v8  ;;  %12787 = vst [vmem:[#allocation15_spill] sm:$0xff] %v11431_v14  ;;  %v12788_v13 = vmov %v11431_v14  ;;  %v3189_v57 = vrot.slane %v3161_v59, 7  ;;  %v3190_v58 = vrot.slane %v3160_v17, 7  ;;  %v12793_v10 = vmov %v11426_v8  ;;  %3052 = sbr.rel (!%p11442_p12) target bundleno = 955 (0x3bb), region = 155 }
 0x3d5   : >> { %v12792_v14 = vmov %v12788_v13  ;;  %v12794_v8 = vmov %v12793_v10  ;;  %v12795_v39 = vmov %v12784_v3  ;;  %v12796_v55 = vmov %v11416_v1 }
 0x3d6   : >> { %v3191_v63 = vsel %vm3097_vm10, %v3189_v57, %v3190_v58   ;;  %v3192_v4 = vsel %vm3097_vm10, %v3188_v15, %v3189_v57   ;;  %v3193_v57 = vsel %vm3097_vm10, %v3187_v53, %v3188_v15   ;;  %v3194_v15 = vsel %vm3097_vm10, %v3190_v58, %v3187_v53  }
 0x3d7   : >> { %v12790_v58 = vmov %v3191_v63  ;;  %v12791_v63 = vmov %v3192_v4  ;;  %v12797_v1 = vmov %v12796_v55  ;;  %v12798_v35 = vmov %v12780_v23  ;;  %v5854_v57 = vld [vmem:[%s12669_s5 + $0xf8] sm:$0xff] (%p11442_p12) }
 0x3d8   : >> { %v12799_v44 = vmov %v12779_v34  ;;  %v12800_v29 = vmov %v3177_v54  ;;  %v12801_v60 = vmov %v3176_v49  ;;  %v12802_v43 = vmov %v12778_v9 }
 0x3d9   : >> { %v12803_v50 = vmov %v12776_v33  ;;  %v12804_v56 = vmov %v12774_v7  ;;  %v12805_v46 = vmov %v11380_v16  ;;  %v3237_v18 = vand.u32 (%p11442_p12), 4294901760, %v5839_v2  ;;  %v5849_v60 = vld [vmem:[%s12669_s5 + $0xd0] sm:$0xff] (%p11442_p12)  ;;  %v5850_v43 = vld [vmem:[%s12669_s5 + $0xd8] sm:$0xff] (%p11442_p12) }
 0x3da   : >> { %v12806_v16 = vmov %v12805_v46  ;;  %v3243_v51 = vand.u32 (%p11442_p12), 4294901760, %v5841_v25  ;;  %v3246_v47 = vand.u32 (%p11442_p12), 4294901760, %v5842_v6  ;;  %v3215_v24 = vmul.f32 (%p11442_p12), %v3176_v49, %v11226_v61  ;;  %v5852_v49 = vld [vmem:[%s12669_s5 + $0xe8] sm:$0xff] (%p11442_p12) }
 0x3db   : > { %v11511_v27 = vpack.c.bf16 %v3240_v11, %v3237_v18  ;;  %v3249_v36 = vand.u32 4294901760, %v5843_v41  ;;  %v3252_v28 = vand.u32 4294901760, %v5844_v31  ;;  %v3255_v45 = vand.u32 4294901760, %v11518_v62 }
 0x3dc   : > { %v11513_v32 = vpack.c.bf16 %v3246_v47, %v3243_v51  ;;  %v11527_v19 = vand.u32 4294901760, %v3215_v24  ;;  %v12702_v30 = vand.u32 4294901760, %v11523_v48  ;;  %v3216_v14 = vmul.f32 %v3177_v54, %v11226_v61  ;;  %v5853_v54 = vld [vmem:[%s12669_s5 + $0xf0] sm:$0xff] }
 0x3dd   : > { %8546 = vmatprep.subr.bf16.mxu1 %v11511_v27  ;;  %v11530_v37 = vpack.c.bf16 %v3252_v28, %v3249_v36  ;;  %v11550_v39 = vsub.f32 %v5839_v2, %v3237_v18  ;;  %v11552_v1 = vsub.f32 %v5840_v42, %v3240_v11  ;;  %v3261_v44 = vand.u32 4294901760, %v11537_v22 }
 0x3de   : > { %8548 = vmatpush3.bf16.msra.mxu1 %v11511_v27  ;;  %v11545_v26 = vsub.f32 %v3215_v24, %v11527_v19  ;;  %v11559_v35 = vpack.c.bf16 %v12702_v30, %v3255_v45  ;;  %v3264_v29 = vand.u32 4294901760, %v11542_v21  ;;  %v11572_v56 = vand.u32 4294901760, %v3216_v14 }
 0x3df   : > { %8550 = vmatprep.subr.bf16.mxu1 %v11513_v32  ;;  %v11574_v16 = vsub.f32 %v5841_v25, %v3243_v51  ;;  %v3267_v20 = vand.u32 4294901760, %v5849_v60  ;;  %v12701_v17 = vand.u32 4294901760, %v11550_v39  ;;  %v12699_v59 = vand.u32 4294901760, %v11552_v1 }
 0x3e0   : > { %v12698_v8 = vand.u32 4294901760, %v11545_v26  ;;  %v11583_v38 = vpack.c.bf16 %v3264_v29, %v3261_v44  ;;  %v3270_v12 = vand.u32 4294901760, %v5850_v43  ;;  %v11591_v53 = vsub.f32 %v5842_v6, %v3246_v47 }
 0x3e1   : > { %v11593_v15 = vsub.f32 %v5843_v41, %v3249_v36  ;;  %v11599_v58 = vsub.f32 %v3216_v14, %v11572_v56  ;;  %v12700_v63 = vand.u32 4294901760, %v11574_v16  ;;  %v11602_v4 = vsub.f32 %v5844_v31, %v3252_v28 }
 0x3e2   : > { %8552 = vmatpush3.bf16.msra.mxu1 %v11513_v32  ;;  %v3320_v50 = vsub.f32 %v11545_v26, %v12698_v8  ;;  %v3273_v2 = vand.u32 4294901760, %v5851_v52  ;;  %v3217_v42 = vmul.f32 %v12779_v34, %v11226_v61  ;;  %v3276_v25 = vand.u32 4294901760, %v5852_v49 }
 0x3e3   : > { %8554 = vmatprep.subr.bf16.mxu1 %v11530_v37  ;;  %v3279_v18 = vand.u32 4294901760, %v5853_v54  ;;  %v3361_v11 = vsub.f32 %v11550_v39, %v12701_v17  ;;  %v3368_v6 = vsub.f32 %v11552_v1, %v12699_v59  ;;  %v11614_v51 = vpack.c.bf16 %v3270_v12, %v3267_v20 }
 0x3e4   : > { %v3321_v5 = vand.u32 4294901760, %v3320_v50  ;;  %v3282_v41 = vand.u32 4294901760, %v5854_v57  ;;  %v3381_v31 = vand.u32 4294901760, %v11591_v53  ;;  %v3388_v34 = vand.u32 4294901760, %v11593_v15 }
 0x3e5   : > { %v12706_v47 = vand.u32 4294901760, %v11599_v58  ;;  %v11622_v24 = vsub.f32 %v11574_v16, %v12700_v63  ;;  %v3395_v36 = vand.u32 4294901760, %v11602_v4  ;;  %v11626_v28 = vpack.c.bf16 %v3276_v25, %v3273_v2 }
 0x3e6   : > { %8556 = vmatpush3.bf16.msra.mxu1 %v11530_v37  ;;  %7317 = vmatprep.mubr.f32.mxu1 %v3321_v5  ;;  %v3362_v14 = vand.u32 4294901760, %v3361_v11  ;;  %v3369_v50 = vand.u32 4294901760, %v3368_v6  ;;  %v3218_v5 = vmul.f32 %v12780_v23, %v11226_v61  ;;  %v11631_v8 = vpack.c.bf16 %v3282_v41, %v3279_v18 }
 0x3e7   : > { %8558 = vmatprep.subr.bf16.mxu1 %v11559_v35  ;;  %v3382_v59 = vsub.f32 %v11591_v53, %v3381_v31  ;;  %v3389_v63 = vsub.f32 %v11593_v15, %v3388_v34  ;;  %v11635_v17 = vand.u32 4294901760, %v3217_v42  ;;  %v3330_v30 = vsub.f32 %v11599_v58, %v12706_v47 }
 0x3e8   : > { %v3376_v11 = vand.u32 4294901760, %v11622_v24  ;;  %v3396_v6 = vsub.f32 %v11602_v4, %v3395_v36  ;;  %v11645_v61 = vsub.f32 %v11518_v62, %v3255_v45  ;;  %v12807_v23 = vand.u32 4294901760, %v11523_v48 }
 0x3e9   : > { %v11653_v10 = vsub.f32 %v11537_v22, %v3261_v44  ;;  %v11656_v3 = vsub.f32 %v11542_v21, %v3264_v29  ;;  %v11659_v24 = vsub.f32 %v3217_v42, %v11635_v17  ;;  %v8577_v47 = vpack.c.bf16 %v3369_v50, %v3362_v14 }
 0x3ea   : > { %8560 = vmatpush3.bf16.msra.mxu1 %v11559_v35  ;;  %v11650_v13 = vsub.f32 %v11523_v48, %v12807_v23  ;;  %v11662_v55 = vsub.f32 %v5849_v60, %v3267_v20  ;;  %v11664_v62 = vsub.f32 %v5850_v43, %v3270_v12  ;;  %v11666_v45 = vand.u32 4294901760, %v3218_v5 }
 0x3eb   : > { %8562 = vmatprep.subr.bf16.mxu1 %v11583_v38  ;;  %v11669_v48 = vsub.f32 %v5851_v52, %v3273_v2  ;;  %v11671_v22 = vsub.f32 %v5852_v49, %v3276_v25  ;;  %v12708_v21 = vand.u32 4294901760, %v11659_v24  ;;  %v11674_v44 = vsub.f32 %v5853_v54, %v3279_v18 }
 0x3ec   : > { %v3331_v29 = vand.u32 4294901760, %v3330_v30  ;;  %v3383_v42 = vand.u32 4294901760, %v3382_v59  ;;  %v11676_v23 = vsub.f32 %v5854_v57, %v3282_v41  ;;  %v11679_v60 = vsub.f32 %v3218_v5, %v11666_v45 }
 0x3ed   : > { %v3402_v43 = vand.u32 4294901760, %v11645_v61  ;;  %v3409_v20 = vand.u32 4294901760, %v11650_v13  ;;  %v3416_v52 = vand.u32 4294901760, %v11653_v10  ;;  %v3423_v12 = vand.u32 4294901760, %v11656_v3 }
 0x3ee   : > { %8564 = vmatpush3.bf16.msra.mxu1 %v11583_v38  ;;  %v3430_v49 = vand.u32 4294901760, %v11662_v55  ;;  %v3437_v30 = vand.u32 4294901760, %v11664_v62  ;;  %v3340_v59 = vsub.f32 %v11659_v24, %v12708_v21  ;;  %v3444_v57 = vand.u32 4294901760, %v11669_v48 }
 0x3ef   : > { %8566 = vmatprep.subr.bf16.mxu1 %v11614_v51  ;;  %v3451_v2 = vand.u32 4294901760, %v11671_v22  ;;  %v3458_v25 = vand.u32 4294901760, %v11674_v44  ;;  %v12808_v18 = vand.u32 4294901760, %v11550_v39  ;;  %v12809_v41 = vand.u32 4294901760, %v11552_v1 }
 0x3f0   : > { %v3465_v50 = vand.u32 4294901760, %v11676_v23  ;;  %v12810_v5 = vand.u32 4294901760, %v11574_v16  ;;  %v11707_v54 = vpack.c.bf16 %v3395_v36, %v3388_v34  ;;  %v11709_v40 = vpack.c.bf16 %v3409_v20, %v3402_v43 }
 0x3f1   : > { %v11700_v14 = vpack.c.bf16 %v12809_v41, %v12808_v18  ;;  %v12812_v9 = vand.u32 4294901760, %v11679_v60  ;;  %v11714_v7 = vpack.c.bf16 %v3423_v12, %v3416_v52  ;;  %v11716_v46 = vpack.c.bf16 %v3437_v30, %v3430_v49 }
 0x3f2   : > { %8568 = vmatpush3.bf16.msra.mxu1 %v11614_v51  ;;  %v11705_v21 = vpack.c.bf16 %v3381_v31, %v12810_v5  ;;  %12811 = vst [vmem:[#allocation16_spill] sm:$0xff] %v11709_v40  ;;  %v11718_v18 = vpack.c.bf16 %v3451_v2, %v3444_v57  ;;  %v3390_v41 = vand.u32 4294901760, %v3389_v63  ;;  %v3397_v0 = vand.u32 4294901760, %v3396_v6 }
 0x3f3   : > { %8570 = vmatprep.subr.bf16.mxu1 %v11626_v28  ;;  %v3350_v33 = vsub.f32 %v11679_v60, %v12812_v9  ;;  %12813 = vst [vmem:[#allocation17_spill] sm:$0xff] %v11714_v7  ;;  %12814 = vst [vmem:[#allocation18_spill] sm:$0xff] %v11716_v46  ;;  %v3341_v31 = vand.u32 4294901760, %v3340_v59  ;;  %v11721_v5 = vpack.c.bf16 %v3465_v50, %v3458_v25 }
 0x3f4   : > { %12815 = vst [vmem:[#allocation19_spill] sm:$0xff] %v11718_v18  ;;  %v8581_v34 = vpack.c.bf16 %v3383_v42, %v3376_v11  ;;  %v3403_v36 = vsub.f32 %v11645_v61, %v3402_v43  ;;  %v3410_v40 = vsub.f32 %v11650_v13, %v3409_v20  ;;  %v8585_v7 = vpack.c.bf16 %v3397_v0, %v3390_v41 }
 0x3f5   : > { %v3351_v9 = vand.u32 4294901760, %v3350_v33  ;;  %v3417_v63 = vsub.f32 %v11653_v10, %v3416_v52  ;;  %v3424_v6 = vsub.f32 %v11656_v3, %v3423_v12  ;;  %v3431_v11 = vsub.f32 %v11662_v55, %v3430_v49 }
 0x3f6   : > { %8572 = vmatpush3.bf16.msra.mxu1 %v11626_v28  ;;  %v3404_v18 = vand.u32 4294901760, %v3403_v36  ;;  %v3411_v46 = vand.u32 4294901760, %v3410_v40  ;;  %v3438_v0 = vsub.f32 %v11664_v62, %v3437_v30  ;;  %v3452_v52 = vsub.f32 %v11671_v22, %v3451_v2  ;;  %v3205_v36 = vld [vmem:[%s12669_s5 + $0x30] sm:$0xff] }
 0x3f7   : > { %8574 = vmatprep.subr.bf16.mxu1 %v11631_v8  ;;  %v3425_v33 = vand.u32 4294901760, %v3424_v6  ;;  %v3432_v43 = vand.u32 4294901760, %v3431_v11  ;;  %v8609_v2 = vpack.c.bf16 %v11552_v1, %v11550_v39  ;;  %v8621_v39 = vpack.c.bf16 %v11650_v13, %v11645_v61 }
 0x3f8   : > { %v8589_v42 = vpack.c.bf16 %v3411_v46, %v3404_v18  ;;  %v3439_v20 = vand.u32 4294901760, %v3438_v0  ;;  %v3453_v59 = vand.u32 4294901760, %v3452_v52  ;;  %v3459_v46 = vsub.f32 %v11674_v44, %v3458_v25  ;;  %v11890_v0 = vld [vmem:[%s12669_s5 + $0x50] sm:$0xff] }
 0x3f9   : > { %v3466_v18 = vsub.f32 %v11676_v23, %v3465_v50  ;;  %v8613_v25 = vpack.c.bf16 %v11591_v53, %v11574_v16  ;;  %v8617_v50 = vpack.c.bf16 %v11602_v4, %v11593_v15  ;;  %v8625_v1 = vpack.c.bf16 %v11656_v3, %v11653_v10  ;;  %v12820_v15 = vld [vmem:[#allocation16_spill] sm:$0xff] }
 0x3fa   : > { %8576 = vmatpush3.bf16.msra.mxu1 %v11631_v8  ;;  %v8597_v49 = vpack.c.bf16 %v3439_v20, %v3432_v43  ;;  %v3460_v30 = vand.u32 4294901760, %v3459_v46  ;;  %v8629_v16 = vpack.c.bf16 %v11664_v62, %v11662_v55  ;;  %v8633_v53 = vpack.c.bf16 %v11671_v22, %v11669_v48  ;;  %v12822_v4 = vld [vmem:[#allocation18_spill] sm:$0xff]  ;;  %v3201_v22 = vld [vmem:[%s12669_s5 + $0x10] sm:$0xff]  ;;  %v11908_v20 = vld [vmem:[%s12669_s5 + $0x68] sm:$0xff] }
 0x3fb   : > { %8578 = vmatprep.subr.bf16.mxu1 %v8577_v47  ;;  %v8637_v13 = vpack.c.bf16 %v11676_v23, %v11674_v44  ;;  %v12816_v55 = vand.u32 4294901760, %v11545_v26  ;;  %v12817_v3 = vand.u32 4294901760, %v11599_v58  ;;  %v12818_v10 = vand.u32 4294901760, %v11659_v24  ;;  %v12823_v61 = vld [vmem:[#allocation19_spill] sm:$0xff]  ;;  %v11903_v43 = vld [vmem:[%s12669_s5 + $0x60] sm:$0xff] }
 0x3fc   : > { %v4013_v23 = vand.u32 4294901760, %v3201_v22  ;;  %v4025_v6 = vand.u32 4294901760, %v3205_v36 }
 0x3fd   : > { %7318 = vmatmul.mubr.f32.vlgmr.msra.gmra.mrb[0].mxu1 %v3331_v29  ;;  %v3418_v29 = vand.u32 4294901760, %v3417_v63 }
 0x3fe   : > { %8580 = vmatpush3.bf16.msra.mxu1 %v8577_v47  ;;  %7320 = vmatprep.mubr.f32.mxu1 %v3341_v31  ;;  %v3445_v47 = vsub.f32 %v11669_v48, %v3444_v57  ;;  %v3467_v57 = vand.u32 4294901760, %v3466_v18  ;;  %v4037_v18 = vand.u32 4294901760, %v11890_v0 }
 0x3ff   : > { %8582 = vmatprep.subr.bf16.mxu1 %v8581_v34  ;;  %v8593_v40 = vpack.c.bf16 %v3425_v33, %v3418_v29 }
 0x400   : > { %v3446_v12 = vand.u32 4294901760, %v3445_v47  ;;  %v8605_v41 = vpack.c.bf16 %v3467_v57, %v3460_v30  ;;  %v12826_v47 = vld [vmem:[#allocation9_spill] sm:$0xff]  ;;  %v4043_v57 = vand.u32 4294901760, %v11903_v43 }
 0x401   : > { %7321 = vmatmul.mubr.f32.gmra.mrb[2].mxu1 %v3351_v9 }
 0x402   : > { %8584 = vmatpush3.bf16.msra.mxu1 %v8581_v34  ;;  %7355 = vmatprep.mubr.f32.mxu1 %v11527_v19 }
 0x403   : > { %8586 = vmatprep.subr.bf16.mxu1 %v8585_v7 }
 0x406   : > { %8588 = vmatpush3.bf16.msra.mxu1 %v8585_v7  ;;  %v8601_v7 = vpack.c.bf16 %v3453_v59, %v3446_v12 }
 0x407   : > { %8590 = vmatprep.subr.bf16.mxu1 %v8589_v42 }
 0x40a   : > { %8592 = vmatpush3.bf16.msra.mxu1 %v8589_v42  ;;  %v11873_v42 = vld [vmem:[%s12669_s5 + $0x40] sm:$0xff] }
 0x40b   : > { %8594 = vmatprep.subr.bf16.mxu1 %v8593_v40  ;;  %v4031_v29 = vand.u32 4294901760, %v11873_v42 }
 0x40e   : > { %8596 = vmatpush3.bf16.msra.mxu1 %v8593_v40 }
 0x40f   : > { %8598 = vmatprep.subr.bf16.mxu1 %v8597_v49 }
 0x412   : > { %8600 = vmatpush3.bf16.msra.mxu1 %v8597_v49  ;;  %v12827_v49 = vld [vmem:[#allocation10_spill] sm:$0xff] }
 0x413   : > { %8602 = vmatprep.subr.bf16.mxu1 %v8601_v7 }
 0x416   : > { %8604 = vmatpush3.bf16.msra.mxu1 %v8601_v7 }
 0x417   : > { %8606 = vmatprep.subr.bf16.mxu1 %v8605_v41 }
 0x41a   : > { %8608 = vmatpush3.bf16.msra.mxu1 %v8605_v41  ;;  %v4046_v41 = vand.u32 4294901760, %v11908_v20 }
 0x41b   : > { %8610 = vmatprep.subr.bf16.mxu1 %v8609_v2 }
 0x41d   : > { %7356 = vmatmul.mubr.f32.vlgmr.msra.gmra.mrb[0].mxu1 %v11572_v56 }
 0x41e   : > { %8612 = vmatpush3.bf16.msra.mxu1 %v8609_v2  ;;  %7358 = vmatprep.mubr.f32.mxu1 %v11635_v17  ;;  %v12828_v2 = vld [vmem:[#allocation11_spill] sm:$0xff] }
 0x41f   : > { %8614 = vmatprep.subr.bf16.mxu1 %v8613_v25 }
 0x421   : > { %7359 = vmatmul.mubr.f32.gmra.mrb[2].mxu1 %v11666_v45 }
 0x422   : > { %8616 = vmatpush3.bf16.msra.mxu1 %v8613_v25  ;;  %7393 = vmatprep.mubr.f32.mxu1 %v11545_v26  ;;  %v12819_v26 = vand.u32 4294901760, %v11679_v60 }
 0x423   : > { %8618 = vmatprep.subr.bf16.mxu1 %v8617_v50 }
 0x426   : > { %8620 = vmatpush3.bf16.msra.mxu1 %v8617_v50  ;;  %v11933_v50 = vld [vmem:[%s12669_s5 + $0x70] sm:$0xff] }
 0x427   : > { %8622 = vmatprep.subr.bf16.mxu1 %v8621_v39 }
 0x42a   : > { %8624 = vmatpush3.bf16.msra.mxu1 %v8621_v39 }
 0x42b   : > { %8626 = vmatprep.subr.bf16.mxu1 %v8625_v1 }
 0x42e   : > { %8628 = vmatpush3.bf16.msra.mxu1 %v8625_v1 }
 0x42f   : > { %8630 = vmatprep.subr.bf16.mxu1 %v8629_v16 }
 0x432   : > { %8632 = vmatpush3.bf16.msra.mxu1 %v8629_v16 }
 0x433   : > { %8634 = vmatprep.subr.bf16.mxu1 %v8633_v53 }
 0x436   : > { %8636 = vmatpush3.bf16.msra.mxu1 %v8633_v53 }
 0x437   : > { %8638 = vmatprep.subr.bf16.mxu1 %v8637_v13 }
 0x43a   : > { %8640 = vmatpush3.bf16.msra.mxu1 %v8637_v13  ;;  %v11949_v13 = vld [vmem:[%s12669_s5 + $0x78] sm:$0xff] }
 0x43b   : > { %8642 = vmatprep.subr.bf16.mxu1 %v11511_v27 }
 0x43d   : > { %7394 = vmatmul.mubr.f32.vlgmr.msra.gmra.mrb[0].mxu1 %v11599_v58  ;;  %v12821_v58 = vld [vmem:[#allocation17_spill] sm:$0xff] }
 0x43e   : > { %8644 = vmatpush3.bf16.msra.mxu1 %v11511_v27  ;;  %7396 = vmatprep.mubr.f32.mxu1 %v11659_v24  ;;  %v12824_v24 = vld [vmem:[#allocation6_spill] sm:$0xff] }
 0x43f   : > { %8646 = vmatprep.subr.bf16.mxu1 %v11513_v32  ;;  %v3196_v40 = vmul.f32 %v12826_v47, %v12824_v24  ;;  %v3197_v59 = vmul.f32 %v12827_v49, %v12824_v24  ;;  %v3198_v25 = vmul.f32 %v12828_v2, %v12824_v24  ;;  %v12018_v47 = vsub.f32 %v11873_v42, %v4031_v29 }
 0x441   : > { %7397 = vmatmul.mubr.f32.gmra.mrb[2].mxu1 %v11679_v60  ;;  %v11923_v30 = vand.u32 4294901760, %v3196_v40  ;;  %v11937_v16 = vand.u32 4294901760, %v3197_v59 }
 0x442   : > { %8648 = vmatpush3.bf16.msra.mxu1 %v11513_v32  ;;  %7431 = vmatprep.mubr.f32.mxu1 %v12816_v55  ;;  %v11951_v55 = vsub.f32 %v3201_v22, %v4013_v23  ;;  %v11988_v22 = vsub.f32 %v3205_v36, %v4025_v6 }
 0x443   : > { %8650 = vmatprep.subr.bf16.mxu1 %v11530_v37 }
 0x446   : > { %8652 = vmatpush3.bf16.msra.mxu1 %v11530_v37 }
 0x447   : > { %8654 = vmatprep.subr.bf16.mxu1 %v11559_v35 }
 0x44a   : > { %8656 = vmatpush3.bf16.msra.mxu1 %v11559_v35 }
 0x44b   : > { %8658 = vmatprep.subr.bf16.mxu1 %v11583_v38 }
 0x44e   : > { %8660 = vmatpush3.bf16.msra.mxu1 %v11583_v38 }
 0x44f   : > { %8662 = vmatprep.subr.bf16.mxu1 %v11614_v51 }
 0x452   : > { %8664 = vmatpush3.bf16.msra.mxu1 %v11614_v51 }
 0x453   : > { %8666 = vmatprep.subr.bf16.mxu1 %v11626_v28 }
 0x456   : > { %8668 = vmatpush3.bf16.msra.mxu1 %v11626_v28 }
 0x457   : > { %8670 = vmatprep.subr.bf16.mxu1 %v11631_v8 }
 0x45a   : > { %8672 = vmatpush3.bf16.msra.mxu1 %v11631_v8 }
 0x45b   : > { %8674 = vmatprep.subr.bf16.mxu1 %v11700_v14 }
 0x45d   : > { %7432 = vmatmul.mubr.f32.vlgmr.msra.gmra.mrb[0].mxu1 %v12817_v3 }
 0x45e   : > { %8676 = vmatpush3.bf16.msra.mxu1 %v11700_v14  ;;  %7434 = vmatprep.mubr.f32.mxu1 %v12818_v10  ;;  %v11847_v14 = vld [vmem:[%s12669_s5 + $0x28] sm:$0xff]  ;;  %v11956_v10 = vsub.f32 %v3196_v40, %v11923_v30 }
 0x45f   : > { %8678 = vmatprep.subr.bf16.mxu1 %v11705_v21  ;;  %v4022_v34 = vand.u32 4294901760, %v11847_v14 }
 0x461   : > { %7435 = vmatmul.mubr.f32.gmra.mrb[2].mxu1 %v12819_v26  ;;  %v11962_v26 = vpack.c.bf16 %v4046_v41, %v4043_v57 }
 0x462   : > { %8680 = vmatpush3.bf16.msra.mxu1 %v11705_v21  ;;  %7469 = vmatprep.mubr.f32.mxu1 %v11527_v19  ;;  %v3202_v21 = vld [vmem:[%s12669_s5 + $0x18] sm:$0xff] }
 0x463   : > { %8682 = vmatprep.subr.bf16.mxu1 %v11707_v54  ;;  %v4016_v60 = vand.u32 4294901760, %v3202_v21 }
 0x465   : > { %v11854_v31 = vpack.c.bf16 %v4016_v60, %v4013_v23  ;;  %v11953_v3 = vsub.f32 %v3202_v21, %v4016_v60 }
 0x466   : > { %8684 = vmatpush3.bf16.msra.mxu1 %v11707_v54  ;;  %v11842_v54 = vld [vmem:[%s12669_s5 + $0x20] sm:$0xff] }
 0x467   : > { %8686 = vmatprep.subr.bf16.mxu1 %v12820_v15 }
 0x46a   : > { %8688 = vmatpush3.bf16.msra.mxu1 %v12820_v15  ;;  %v4049_v15 = vand.u32 4294901760, %v11933_v50 }
 0x46b   : > { %8690 = vmatprep.subr.bf16.mxu1 %v12821_v58 }
 0x46e   : > { %8692 = vmatpush3.bf16.msra.mxu1 %v12821_v58  ;;  %v11965_v58 = vand.u32 4294901760, %v3198_v25 }
 0x46f   : > { %8694 = vmatprep.subr.bf16.mxu1 %v12822_v4 }
 0x470   : > { %v11993_v23 = vsub.f32 %v3198_v25, %v11965_v58 }
 0x472   : > { %8696 = vmatpush3.bf16.msra.mxu1 %v12822_v4  ;;  %v4052_v4 = vand.u32 4294901760, %v11949_v13  ;;  %v12723_v40 = vand.u32 4294901760, %v11993_v23 }
 0x473   : > { %8698 = vmatprep.subr.bf16.mxu1 %v12823_v61 }
 0x474   : > { %v12000_v60 = vpack.c.bf16 %v4052_v4, %v4049_v15 }
 0x476   : > { %8700 = vmatpush3.bf16.msra.mxu1 %v12823_v61 }
 0x477   : > { %8702 = vmatprep.subr.bf16.mxu1 %v11721_v5 }
 0x47a   : > { %8704 = vmatpush3.bf16.msra.mxu1 %v11721_v5  ;;  %v4019_v5 = vand.u32 4294901760, %v11842_v54 }
 0x47b   : > { %8706 = vmatprep.subr.bf16.mxu1 %v11511_v27 }
 0x47c   : > { %v11868_v63 = vpack.c.bf16 %v4022_v34, %v4019_v5 }
 0x47d   : > { %7470 = vmatmul.mubr.f32.vlgmr.msra.gmra.mrb[0].mxu1 %v11572_v56 }
 0x47e   : > { %8708 = vmatpush3.bf16.msra.mxu1 %v11511_v27  ;;  %7472 = vmatprep.mubr.f32.mxu1 %v11635_v17  ;;  %v12825_v27 = vld [vmem:[#allocation8_spill] sm:$0xff] }
 0x47f   : > { %8710 = vmatprep.subr.bf16.mxu1 %v11513_v32  ;;  %v3195_v62 = vmul.f32 %v12825_v27, %v12824_v24  ;;  %v11976_v27 = vsub.f32 %v3197_v59, %v11937_v16 }
 0x481   : > { %7473 = vmatmul.mubr.f32.gmra.mrb[2].mxu1 %v11666_v45  ;;  %v11814_v48 = vand.u32 4294901760, %v3195_v62 }
 0x482   : > { %8712 = vmatpush3.bf16.msra.mxu1 %v11513_v32  ;;  %7507 = vmatprep.mubr.f32.mxu1 %v11527_v19  ;;  %v3199_v32 = vld [vmem:[%s12669_s5] sm:$0xff]  ;;  %v3200_v19 = vld [vmem:[%s12669_s5 + $0x8] sm:$0xff] }
 0x483   : > { %8714 = vmatprep.subr.bf16.mxu1 %v11530_v37 }
 0x486   : > { %8716 = vmatpush3.bf16.msra.mxu1 %v11530_v37  ;;  %v11825_v37 = vsub.f32 %v3195_v62, %v11814_v48  ;;  %v4144_v62 = vand.u32 4294901760, %v11951_v55 }
 0x487   : > { %8718 = vmatprep.subr.bf16.mxu1 %v11559_v35 }
 0x488   : > { %v4089_v44 = vand.u32 4294901760, %v11825_v37 }
 0x48a   : > { %8720 = vmatpush3.bf16.msra.mxu1 %v11559_v35  ;;  %v4007_v35 = vand.u32 4294901760, %v3199_v32 }
 0x48b   : > { %8722 = vmatprep.subr.bf16.mxu1 %v11583_v38 }
 0x48c   : > { %v11910_v52 = vsub.f32 %v3199_v32, %v4007_v35  ;;  %v4151_v32 = vand.u32 4294901760, %v11953_v3 }
 0x48e   : > { %8724 = vmatpush3.bf16.msra.mxu1 %v11583_v38  ;;  %v4010_v38 = vand.u32 4294901760, %v3200_v19  ;;  %v4130_v39 = vand.u32 4294901760, %v11910_v52 }
 0x48f   : > { %8726 = vmatprep.subr.bf16.mxu1 %v11614_v51 }
 0x490   : > { %v11912_v12 = vsub.f32 %v3200_v19, %v4010_v38  ;;  %v4131_v61 = vsub.f32 %v11910_v52, %v4130_v39  ;;  %v11982_v19 = vsub.f32 %v11842_v54, %v4019_v5  ;;  %v4145_v5 = vsub.f32 %v11951_v55, %v4144_v62 }
 0x492   : > { %8728 = vmatpush3.bf16.msra.mxu1 %v11614_v51  ;;  %v11837_v51 = vpack.c.bf16 %v4010_v38, %v4007_v35  ;;  %v4137_v1 = vand.u32 4294901760, %v11912_v12  ;;  %v11985_v35 = vsub.f32 %v11847_v14, %v4022_v34  ;;  %v12725_v38 = vand.u32 4294901760, %v11956_v10 }
 0x493   : > { %8730 = vmatprep.subr.bf16.mxu1 %v11626_v28  ;;  %v4132_v54 = vand.u32 4294901760, %v4131_v61  ;;  %v4152_v34 = vsub.f32 %v11953_v3, %v4151_v32  ;;  %v12722_v36 = vand.u32 4294901760, %v11982_v19  ;;  %v4146_v25 = vand.u32 4294901760, %v4145_v5 }
 0x494   : > { %v4138_v24 = vsub.f32 %v11912_v12, %v4137_v1 }
 0x495   : > { %v4153_v61 = vand.u32 4294901760, %v4152_v34  ;;  %v4159_v42 = vsub.f32 %v11982_v19, %v12722_v36  ;;  %v12052_v34 = vsub.f32 %v11890_v0, %v4037_v18 }
 0x496   : > { %8732 = vmatpush3.bf16.msra.mxu1 %v11626_v28  ;;  %v4090_v28 = vsub.f32 %v11825_v37, %v4089_v44  ;;  %v4139_v14 = vand.u32 4294901760, %v4138_v24 }
 0x497   : > { %8734 = vmatprep.subr.bf16.mxu1 %v11631_v8 }
 0x498   : > { %v4091_v9 = vand.u32 4294901760, %v4090_v28  ;;  %v12724_v28 = vand.u32 4294901760, %v11976_v27  ;;  %v8769_v49 = vpack.c.bf16 %v4139_v14, %v4132_v54  ;;  %v4186_v54 = vand.u32 4294901760, %v12018_v47 }
 0x499   : > { %v4120_v14 = vsub.f32 %v11993_v23, %v12723_v40 }
 0x49a   : > { %8736 = vmatpush3.bf16.msra.mxu1 %v11631_v8  ;;  %v3206_v8 = vld [vmem:[%s12669_s5 + $0x38] sm:$0xff]  ;;  %v4110_v2 = vsub.f32 %v11976_v27, %v12724_v28  ;;  %v4187_v0 = vsub.f32 %v12018_v47, %v4186_v54 }
 0x49b   : > { %8738 = vmatprep.subr.bf16.mxu1 %v11837_v51  ;;  %v4028_v11 = vand.u32 4294901760, %v3206_v8 }
 0x49d   : > { %7508 = vmatmul.mubr.f32.vlgmr.msra.gmra.mrb[0].mxu1 %v11572_v56  ;;  %v11878_v56 = vld [vmem:[%s12669_s5 + $0x48] sm:$0xff]  ;;  %v11990_v21 = vsub.f32 %v3206_v8, %v4028_v11  ;;  %v12721_v8 = vand.u32 4294901760, %v11985_v35 }
 0x49e   : > { %8740 = vmatpush3.bf16.msra.mxu1 %v11837_v51  ;;  %7510 = vmatprep.mubr.f32.mxu1 %v11635_v17  ;;  %v11883_v17 = vpack.c.bf16 %v4028_v11, %v4025_v6  ;;  %v4034_v33 = vand.u32 4294901760, %v11878_v56  ;;  %v12720_v6 = vand.u32 4294901760, %v11988_v22 }
 0x49f   : > { %8742 = vmatprep.subr.bf16.mxu1 %v11854_v31  ;;  %v12719_v11 = vand.u32 4294901760, %v11990_v21 }
 0x4a0   : > { %v11919_v46 = vpack.c.bf16 %v4034_v33, %v4031_v29  ;;  %v12025_v59 = vsub.f32 %v11878_v56, %v4034_v33  ;;  %v4166_v29 = vsub.f32 %v11985_v35, %v12721_v8  ;;  %v4173_v56 = vsub.f32 %v11988_v22, %v12720_v6 }
 0x4a1   : > { %7511 = vmatmul.mubr.f32.gmra.mrb[2].mxu1 %v11666_v45  ;;  %v11895_v45 = vld [vmem:[%s12669_s5 + $0x58] sm:$0xff]  ;;  %v4180_v33 = vsub.f32 %v11990_v21, %v12719_v11  ;;  %v4111_v11 = vand.u32 4294901760, %v4110_v2  ;;  %v8773_v6 = vpack.c.bf16 %v4153_v61, %v4146_v25  ;;  %v4160_v8 = vand.u32 4294901760, %v4159_v42 }
 0x4a2   : > { %8744 = vmatpush3.bf16.msra.mxu1 %v11854_v31  ;;  %7545 = vmatprep.mubr.f32.mxu1 %v4091_v9  ;;  %v4040_v7 = vand.u32 4294901760, %v11895_v45  ;;  %v4100_v9 = vsub.f32 %v11956_v10, %v12725_v38  ;;  %v4193_v5 = vand.u32 4294901760, %v12025_v59  ;;  %v4167_v36 = vand.u32 4294901760, %v4166_v29 }
 0x4a3   : > { %8746 = vmatprep.subr.bf16.mxu1 %v11868_v63  ;;  %v4174_v40 = vand.u32 4294901760, %v4173_v56  ;;  %v4181_v28 = vand.u32 4294901760, %v4180_v33  ;;  %v4121_v38 = vand.u32 4294901760, %v4120_v14  ;;  %v12070_v25 = vsub.f32 %v11903_v43, %v4043_v57 }
 0x4a4   : > { %v11944_v53 = vpack.c.bf16 %v4040_v7, %v4037_v18  ;;  %v4101_v24 = vand.u32 4294901760, %v4100_v9  ;;  %v12057_v9 = vsub.f32 %v11895_v45, %v4040_v7  ;;  %v4194_v18 = vsub.f32 %v12025_v59, %v4193_v5 }
 0x4a5   : > { %v4200_v45 = vand.u32 4294901760, %v12052_v34  ;;  %v8777_v2 = vpack.c.bf16 %v4167_v36, %v4160_v8  ;;  %v8781_v61 = vpack.c.bf16 %v4181_v28, %v4174_v40  ;;  %v4188_v42 = vand.u32 4294901760, %v4187_v0 }
 0x4a6   : > { %8748 = vmatpush3.bf16.msra.mxu1 %v11868_v63  ;;  %v4207_v7 = vand.u32 4294901760, %v12057_v9  ;;  %v4195_v29 = vand.u32 4294901760, %v4194_v18  ;;  %v4214_v43 = vand.u32 4294901760, %v12070_v25  ;;  %v12089_v57 = vsub.f32 %v11933_v50, %v4049_v15 }
 0x4a7   : > { %8750 = vmatprep.subr.bf16.mxu1 %v11883_v17 }
 0x4a8   : > { %v4208_v36 = vsub.f32 %v12057_v9, %v4207_v7  ;;  %v4228_v50 = vand.u32 4294901760, %v12089_v57 }
 0x4aa   : > { %8752 = vmatpush3.bf16.msra.mxu1 %v11883_v17  ;;  %v4209_v8 = vand.u32 4294901760, %v4208_v36  ;;  %v4229_v56 = vsub.f32 %v12089_v57, %v4228_v50  ;;  %v8817_v36 = vpack.c.bf16 %v12025_v59, %v12018_v47  ;;  %v5858_v47 = vld [vmem:[%s12669_s5 + $0x118] sm:$0xff] }
 0x4ab   : > { %8754 = vmatprep.subr.bf16.mxu1 %v11919_v46 }
 0x4ac   : > { %v4230_v0 = vand.u32 4294901760, %v4229_v56 }
 0x4ae   : > { %8756 = vmatpush3.bf16.msra.mxu1 %v11919_v46 }
 0x4af   : > { %8758 = vmatprep.subr.bf16.mxu1 %v11944_v53 }
 0x4b2   : > { %8760 = vmatpush3.bf16.msra.mxu1 %v11944_v53 }
 0x4b3   : > { %8762 = vmatprep.subr.bf16.mxu1 %v11962_v26 }
 0x4b6   : > { %8764 = vmatpush3.bf16.msra.mxu1 %v11962_v26 }
 0x4b7   : > { %8766 = vmatprep.subr.bf16.mxu1 %v12000_v60 }
 0x4ba   : > { %8768 = vmatpush3.bf16.msra.mxu1 %v12000_v60 }
 0x4bb   : > { %8770 = vmatprep.subr.bf16.mxu1 %v8769_v49 }
 0x4bd   : > { %7546 = vmatmul.mubr.f32.vlgmr.msra.gmra.mrb[0].mxu1 %v4101_v24 }
 0x4be   : > { %8772 = vmatpush3.bf16.msra.mxu1 %v8769_v49  ;;  %7548 = vmatprep.mubr.f32.mxu1 %v4111_v11  ;;  %v12075_v49 = vsub.f32 %v11908_v20, %v4046_v41  ;;  %v4201_v11 = vsub.f32 %v12052_v34, %v4200_v45  ;;  %v12094_v41 = vsub.f32 %v11949_v13, %v4052_v4 }
 0x4bf   : > { %8774 = vmatprep.subr.bf16.mxu1 %v8773_v6 }
 0x4c0   : > { %v4221_v20 = vand.u32 4294901760, %v12075_v49  ;;  %v4202_v28 = vand.u32 4294901760, %v4201_v11  ;;  %v4235_v15 = vand.u32 4294901760, %v12094_v41  ;;  %v8813_v11 = vpack.c.bf16 %v11990_v21, %v11988_v22 }
 0x4c1   : > { %7549 = vmatmul.mubr.f32.gmra.mrb[2].mxu1 %v4121_v38  ;;  %v8785_v38 = vpack.c.bf16 %v4195_v29, %v4188_v42  ;;  %v8805_v42 = vpack.c.bf16 %v11953_v3, %v11951_v55  ;;  %v8809_v29 = vpack.c.bf16 %v11985_v35, %v11982_v19  ;;  %v12834_v55 = vand.u32 4294901760, %v11988_v22 }
 0x4c2   : > { %8776 = vmatpush3.bf16.msra.mxu1 %v8773_v6  ;;  %7583 = vmatprep.mubr.f32.mxu1 %v11814_v48  ;;  %v4215_v6 = vsub.f32 %v12070_v25, %v4214_v43  ;;  %v4222_v40 = vsub.f32 %v12075_v49, %v4221_v20  ;;  %v8789_v13 = vpack.c.bf16 %v4209_v8, %v4202_v28  ;;  %v12835_v3 = vand.u32 4294901760, %v11990_v21 }
 0x4c3   : > { %8778 = vmatprep.subr.bf16.mxu1 %v8777_v2  ;;  %v4236_v33 = vsub.f32 %v12094_v41, %v4235_v15  ;;  %v8825_v28 = vpack.c.bf16 %v12075_v49, %v12070_v25  ;;  %v8829_v8 = vpack.c.bf16 %v12094_v41, %v12089_v57  ;;  %v5861_v49 = vld [vmem:[%s12669_s5 + $0x130] sm:$0xff] }
 0x4c4   : > { %v4216_v4 = vand.u32 4294901760, %v4215_v6  ;;  %v4223_v24 = vand.u32 4294901760, %v4222_v40  ;;  %v12829_v6 = vand.u32 4294901760, %v11956_v10  ;;  %v12830_v40 = vand.u32 4294901760, %v11976_v27 }
 0x4c5   : > { %v4237_v18 = vand.u32 4294901760, %v4236_v33  ;;  %v4816_v57 = vand.u32 4294901760, %v5861_v49  ;;  %v12295_v33 = vld [vmem:[%s12669_s5 + $0x160] sm:$0xff] }
 0x4c6   : > { %8780 = vmatpush3.bf16.msra.mxu1 %v8777_v2  ;;  %v8793_v14 = vpack.c.bf16 %v4223_v24, %v4216_v4  ;;  %v12282_v4 = vld [vmem:[%s12669_s5 + $0x150] sm:$0xff]  ;;  %v12838_v24 = vld [vmem:[#allocation13_spill] sm:$0xff] }
 0x4c7   : > { %8782 = vmatprep.subr.bf16.mxu1 %v8781_v61  ;;  %v8797_v2 = vpack.c.bf16 %v4237_v18, %v4230_v0 }
 0x4ca   : > { %8784 = vmatpush3.bf16.msra.mxu1 %v8781_v61  ;;  %v8801_v61 = vpack.c.bf16 %v11912_v12, %v11910_v52  ;;  %v12831_v52 = vand.u32 4294901760, %v11982_v19  ;;  %v12832_v12 = vand.u32 4294901760, %v11985_v35  ;;  %v8893_v19 = vpack.c.bf16 %v4235_v15, %v4228_v50  ;;  %v12836_v35 = vld [vmem:[#allocation7_spill] sm:$0xff]  ;;  %v12265_v50 = vld [vmem:[%s12669_s5 + $0x140] sm:$0xff] }
 0x4cb   : > { %8786 = vmatprep.subr.bf16.mxu1 %v8785_v38  ;;  %v4822_v15 = vand.u32 4294901760, %v12265_v50  ;;  %v4777_v56 = vmul.f32 %v12838_v24, %v12836_v35 }
 0x4cd   : > { %v12410_v24 = vsub.f32 %v12265_v50, %v4822_v15 }
 0x4ce   : > { %8788 = vmatpush3.bf16.msra.mxu1 %v8785_v38  ;;  %v8821_v38 = vpack.c.bf16 %v12057_v9, %v12052_v34  ;;  %v12234_v34 = vld [vmem:[%s12669_s5 + $0x120] sm:$0xff]  ;;  %v12239_v9 = vld [vmem:[%s12669_s5 + $0x128] sm:$0xff] }
 0x4cf   : > { %8790 = vmatprep.subr.bf16.mxu1 %v8789_v13  ;;  %v4813_v25 = vand.u32 4294901760, %v12239_v9 }
 0x4d2   : > { %8792 = vmatpush3.bf16.msra.mxu1 %v8789_v13 }
 0x4d3   : > { %8794 = vmatprep.subr.bf16.mxu1 %v8793_v14 }
 0x4d6   : > { %8796 = vmatpush3.bf16.msra.mxu1 %v8793_v14  ;;  %v12300_v14 = vld [vmem:[%s12669_s5 + $0x168] sm:$0xff] }
 0x4d7   : > { %8798 = vmatprep.subr.bf16.mxu1 %v8797_v2 }
 0x4da   : > { %8800 = vmatpush3.bf16.msra.mxu1 %v8797_v2  ;;  %v12839_v2 = vld [vmem:[#allocation14_spill] sm:$0xff] }
 0x4db   : > { %8802 = vmatprep.subr.bf16.mxu1 %v8801_v61 }
 0x4dd   : > { %7584 = vmatmul.mubr.f32.vlgmr.msra.gmra.mrb[0].mxu1 %v11923_v30 }
 0x4de   : > { %8804 = vmatpush3.bf16.msra.mxu1 %v8801_v61  ;;  %7586 = vmatprep.mubr.f32.mxu1 %v11937_v16  ;;  %v4778_v61 = vmul.f32 %v12839_v2, %v12836_v35 }
 0x4df   : > { %8806 = vmatprep.subr.bf16.mxu1 %v8805_v42 }
 0x4e1   : > { %7587 = vmatmul.mubr.f32.gmra.mrb[2].mxu1 %v11965_v58 }
 0x4e2   : > { %8808 = vmatpush3.bf16.msra.mxu1 %v8805_v42  ;;  %7621 = vmatprep.mubr.f32.mxu1 %v11825_v37  ;;  %v8865_v37 = vpack.c.bf16 %v4137_v1, %v4130_v39  ;;  %v8873_v39 = vpack.c.bf16 %v12832_v12, %v12831_v52  ;;  %v12833_v1 = vand.u32 4294901760, %v11993_v23  ;;  %v12329_v52 = vand.u32 4294901760, %v4778_v61 }
 0x4e3   : > { %8810 = vmatprep.subr.bf16.mxu1 %v8809_v29 }
 0x4e6   : > { %8812 = vmatpush3.bf16.msra.mxu1 %v8809_v29  ;;  %v4828_v29 = vand.u32 4294901760, %v12282_v4 }
 0x4e7   : > { %8814 = vmatprep.subr.bf16.mxu1 %v8813_v11 }
 0x4ea   : > { %8816 = vmatpush3.bf16.msra.mxu1 %v8813_v11 }
 0x4eb   : > { %8818 = vmatprep.subr.bf16.mxu1 %v8817_v36 }
 0x4ee   : > { %8820 = vmatpush3.bf16.msra.mxu1 %v8817_v36  ;;  %v12315_v36 = vand.u32 4294901760, %v4777_v56 }
 0x4ef   : > { %8822 = vmatprep.subr.bf16.mxu1 %v8821_v38 }
 0x4f2   : > { %8824 = vmatpush3.bf16.msra.mxu1 %v8821_v38  ;;  %v4834_v38 = vand.u32 4294901760, %v12295_v33 }
 0x4f3   : > { %8826 = vmatprep.subr.bf16.mxu1 %v8825_v28 }
 0x4f6   : > { %8828 = vmatpush3.bf16.msra.mxu1 %v8825_v28  ;;  %v4837_v28 = vand.u32 4294901760, %v12300_v14 }
 0x4f7   : > { %8830 = vmatprep.subr.bf16.mxu1 %v8829_v8 }
 0x4fa   : > { %8832 = vmatpush3.bf16.msra.mxu1 %v8829_v8  ;;  %v12840_v8 = vld [vmem:[#allocation15_spill] sm:$0xff] }
 0x4fb   : > { %8834 = vmatprep.subr.bf16.mxu1 %v11837_v51 }
 0x4fd   : > { %7622 = vmatmul.mubr.f32.vlgmr.msra.gmra.mrb[0].mxu1 %v11956_v10  ;;  %v8877_v10 = vpack.c.bf16 %v12835_v3, %v12834_v55  ;;  %v12348_v3 = vsub.f32 %v4777_v56, %v12315_v36 }
 0x4fe   : > { %8836 = vmatpush3.bf16.msra.mxu1 %v11837_v51  ;;  %7624 = vmatprep.mubr.f32.mxu1 %v11976_v27  ;;  %v8881_v27 = vpack.c.bf16 %v4193_v5, %v4186_v54  ;;  %v4807_v5 = vand.u32 4294901760, %v5858_v47 }
 0x4ff   : > { %8838 = vmatprep.subr.bf16.mxu1 %v11854_v31 }
 0x500   : > { %v12345_v55 = vsub.f32 %v5858_v47, %v4807_v5 }
 0x501   : > { %7625 = vmatmul.mubr.f32.gmra.mrb[2].mxu1 %v11993_v23  ;;  %v5857_v23 = vld [vmem:[%s12669_s5 + $0x110] sm:$0xff] }
 0x502   : > { %8840 = vmatpush3.bf16.msra.mxu1 %v11854_v31  ;;  %7659 = vmatprep.mubr.f32.mxu1 %v4089_v44  ;;  %v8869_v44 = vpack.c.bf16 %v4151_v32, %v4144_v62  ;;  %v8885_v62 = vpack.c.bf16 %v4207_v7, %v4200_v45  ;;  %v8889_v32 = vpack.c.bf16 %v4221_v20, %v4214_v43  ;;  %v4804_v54 = vand.u32 4294901760, %v5857_v23 }
 0x503   : > { %8842 = vmatprep.subr.bf16.mxu1 %v11868_v63  ;;  %v4810_v7 = vand.u32 4294901760, %v12234_v34 }
 0x504   : > { %v12246_v45 = vpack.c.bf16 %v4807_v5, %v4804_v54 }
 0x505   : > { %v12260_v20 = vpack.c.bf16 %v4813_v25, %v4810_v7 }
 0x506   : > { %8844 = vmatpush3.bf16.msra.mxu1 %v11868_v63 }
 0x507   : > { %8846 = vmatprep.subr.bf16.mxu1 %v11883_v17 }
 0x50a   : > { %8848 = vmatpush3.bf16.msra.mxu1 %v11883_v17 }
 0x50b   : > { %8850 = vmatprep.subr.bf16.mxu1 %v11919_v46 }
 0x50e   : > { %8852 = vmatpush3.bf16.msra.mxu1 %v11919_v46 }
 0x50f   : > { %8854 = vmatprep.subr.bf16.mxu1 %v11944_v53 }
 0x512   : > { %8856 = vmatpush3.bf16.msra.mxu1 %v11944_v53 }
 0x513   : > { %8858 = vmatprep.subr.bf16.mxu1 %v11962_v26 }
 0x516   : > { %8860 = vmatpush3.bf16.msra.mxu1 %v11962_v26 }
 0x517   : > { %8862 = vmatprep.subr.bf16.mxu1 %v12000_v60 }
 0x51a   : > { %8864 = vmatpush3.bf16.msra.mxu1 %v12000_v60 }
 0x51b   : > { %8866 = vmatprep.subr.bf16.mxu1 %v8865_v37 }
 0x51d   : > { %7660 = vmatmul.mubr.f32.vlgmr.msra.gmra.mrb[0].mxu1 %v12829_v6 }
 0x51e   : > { %8868 = vmatpush3.bf16.msra.mxu1 %v8865_v37  ;;  %7662 = vmatprep.mubr.f32.mxu1 %v12830_v40  ;;  %v4779_v37 = vmul.f32 %v12840_v8, %v12836_v35 }
 0x51f   : > { %8870 = vmatprep.subr.bf16.mxu1 %v8869_v44 }
 0x521   : > { %7663 = vmatmul.mubr.f32.gmra.mrb[2].mxu1 %v12833_v1  ;;  %v12343_v1 = vsub.f32 %v5857_v23, %v4804_v54  ;;  %v12380_v23 = vsub.f32 %v5861_v49, %v4816_v57 }
 0x522   : > { %8872 = vmatpush3.bf16.msra.mxu1 %v8869_v44  ;;  %7697 = vmatprep.mubr.f32.mxu1 %v11814_v48  ;;  %v12325_v44 = vld [vmem:[%s12669_s5 + $0x170] sm:$0xff] }
 0x523   : > { %8874 = vmatprep.subr.bf16.mxu1 %v8873_v39 }
 0x526   : > { %8876 = vmatpush3.bf16.msra.mxu1 %v8873_v39  ;;  %v12341_v39 = vld [vmem:[%s12669_s5 + $0x178] sm:$0xff] }
 0x527   : > { %8878 = vmatprep.subr.bf16.mxu1 %v8877_v10 }
 0x52a   : > { %8880 = vmatpush3.bf16.msra.mxu1 %v8877_v10  ;;  %v12354_v10 = vpack.c.bf16 %v4837_v28, %v4834_v38 }
 0x52b   : > { %8882 = vmatprep.subr.bf16.mxu1 %v8881_v27 }
 0x52e   : > { %8884 = vmatpush3.bf16.msra.mxu1 %v8881_v27  ;;  %v4840_v27 = vand.u32 4294901760, %v12325_v44 }
 0x52f   : > { %8886 = vmatprep.subr.bf16.mxu1 %v8885_v62 }
 0x532   : > { %8888 = vmatpush3.bf16.msra.mxu1 %v8885_v62  ;;  %v12357_v62 = vand.u32 4294901760, %v4779_v37 }
 0x533   : > { %8890 = vmatprep.subr.bf16.mxu1 %v8889_v32 }
 0x534   : > { %v12385_v54 = vsub.f32 %v4779_v37, %v12357_v62 }
 0x536   : > { %8892 = vmatpush3.bf16.msra.mxu1 %v8889_v32  ;;  %v4843_v32 = vand.u32 4294901760, %v12341_v39  ;;  %v12730_v56 = vand.u32 4294901760, %v12385_v54 }
 0x537   : > { %8894 = vmatprep.subr.bf16.mxu1 %v8893_v19 }
 0x538   : > { %v12392_v5 = vpack.c.bf16 %v4843_v32, %v4840_v27 }
 0x53a   : > { %8896 = vmatpush3.bf16.msra.mxu1 %v8893_v19 }
 0x53b   : > { %8898 = vmatprep.subr.bf16.mxu1 %v11837_v51 }
 0x53d   : > { %7698 = vmatmul.mubr.f32.vlgmr.msra.gmra.mrb[0].mxu1 %v11923_v30 }
 0x53e   : > { %8900 = vmatpush3.bf16.msra.mxu1 %v11837_v51  ;;  %7700 = vmatprep.mubr.f32.mxu1 %v11937_v16  ;;  %v12837_v51 = vld [vmem:[#allocation12_spill] sm:$0xff] }
 0x53f   : > { %8902 = vmatprep.subr.bf16.mxu1 %v11854_v31  ;;  %v4776_v22 = vmul.f32 %v12837_v51, %v12836_v35  ;;  %v12368_v51 = vsub.f32 %v4778_v61, %v12329_v52 }
 0x541   : > { %7701 = vmatmul.mubr.f32.gmra.mrb[2].mxu1 %v11965_v58  ;;  %v12206_v21 = vand.u32 4294901760, %v4776_v22 }
 0x542   : > { %8904 = vmatpush3.bf16.msra.mxu1 %v11854_v31  ;;  %7735 = vmatprep.mubr.f32.mxu1 %v11814_v48  ;;  %v5855_v48 = vld [vmem:[%s12669_s5 + $0x100] sm:$0xff]  ;;  %v5856_v31 = vld [vmem:[%s12669_s5 + $0x108] sm:$0xff] }
 0x543   : > { %8906 = vmatprep.subr.bf16.mxu1 %v11868_v63 }
 0x546   : > { %8908 = vmatpush3.bf16.msra.mxu1 %v11868_v63  ;;  %v12217_v63 = vsub.f32 %v4776_v22, %v12206_v21  ;;  %v4935_v22 = vand.u32 4294901760, %v12343_v1 }
 0x547   : > { %8910 = vmatprep.subr.bf16.mxu1 %v11883_v17 }
 0x548   : > { %v4880_v59 = vand.u32 4294901760, %v12217_v63 }
 0x54a   : > { %8912 = vmatpush3.bf16.msra.mxu1 %v11883_v17  ;;  %v4798_v17 = vand.u32 4294901760, %v5855_v48 }
 0x54b   : > { %8914 = vmatprep.subr.bf16.mxu1 %v11919_v46 }
 0x54c   : > { %v12302_v0 = vsub.f32 %v5855_v48, %v4798_v17  ;;  %v4942_v48 = vand.u32 4294901760, %v12345_v55 }
 0x54e   : > { %8916 = vmatpush3.bf16.msra.mxu1 %v11919_v46  ;;  %v4801_v46 = vand.u32 4294901760, %v5856_v31  ;;  %v4921_v6 = vand.u32 4294901760, %v12302_v0 }
 0x54f   : > { %8918 = vmatprep.subr.bf16.mxu1 %v11944_v53 }
 0x550   : > { %v12304_v18 = vsub.f32 %v5856_v31, %v4801_v46  ;;  %v4922_v19 = vsub.f32 %v12302_v0, %v4921_v6  ;;  %v12374_v31 = vsub.f32 %v12234_v34, %v4810_v7  ;;  %v4936_v7 = vsub.f32 %v12343_v1, %v4935_v22 }
 0x552   : > { %8920 = vmatpush3.bf16.msra.mxu1 %v11944_v53  ;;  %v12229_v53 = vpack.c.bf16 %v4801_v46, %v4798_v17  ;;  %v4928_v40 = vand.u32 4294901760, %v12304_v18  ;;  %v12377_v17 = vsub.f32 %v12239_v9, %v4813_v25  ;;  %v12732_v46 = vand.u32 4294901760, %v12348_v3 }
 0x553   : > { %8922 = vmatprep.subr.bf16.mxu1 %v11962_v26  ;;  %v4923_v34 = vand.u32 4294901760, %v4922_v19  ;;  %v4943_v25 = vsub.f32 %v12345_v55, %v4942_v48  ;;  %v12729_v49 = vand.u32 4294901760, %v12374_v31  ;;  %v4937_v37 = vand.u32 4294901760, %v4936_v7 }
 0x554   : > { %v4929_v35 = vsub.f32 %v12304_v18, %v4928_v40 }
 0x555   : > { %v4944_v19 = vand.u32 4294901760, %v4943_v25  ;;  %v4950_v50 = vsub.f32 %v12374_v31, %v12729_v49  ;;  %v12444_v25 = vsub.f32 %v12282_v4, %v4828_v29 }
 0x556   : > { %8924 = vmatpush3.bf16.msra.mxu1 %v11962_v26  ;;  %v4881_v26 = vsub.f32 %v12217_v63, %v4880_v59  ;;  %v4930_v9 = vand.u32 4294901760, %v4929_v35 }
 0x557   : > { %8926 = vmatprep.subr.bf16.mxu1 %v12000_v60 }
 0x558   : > { %v4882_v43 = vand.u32 4294901760, %v4881_v26  ;;  %v12731_v26 = vand.u32 4294901760, %v12368_v51  ;;  %v8961_v2 = vpack.c.bf16 %v4930_v9, %v4923_v34  ;;  %v4977_v34 = vand.u32 4294901760, %v12410_v24 }
 0x559   : > { %v4911_v9 = vsub.f32 %v12385_v54, %v12730_v56 }
 0x55a   : > { %8928 = vmatpush3.bf16.msra.mxu1 %v12000_v60  ;;  %v5862_v60 = vld [vmem:[%s12669_s5 + $0x138] sm:$0xff]  ;;  %v4901_v8 = vsub.f32 %v12368_v51, %v12731_v26  ;;  %v4978_v4 = vsub.f32 %v12410_v24, %v4977_v34 }
 0x55b   : > { %8930 = vmatprep.subr.bf16.mxu1 %v12229_v53  ;;  %v4819_v41 = vand.u32 4294901760, %v5862_v60 }
 0x55d   : > { %7736 = vmatmul.mubr.f32.vlgmr.msra.gmra.mrb[0].mxu1 %v11923_v30  ;;  %v12270_v30 = vld [vmem:[%s12669_s5 + $0x148] sm:$0xff]  ;;  %v12382_v47 = vsub.f32 %v5862_v60, %v4819_v41  ;;  %v12728_v60 = vand.u32 4294901760, %v12377_v17 }
 0x55e   : > { %8932 = vmatpush3.bf16.msra.mxu1 %v12229_v53  ;;  %7738 = vmatprep.mubr.f32.mxu1 %v11937_v16  ;;  %v12275_v16 = vpack.c.bf16 %v4819_v41, %v4816_v57  ;;  %v4825_v13 = vand.u32 4294901760, %v12270_v30  ;;  %v12727_v57 = vand.u32 4294901760, %v12380_v23 }
 0x55f   : > { %8934 = vmatprep.subr.bf16.mxu1 %v12246_v45  ;;  %v12726_v41 = vand.u32 4294901760, %v12382_v47 }
 0x560   : > { %v12311_v42 = vpack.c.bf16 %v4825_v13, %v4822_v15  ;;  %v12417_v61 = vsub.f32 %v12270_v30, %v4825_v13  ;;  %v4957_v15 = vsub.f32 %v12377_v17, %v12728_v60  ;;  %v4964_v30 = vsub.f32 %v12380_v23, %v12727_v57 }
 0x561   : > { %7739 = vmatmul.mubr.f32.gmra.mrb[2].mxu1 %v11965_v58  ;;  %v12287_v58 = vld [vmem:[%s12669_s5 + $0x158] sm:$0xff]  ;;  %v4971_v13 = vsub.f32 %v12382_v47, %v12726_v41  ;;  %v4902_v41 = vand.u32 4294901760, %v4901_v8  ;;  %v8965_v57 = vpack.c.bf16 %v4944_v19, %v4937_v37  ;;  %v4951_v60 = vand.u32 4294901760, %v4950_v50 }
 0x562   : > { %8936 = vmatpush3.bf16.msra.mxu1 %v12246_v45  ;;  %7773 = vmatprep.mubr.f32.mxu1 %v4882_v43  ;;  %v4831_v11 = vand.u32 4294901760, %v12287_v58  ;;  %v4891_v43 = vsub.f32 %v12348_v3, %v12732_v46  ;;  %v4984_v7 = vand.u32 4294901760, %v12417_v61  ;;  %v4958_v49 = vand.u32 4294901760, %v4957_v15 }
 0x563   : > { %8938 = vmatprep.subr.bf16.mxu1 %v12260_v20  ;;  %v4965_v56 = vand.u32 4294901760, %v4964_v30  ;;  %v4972_v26 = vand.u32 4294901760, %v4971_v13  ;;  %v4912_v46 = vand.u32 4294901760, %v4911_v9  ;;  %v12462_v37 = vsub.f32 %v12295_v33, %v4834_v38 }
 0x564   : > { %v12336_v12 = vpack.c.bf16 %v4831_v11, %v4828_v29  ;;  %v4892_v35 = vand.u32 4294901760, %v4891_v43  ;;  %v12449_v43 = vsub.f32 %v12287_v58, %v4831_v11  ;;  %v4985_v29 = vsub.f32 %v12417_v61, %v4984_v7 }
 0x565   : > { %v4991_v58 = vand.u32 4294901760, %v12444_v25  ;;  %v8969_v8 = vpack.c.bf16 %v4958_v49, %v4951_v60  ;;  %v8973_v19 = vpack.c.bf16 %v4972_v26, %v4965_v56  ;;  %v4979_v50 = vand.u32 4294901760, %v4978_v4 }
 0x566   : > { %8940 = vmatpush3.bf16.msra.mxu1 %v12260_v20  ;;  %v4998_v11 = vand.u32 4294901760, %v12449_v43  ;;  %v4986_v15 = vand.u32 4294901760, %v4985_v29  ;;  %v5005_v33 = vand.u32 4294901760, %v12462_v37  ;;  %v12481_v38 = vsub.f32 %v12325_v44, %v4840_v27 }
 0x567   : > { %8942 = vmatprep.subr.bf16.mxu1 %v12275_v16 }
 0x568   : > { %v4999_v49 = vsub.f32 %v12449_v43, %v4998_v11  ;;  %v5019_v44 = vand.u32 4294901760, %v12481_v38 }
 0x56a   : > { %8944 = vmatpush3.bf16.msra.mxu1 %v12275_v16  ;;  %v5000_v60 = vand.u32 4294901760, %v4999_v49  ;;  %v5020_v30 = vsub.f32 %v12481_v38, %v5019_v44  ;;  %v9009_v49 = vpack.c.bf16 %v12417_v61, %v12410_v24 }
 0x56b   : > { %8946 = vmatprep.subr.bf16.mxu1 %v12311_v42 }
 0x56c   : > { %v5021_v4 = vand.u32 4294901760, %v5020_v30 }
 0x56e   : > { %8948 = vmatpush3.bf16.msra.mxu1 %v12311_v42 }
 0x56f   : > { %8950 = vmatprep.subr.bf16.mxu1 %v12336_v12 }
 0x572   : > { %8952 = vmatpush3.bf16.msra.mxu1 %v12336_v12 }
 0x573   : > { %8954 = vmatprep.subr.bf16.mxu1 %v12354_v10 }
 0x576   : > { %8956 = vmatpush3.bf16.msra.mxu1 %v12354_v10 }
 0x577   : > { %8958 = vmatprep.subr.bf16.mxu1 %v12392_v5 }
 0x57a   : > { %8960 = vmatpush3.bf16.msra.mxu1 %v12392_v5 }
 0x57b   : > { %8962 = vmatprep.subr.bf16.mxu1 %v8961_v2 }
 0x57d   : > { %7774 = vmatmul.mubr.f32.vlgmr.msra.gmra.mrb[0].mxu1 %v4892_v35 }
 0x57e   : > { %8964 = vmatpush3.bf16.msra.mxu1 %v8961_v2  ;;  %7776 = vmatprep.mubr.f32.mxu1 %v4902_v41  ;;  %v12467_v2 = vsub.f32 %v12300_v14, %v4837_v28  ;;  %v4992_v41 = vsub.f32 %v12444_v25, %v4991_v58  ;;  %v12486_v28 = vsub.f32 %v12341_v39, %v4843_v32 }
 0x57f   : > { %8966 = vmatprep.subr.bf16.mxu1 %v8965_v57 }
 0x580   : > { %v5012_v14 = vand.u32 4294901760, %v12467_v2  ;;  %v4993_v26 = vand.u32 4294901760, %v4992_v41  ;;  %v5026_v27 = vand.u32 4294901760, %v12486_v28  ;;  %v9005_v41 = vpack.c.bf16 %v12382_v47, %v12380_v23 }
 0x581   : > { %7777 = vmatmul.mubr.f32.gmra.mrb[2].mxu1 %v4912_v46  ;;  %v8977_v46 = vpack.c.bf16 %v4986_v15, %v4979_v50  ;;  %v8997_v50 = vpack.c.bf16 %v12345_v55, %v12343_v1  ;;  %v9001_v15 = vpack.c.bf16 %v12377_v17, %v12374_v31  ;;  %v12846_v1 = vand.u32 4294901760, %v12380_v23 }
 0x582   : > { %8968 = vmatpush3.bf16.msra.mxu1 %v8965_v57  ;;  %7811 = vmatprep.mubr.f32.mxu1 %v12206_v21  ;;  %v5006_v57 = vsub.f32 %v12462_v37, %v5005_v33  ;;  %v5013_v56 = vsub.f32 %v12467_v2, %v5012_v14  ;;  %v8981_v39 = vpack.c.bf16 %v5000_v60, %v4993_v26  ;;  %v12847_v55 = vand.u32 4294901760, %v12382_v47 }
 0x583   : > { %8970 = vmatprep.subr.bf16.mxu1 %v8969_v8  ;;  %v5027_v13 = vsub.f32 %v12486_v28, %v5026_v27  ;;  %v9017_v26 = vpack.c.bf16 %v12467_v2, %v12462_v37  ;;  %v9021_v60 = vpack.c.bf16 %v12486_v28, %v12481_v38 }
 0x584   : > { %v5007_v32 = vand.u32 4294901760, %v5006_v57  ;;  %v5014_v35 = vand.u32 4294901760, %v5013_v56  ;;  %v12841_v57 = vand.u32 4294901760, %v12348_v3  ;;  %v12842_v56 = vand.u32 4294901760, %v12368_v51 }
 0x585   : > { %v5028_v29 = vand.u32 4294901760, %v5027_v13 }
 0x586   : > { %8972 = vmatpush3.bf16.msra.mxu1 %v8969_v8  ;;  %v8985_v9 = vpack.c.bf16 %v5014_v35, %v5007_v32 }
 0x587   : > { %8974 = vmatprep.subr.bf16.mxu1 %v8973_v19  ;;  %v8989_v8 = vpack.c.bf16 %v5028_v29, %v5021_v4 }
 0x58a   : > { %8976 = vmatpush3.bf16.msra.mxu1 %v8973_v19  ;;  %v8993_v19 = vpack.c.bf16 %v12304_v18, %v12302_v0  ;;  %v12843_v0 = vand.u32 4294901760, %v12374_v31  ;;  %v12844_v18 = vand.u32 4294901760, %v12377_v17  ;;  %v9085_v31 = vpack.c.bf16 %v5026_v27, %v5019_v44 }
 0x58b   : > { %8978 = vmatprep.subr.bf16.mxu1 %v8977_v46 }
 0x58e   : > { %8980 = vmatpush3.bf16.msra.mxu1 %v8977_v46  ;;  %v9013_v46 = vpack.c.bf16 %v12449_v43, %v12444_v25 }
 0x58f   : > { %8982 = vmatprep.subr.bf16.mxu1 %v8981_v39 }
 0x592   : > { %8984 = vmatpush3.bf16.msra.mxu1 %v8981_v39 }
 0x593   : > { %8986 = vmatprep.subr.bf16.mxu1 %v8985_v9 }
 0x596   : > { %8988 = vmatpush3.bf16.msra.mxu1 %v8985_v9 }
 0x597   : > { %8990 = vmatprep.subr.bf16.mxu1 %v8989_v8 }
 0x59a   : > { %8992 = vmatpush3.bf16.msra.mxu1 %v8989_v8 }
 0x59b   : > { %8994 = vmatprep.subr.bf16.mxu1 %v8993_v19 }
 0x59d   : > { %7812 = vmatmul.mubr.f32.vlgmr.msra.gmra.mrb[0].mxu1 %v12315_v36 }
 0x59e   : > { %8996 = vmatpush3.bf16.msra.mxu1 %v8993_v19  ;;  %7814 = vmatprep.mubr.f32.mxu1 %v12329_v52 }
 0x59f   : > { %8998 = vmatprep.subr.bf16.mxu1 %v8997_v50 }
 0x5a1   : > { %7815 = vmatmul.mubr.f32.gmra.mrb[2].mxu1 %v12357_v62 }
 0x5a2   : > { %9000 = vmatpush3.bf16.msra.mxu1 %v8997_v50  ;;  %7849 = vmatprep.mubr.f32.mxu1 %v12217_v63  ;;  %v9057_v63 = vpack.c.bf16 %v4928_v40, %v4921_v6  ;;  %v9065_v6 = vpack.c.bf16 %v12844_v18, %v12843_v0  ;;  %v12845_v40 = vand.u32 4294901760, %v12385_v54 }
 0x5a3   : > { %9002 = vmatprep.subr.bf16.mxu1 %v9001_v15 }
 0x5a6   : > { %9004 = vmatpush3.bf16.msra.mxu1 %v9001_v15 }
 0x5a7   : > { %9006 = vmatprep.subr.bf16.mxu1 %v9005_v41 }
 0x5aa   : > { %9008 = vmatpush3.bf16.msra.mxu1 %v9005_v41 }
 0x5ab   : > { %9010 = vmatprep.subr.bf16.mxu1 %v9009_v49 }
 0x5ae   : > { %9012 = vmatpush3.bf16.msra.mxu1 %v9009_v49 }
 0x5af   : > { %9014 = vmatprep.subr.bf16.mxu1 %v9013_v46 }
 0x5b2   : > { %9016 = vmatpush3.bf16.msra.mxu1 %v9013_v46 }
 0x5b3   : > { %9018 = vmatprep.subr.bf16.mxu1 %v9017_v26 }
 0x5b6   : > { %9020 = vmatpush3.bf16.msra.mxu1 %v9017_v26 }
 0x5b7   : > { %9022 = vmatprep.subr.bf16.mxu1 %v9021_v60 }
 0x5ba   : > { %9024 = vmatpush3.bf16.msra.mxu1 %v9021_v60 }
 0x5bb   : > { %9026 = vmatprep.subr.bf16.mxu1 %v12229_v53 }
 0x5bd   : > { %7850 = vmatmul.mubr.f32.vlgmr.msra.gmra.mrb[0].mxu1 %v12348_v3  ;;  %v9069_v3 = vpack.c.bf16 %v12847_v55, %v12846_v1 }
 0x5be   : > { %9028 = vmatpush3.bf16.msra.mxu1 %v12229_v53  ;;  %7852 = vmatprep.mubr.f32.mxu1 %v12368_v51  ;;  %v9073_v51 = vpack.c.bf16 %v4984_v7, %v4977_v34 }
 0x5bf   : > { %9030 = vmatprep.subr.bf16.mxu1 %v12246_v45 }
 0x5c1   : > { %7853 = vmatmul.mubr.f32.gmra.mrb[2].mxu1 %v12385_v54 }
 0x5c2   : > { %9032 = vmatpush3.bf16.msra.mxu1 %v12246_v45  ;;  %7887 = vmatprep.mubr.f32.mxu1 %v4880_v59  ;;  %v9061_v59 = vpack.c.bf16 %v4942_v48, %v4935_v22  ;;  %v9077_v22 = vpack.c.bf16 %v4998_v11, %v4991_v58  ;;  %v9081_v48 = vpack.c.bf16 %v5012_v14, %v5005_v33 }
 0x5c3   : > { %9034 = vmatprep.subr.bf16.mxu1 %v12260_v20 }
 0x5c6   : > { %9036 = vmatpush3.bf16.msra.mxu1 %v12260_v20 }
 0x5c7   : > { %9038 = vmatprep.subr.bf16.mxu1 %v12275_v16 }
 0x5ca   : > { %9040 = vmatpush3.bf16.msra.mxu1 %v12275_v16 }
 0x5cb   : > { %9042 = vmatprep.subr.bf16.mxu1 %v12311_v42 }
 0x5ce   : > { %9044 = vmatpush3.bf16.msra.mxu1 %v12311_v42 }
 0x5cf   : > { %9046 = vmatprep.subr.bf16.mxu1 %v12336_v12 }
 0x5d2   : > { %9048 = vmatpush3.bf16.msra.mxu1 %v12336_v12 }
 0x5d3   : > { %9050 = vmatprep.subr.bf16.mxu1 %v12354_v10 }
 0x5d6   : > { %9052 = vmatpush3.bf16.msra.mxu1 %v12354_v10 }
 0x5d7   : > { %9054 = vmatprep.subr.bf16.mxu1 %v12392_v5 }
 0x5da   : > { %9056 = vmatpush3.bf16.msra.mxu1 %v12392_v5 }
 0x5db   : > { %9058 = vmatprep.subr.bf16.mxu1 %v9057_v63 }
 0x5dd   : > { %7888 = vmatmul.mubr.f32.vlgmr.msra.gmra.mrb[0].mxu1 %v12841_v57 }
 0x5de   : > { %9060 = vmatpush3.bf16.msra.mxu1 %v9057_v63  ;;  %7890 = vmatprep.mubr.f32.mxu1 %v12842_v56 }
 0x5df   : > { %9062 = vmatprep.subr.bf16.mxu1 %v9061_v59 }
 0x5e1   : > { %7891 = vmatmul.mubr.f32.gmra.mrb[2].mxu1 %v12845_v40 }
 0x5e2   : > { %9064 = vmatpush3.bf16.msra.mxu1 %v9061_v59  ;;  %7925 = vmatprep.mubr.f32.mxu1 %v12206_v21 }
 0x5e3   : > { %9066 = vmatprep.subr.bf16.mxu1 %v9065_v6 }
 0x5e6   : > { %9068 = vmatpush3.bf16.msra.mxu1 %v9065_v6 }
 0x5e7   : > { %9070 = vmatprep.subr.bf16.mxu1 %v9069_v3 }
 0x5ea   : > { %9072 = vmatpush3.bf16.msra.mxu1 %v9069_v3 }
 0x5eb   : > { %9074 = vmatprep.subr.bf16.mxu1 %v9073_v51 }
 0x5ee   : > { %9076 = vmatpush3.bf16.msra.mxu1 %v9073_v51 }
 0x5ef   : > { %9078 = vmatprep.subr.bf16.mxu1 %v9077_v22 }
 0x5f2   : > { %9080 = vmatpush3.bf16.msra.mxu1 %v9077_v22 }
 0x5f3   : > { %9082 = vmatprep.subr.bf16.mxu1 %v9081_v48 }
 0x5f6   : > { %9084 = vmatpush3.bf16.msra.mxu1 %v9081_v48 }
 0x5f7   : > { %9086 = vmatprep.subr.bf16.mxu1 %v9085_v31 }
 0x5fa   : > { %9088 = vmatpush3.bf16.msra.mxu1 %v9085_v31 }
 0x5fb   : > { %9090 = vmatprep.subr.bf16.mxu1 %v12229_v53 }
 0x5fd   : > { %7926 = vmatmul.mubr.f32.vlgmr.msra.gmra.mrb[0].mxu1 %v12315_v36 }
 0x5fe   : > { %9092 = vmatpush3.bf16.msra.mxu1 %v12229_v53  ;;  %7928 = vmatprep.mubr.f32.mxu1 %v12329_v52 }
 0x5ff   : > { %9094 = vmatprep.subr.bf16.mxu1 %v12246_v45 }
 0x601   : > { %7929 = vmatmul.mubr.f32.gmra.mrb[2].mxu1 %v12357_v62 }
 0x602   : > { %9096 = vmatpush3.bf16.msra.mxu1 %v12246_v45  ;;  %7963 = vmatprep.mubr.f32.mxu1 %v12206_v21  ;;  %v5871_v21 = vld [vmem:[%s12670_s6] ss:$0 sm:$0xff] }
 0x603   : > { %9098 = vmatprep.subr.bf16.mxu1 %v12260_v20 }
 0x606   : > { %9100 = vmatpush3.bf16.msra.mxu1 %v12260_v20 }
 0x607   : > { %9102 = vmatprep.subr.bf16.mxu1 %v12275_v16 }
 0x60a   : > { %9104 = vmatpush3.bf16.msra.mxu1 %v12275_v16 }
 0x60b   : > { %9106 = vmatprep.subr.bf16.mxu1 %v12311_v42 }
 0x60e   : > { %9108 = vmatpush3.bf16.msra.mxu1 %v12311_v42 }
 0x60f   : > { %9110 = vmatprep.subr.bf16.mxu1 %v12336_v12 }
 0x612   : > { %9112 = vmatpush3.bf16.msra.mxu1 %v12336_v12 }
 0x613   : > { %9114 = vmatprep.subr.bf16.mxu1 %v12354_v10 }
 0x616   : > { %9116 = vmatpush3.bf16.msra.mxu1 %v12354_v10 }
 0x617   : > { %9118 = vmatprep.subr.bf16.mxu1 %v12392_v5 }
 0x61a   : > { %9120 = vmatpush3.bf16.msra.mxu1 %v12392_v5 }
 0x61d   : > { %7964 = vmatmul.mubr.f32.vlgmr.msra.gmra.mrb[0].mxu1 %v12315_v36 }
 0x61e   : > { %7966 = vmatprep.mubr.f32.mxu1 %v12329_v52 }
 0x621   : > { %7967 = vmatmul.mubr.f32.gmra.mrb[2].mxu1 %v12357_v62 }
 0x6f0   : > { %v7965_v53 = vpop.f32.mrb[0].mxu1 }
 0x6f1   : > { %v5579_v45 = vadd.f32 %v7965_v53, %v5871_v21  ;;  %v5545_v20 = vpop.f32.mrb[1].mxu1 }
 0x6f2   : > { %v5578_v16 = vadd.f32 %v5871_v21, %v5545_v20 }
 0x6f3   : > { %5583 = vst [vmem:[%s11062_s19 + $0x8] sm:$0xff] %v5579_v45 }
 0x6f4   : > { %5582 = vst [vmem:[%s11062_s19] sm:$0xff] %v5578_v16  ;;  %v7968_v42 = vpop.f32.mrb[2].mxu1 }
 0x6f5   : > { %v5581_v36 = vadd.f32 %v7968_v42, %v5871_v21  ;;  %v5557_v52 = vpop.f32.mrb[3].mxu1 }
 0x6f6   : > { %v5580_v12 = vadd.f32 %v5871_v21, %v5557_v52 }
 0x6f7   : > { %5585 = vst [vmem:[%s11062_s19 + $0x18] sm:$0xff] %v5581_v36 }
 0x6f8   : > { %5584 = vst [vmem:[%s11062_s19 + $0x10] sm:$0xff] %v5580_v12 }
 0x6f9   : > { %9539 = shalt.err (!%p9536_p7)
}
 0x6fa   : > { %s9540_s13 = scalar_lea.hbm %s12615_s22, 512  ;;  %s9544_s9 = scalar_lea.hbm %s12671_s7, 1024 }
 0x6fb   : > { %p9541_p8 = scmp.ne.s32.totalorder %s12615_s22, %s9540_s13  ;;  %p9545_p11 = scmp.lt.u32.totalorder %s12615_s22, %s12671_s7 }
 0x6fc   : > { %p9546_p12 = scmp.lt.u32.totalorder %s9544_s9, %s9540_s13  ;;  %p9548_p0 = scmp.lt.u32.totalorder %s9540_s13, %s12615_s22 }
 0x6fd   : > { %p9542_p9 = pnand %p9541_p8, %p9879_p5 }
 0x6fe   : > { %p9547_p13 = por %p9546_p12, %p9545_p11 }
 0x6ff   : > { %p9543_p10 = pneg %p9542_p9 }
 0x700   : > { %p9549_p1 = por %p9548_p0, %p9547_p13 }
 0x702   : > { %p9550_p2 = pnand %p9549_p1, %p9543_p10 }
 0x704   : > { %9553 = shalt.err (!%p9550_p2)
}
 0x705   : > { %s9799_s14 = smov 128   ;;  %s9800_s17 = smov 8  }
 0x706   : > { %9261 = dma.vmem_to_hbm [thread:$0]  (%p9879_p5), %s12617_s20, 512, %s12615_s22, %s12623_s28, %s9799_s14, %s9799_s14, %s9800_s17  }
 0x707 PF: > { %p9267_p3 = scmp.ge.s32.totalorder %s9692_s27, 2  ;;  %s5615_s18 = sand.u32 1, %s9680_s24  }
 0x708   : > { %s5616_s21 = scalar_lea.sflag [#allocation4], %s5615_s18 }
 0x709   : > { %p9264_p4 = pnand %p9267_p3, %p9883_p6 }
 0x70b   : > { %9675 = dma.done.wait (!%p9264_p4), %s5616_s21, 512  }
 0x70c   : > { %9677 = vsyncadd (!%p9264_p4), %s5616_s21, 4294966784  ;;  %p17_p7 = scmp.ge.s32.totalorder %s9866_s30, 4   ;;  %s12848_s24 = smov %s9684_s25 }
 0x70d   : > { %s12849_s25 = smov %s9688_s26  ;;  %s12850_s26 = smov %s9877_s10 }
 0x70e   : > { %s12851_s27 = smov %s9866_s30  ;;  %19 = sbr.rel (!%p17_p7) target bundleno = 3 (0x3), region = 166 }
 0x715   :  { %5621 = vsyncpa [#allocation4], 1 }
 0x716   :  { %5623 = vsyncpa [#allocation4 + $0x1], 1 }

</bundles_post_ra>
